<compile_context>
chip_gen: v7x
topology: tpu7x:2x2x1
jax: 0.10.0
libtpu: 0.0.40
codegen_flags: <defaults>
</compile_context>

<pallas_src>
import functools
import math

import jax
import jax.numpy as jnp
from jax.experimental import pallas as pl
from jax.experimental.pallas import tpu as pltpu  # noqa: F401  (TPU backend assumed)


CONFIG = {
    "transformer_config": {
        "in_dim": 16,
        "hidden_size": 32,
        "quant_factor": 2,            # -> squasher downsamples T by 2**2 = 4
        "quant_sequence_length": 8,   # T_out
        "num_hidden_layers": 2,
        "num_attention_heads": 4,
        "intermediate_size": 64,
    }
}

_EPS = 1e-5


# ----------------------------------------------------------------------------
# Kernel 1: squasher block 0 — conv(as matmul) + bias + LeakyReLU + BatchNorm
# ----------------------------------------------------------------------------
def _squash0_kernel(cols_ref, w_ref, b_ref, g_ref, beta_ref, o_ref, *, eps):
    y = jnp.dot(cols_ref[...], w_ref[...], preferred_element_type=jnp.float32)
    y = y + b_ref[...]
    y = jnp.where(y >= 0.0, y, 0.2 * y)                       # LeakyReLU(0.2)
    mu = jnp.mean(y, axis=0, keepdims=True)                   # stats over B*L rows
    var = jnp.mean((y - mu) ** 2, axis=0, keepdims=True)
    o_ref[...] = ((y - mu) * jax.lax.rsqrt(var + eps) * g_ref[...]
                  + beta_ref[...]).astype(o_ref.dtype)


# ----------------------------------------------------------------------------
# Kernel 2: squasher block >=1 — conv + bias + LeakyReLU + BatchNorm + MaxPool1d(2)
#   MaxPool is realized by feeding the even / odd output-position columns
#   separately and taking an elementwise max of the two normalized halves.
# ----------------------------------------------------------------------------
def _squash1_kernel(ce_ref, co_ref, w_ref, b_ref, g_ref, beta_ref, o_ref, *, eps):
    w = w_ref[...]
    b = b_ref[...]
    ye = jnp.dot(ce_ref[...], w, preferred_element_type=jnp.float32) + b
    yo = jnp.dot(co_ref[...], w, preferred_element_type=jnp.float32) + b
    ye = jnp.where(ye >= 0.0, ye, 0.2 * ye)
    yo = jnp.where(yo >= 0.0, yo, 0.2 * yo)
    # combined BatchNorm statistics over all (even + odd) = B*L rows
    n = 2.0 * ye.shape[0]
    mu = (jnp.sum(ye, axis=0, keepdims=True)
          + jnp.sum(yo, axis=0, keepdims=True)) / n
    var = (jnp.sum((ye - mu) ** 2, axis=0, keepdims=True)
           + jnp.sum((yo - mu) ** 2, axis=0, keepdims=True)) / n
    inv = jax.lax.rsqrt(var + eps)
    g = g_ref[...]
    beta = beta_ref[...]
    yne = (ye - mu) * inv * g + beta
    yno = (yo - mu) * inv * g + beta
    o_ref[...] = jnp.maximum(yne, yno).astype(o_ref.dtype)    # MaxPool1d(2)


# ----------------------------------------------------------------------------
# Kernel 3: LinearEmbedding (* sqrt(d_model)) + PositionEmbedding add, fused
# ----------------------------------------------------------------------------
def _embed_kernel(x_ref, w_ref, b_ref, pe_ref, o_ref, *, scale):
    y = jnp.dot(x_ref[...], w_ref[...], preferred_element_type=jnp.float32)
    y = (y + b_ref[...]) * scale + pe_ref[...]
    o_ref[...] = y.astype(o_ref.dtype)


# ----------------------------------------------------------------------------
# Kernel 4: one full transformer encoder layer (post-LN, GELU FFN), fused
# ----------------------------------------------------------------------------
def _layer_kernel(x_ref, wqkv_ref, bqkv_ref, wo_ref, bo_ref,
                  ln1g_ref, ln1b_ref, w1_ref, b1_ref, w2_ref, b2_ref,
                  ln2g_ref, ln2b_ref, o_ref, *, B, T, H, eps):
    x = x_ref[...]                                    # (B*T, d)
    M, d = x.shape
    dh = d // H
    scale = 1.0 / math.sqrt(dh)

    # ---- multi-head self-attention ----
    qkv = jnp.dot(x, wqkv_ref[...], preferred_element_type=jnp.float32) + bqkv_ref[...]

    attn = jnp.zeros((M, d), jnp.float32)
    for h in range(H):                                # head-unrolled, batched over B
        qh = (qkv[:, h * dh:(h + 1) * dh] * scale).reshape(B, T, dh)
        kh = qkv[:, d + h * dh: d + (h + 1) * dh].reshape(B, T, dh)
        vh = qkv[:, 2 * d + h * dh: 2 * d + (h + 1) * dh].reshape(B, T, dh)
        s = jnp.einsum("bqd,bkd->bqk", qh, kh, preferred_element_type=jnp.float32)
        s = s - jnp.max(s, axis=-1, keepdims=True)
        p = jnp.exp(s)
        p = p * pl.reciprocal(jnp.sum(p, axis=-1, keepdims=True), approx=True)
        ch = jnp.einsum("bqk,bkd->bqd", p, vh,
                        preferred_element_type=jnp.float32).reshape(M, dh)
        # concat(ctx_heads) @ Wo == sum_h ctx_h @ Wo[h-block]
        attn = attn + jnp.dot(ch, wo_ref[h * dh:(h + 1) * dh, :],
                              preferred_element_type=jnp.float32)
    attn = attn + bo_ref[...]

    def _layernorm(z, g, b):
        mu = jnp.mean(z, axis=-1, keepdims=True)
        var = jnp.mean((z - mu) ** 2, axis=-1, keepdims=True)
        return (z - mu) * jax.lax.rsqrt(var + eps) * g + b

    h1 = _layernorm(attn + x, ln1g_ref[...], ln1b_ref[...])

    # ---- feed-forward ----
    f = jnp.dot(h1, w1_ref[...], preferred_element_type=jnp.float32) + b1_ref[...]
    # TODO(synk): reference BERT-style GELU is erf-based; tanh approximation used here.
    c = math.sqrt(2.0 / math.pi)
    f = 0.5 * f * (1.0 + jnp.tanh(c * (f + 0.044715 * f * f * f)))
    f = jnp.dot(f, w2_ref[...], preferred_element_type=jnp.float32) + b2_ref[...]

    o_ref[...] = _layernorm(f + h1, ln2g_ref[...], ln2b_ref[...]).astype(o_ref.dtype)


# ----------------------------------------------------------------------------
# XLA glue: replicate padding + im2col (gather; no clean Pallas equivalent)
# ----------------------------------------------------------------------------
def conv_im2col(x, K=5, stride=1, pad=2):
    """x:(B,T,Cin) -> (B, Lout, K*Cin) with replicate padding."""
    B, T, Cin = x.shape
    xp = jnp.pad(x, ((0, 0), (pad, pad), (0, 0)), mode="edge")
    Lout = (T + 2 * pad - K) // stride + 1
    cols = jnp.stack(
        [xp[:, k: k + stride * (Lout - 1) + 1: stride, :] for k in range(K)],
        axis=2)                                       # (B, Lout, K, Cin)
    return cols.reshape(B, Lout, K * Cin)


def _full2d(shape):
    return pl.BlockSpec(shape, lambda i: (0, 0))


# ----------------------------------------------------------------------------
# Model pieces
# ----------------------------------------------------------------------------
def squasher_forward(x, params):
    B = x.shape[0]

    # block 0: Conv1d(stride=2) + LeakyReLU + BatchNorm1d  (one pallas_call)
    p = params["squash"][0]
    Cout = p["w"].shape[0]
    cols = conv_im2col(x, stride=2)
    L = cols.shape[1]
    cols2d = cols.reshape(B * L, -1)
    w2d = jnp.transpose(p["w"], (2, 1, 0)).reshape(-1, Cout)
    y = pl.pallas_call(
        functools.partial(_squash0_kernel, eps=_EPS),
        out_shape=jax.ShapeDtypeStruct((B * L, Cout), jnp.float32),
        grid=(1,),
        in_specs=[_full2d(cols2d.shape), _full2d(w2d.shape),
                  _full2d((1, Cout)), _full2d((1, Cout)), _full2d((1, Cout))],
        out_specs=_full2d((B * L, Cout)),
    )(cols2d, w2d, p["b"].reshape(1, -1),
      p["bn_g"].reshape(1, -1), p["bn_b"].reshape(1, -1))
    y = y.reshape(B, L, Cout)

    # blocks 1..: Conv1d(stride=1)+LeakyReLU+BN+MaxPool1d(2)  (one pallas_call each)
    for p in params["squash"][1:]:
        Cout = p["w"].shape[0]
        cols = conv_im2col(y, stride=1)
        L = cols.shape[1]
        Lh = L // 2
        ce = cols[:, 0:2 * Lh:2, :].reshape(B * Lh, -1)   # even output positions
        co = cols[:, 1:2 * Lh:2, :].reshape(B * Lh, -1)   # odd output positions
        w2d = jnp.transpose(p["w"], (2, 1, 0)).reshape(-1, Cout)
        y = pl.pallas_call(
            functools.partial(_squash1_kernel, eps=_EPS),
            out_shape=jax.ShapeDtypeStruct((B * Lh, Cout), jnp.float32),
            grid=(1,),
            in_specs=[_full2d(ce.shape), _full2d(co.shape), _full2d(w2d.shape),
                      _full2d((1, Cout)), _full2d((1, Cout)), _full2d((1, Cout))],
            out_specs=_full2d((B * Lh, Cout)),
        )(ce, co, w2d, p["b"].reshape(1, -1),
          p["bn_g"].reshape(1, -1), p["bn_b"].reshape(1, -1))
        y = y.reshape(B, Lh, Cout)
    return y


def sinusoidal_pe(seq_len, d):
    position = jnp.arange(seq_len, dtype=jnp.float32)[:, None]
    div = jnp.exp(jnp.arange(0, d, 2, dtype=jnp.float32) * (-math.log(10000.0) / d))
    pe = jnp.zeros((seq_len, d), jnp.float32)
    pe = pe.at[:, 0::2].set(jnp.sin(position * div))
    pe = pe.at[:, 1::2].set(jnp.cos(position * div))
    return pe


def transformer_layer(x2d, lp, B, T, H):
    M, d = x2d.shape
    inter = lp["w1"].shape[1]
    return pl.pallas_call(
        functools.partial(_layer_kernel, B=B, T=T, H=H, eps=_EPS),
        out_shape=jax.ShapeDtypeStruct((M, d), jnp.float32),
        grid=(1,),
        in_specs=[
            _full2d((M, d)),            # x
            _full2d((d, 3 * d)),        # wqkv
            _full2d((1, 3 * d)),        # bqkv
            _full2d((d, d)),            # wo
            _full2d((1, d)),            # bo
            _full2d((1, d)),            # ln1_g
            _full2d((1, d)),            # ln1_b
            _full2d((d, inter)),        # w1
            _full2d((1, inter)),        # b1
            _full2d((inter, d)),        # w2
            _full2d((1, d)),            # b2
            _full2d((1, d)),            # ln2_g
            _full2d((1, d)),            # ln2_b
        ],
        out_specs=_full2d((M, d)),
    )(x2d, lp["wqkv"], lp["bqkv"].reshape(1, -1), lp["wo"], lp["bo"].reshape(1, -1),
      lp["ln1_g"].reshape(1, -1), lp["ln1_b"].reshape(1, -1),
      lp["w1"], lp["b1"].reshape(1, -1), lp["w2"], lp["b2"].reshape(1, -1),
      lp["ln2_g"].reshape(1, -1), lp["ln2_b"].reshape(1, -1))


def transformer_encoder_forward(inputs, params, cfg):
    """inputs: (B, T, in_dim)  ->  (B, quant_sequence_length, hidden_size)."""
    tc = cfg["transformer_config"]
    dim, H = tc["hidden_size"], tc["num_attention_heads"]

    y = squasher_forward(inputs, params)                       # (B, T', dim)
    B, T, _ = y.shape
    x2d = y.reshape(B * T, dim)

    # LinearEmbedding (* sqrt(d_model)) + sinusoidal PE add, fused in one kernel.
    # PE slab is a compile-time constant (broadcast over batch, folded under jit).
    pe = jnp.broadcast_to(sinusoidal_pe(T, dim)[None], (B, T, dim)).reshape(B * T, dim)
    x2d = pl.pallas_call(
        functools.partial(_embed_kernel, scale=math.sqrt(dim)),
        out_shape=jax.ShapeDtypeStruct((B * T, dim), jnp.float32),
        grid=(1,),
        in_specs=[_full2d((B * T, dim)), _full2d((dim, dim)),
                  _full2d((1, dim)), _full2d((B * T, dim))],
        out_specs=_full2d((B * T, dim)),
    )(x2d, params["lin_emb"]["w"], params["lin_emb"]["b"].reshape(1, -1), pe)

    for lp in params["layers"]:
        x2d = transformer_layer(x2d, lp, B, T, H)
    return x2d.reshape(B, T, dim)


# ----------------------------------------------------------------------------
# Deterministic parameter init (synthetic; matches module __init__ shapes)
# ----------------------------------------------------------------------------
def init_params(key, cfg):
    tc = cfg["transformer_config"]
    size, dim = tc["in_dim"], tc["hidden_size"]
    qf, nl, inter = tc["quant_factor"], tc["num_hidden_layers"], tc["intermediate_size"]
    keys = iter(jax.random.split(key, 128))

    def nrm(shape, s=0.02):
        return jax.random.normal(next(keys), shape, jnp.float32) * s

    params = {"squash": []}
    params["squash"].append(dict(w=nrm((dim, size, 5)), b=jnp.zeros((dim,)),
                                 bn_g=jnp.ones((dim,)), bn_b=jnp.zeros((dim,))))
    for _ in range(1, qf):
        params["squash"].append(dict(w=nrm((dim, dim, 5)), b=jnp.zeros((dim,)),
                                     bn_g=jnp.ones((dim,)), bn_b=jnp.zeros((dim,))))
    params["lin_emb"] = dict(w=nrm((dim, dim)), b=jnp.zeros((dim,)))
    params["layers"] = []
    for _ in range(nl):
        params["layers"].append(dict(
            wqkv=nrm((dim, 3 * dim)), bqkv=jnp.zeros((3 * dim,)),
            wo=nrm((dim, dim)), bo=jnp.zeros((dim,)),
            ln1_g=jnp.ones((dim,)), ln1_b=jnp.zeros((dim,)),
            w1=nrm((dim, inter)), b1=jnp.zeros((inter,)),
            w2=nrm((inter, dim)), b2=jnp.zeros((dim,)),
            ln2_g=jnp.ones((dim,)), ln2_b=jnp.zeros((dim,)),
        ))
    return params


if __name__ == "__main__":
    cfg = CONFIG
    tc = cfg["transformer_config"]
    B = 2
    T_in = tc["quant_sequence_length"] * (2 ** tc["quant_factor"])  # 32
    key = jax.random.PRNGKey(0)
    kx, kp = jax.random.split(key)
    x = jax.random.normal(kx, (B, T_in, tc["in_dim"]), jnp.float32)
    params = init_params(kp, cfg)

    fwd = jax.jit(functools.partial(transformer_encoder_forward, cfg=cfg))
    out = fwd(x, params)
    out = jax.block_until_ready(out)
    assert out.shape == (B, tc["quant_sequence_length"], tc["hidden_size"])
    assert bool(jnp.all(jnp.isfinite(out)))
    print("KERNEL_OK")
</pallas_src>

<mosaic_0001>
module attributes {stable_mosaic.version = 11 : i64} {
  func.func @_squash0_kernel(%arg0: i32, %arg1: memref<32x80xf32, #tpu.memory_space<vmem>>, %arg2: memref<80x32xf32, #tpu.memory_space<vmem>>, %arg3: memref<1x32xf32, #tpu.memory_space<vmem>>, %arg4: memref<1x32xf32, #tpu.memory_space<vmem>>, %arg5: memref<1x32xf32, #tpu.memory_space<vmem>>, %arg6: memref<32x32xf32, #tpu.memory_space<vmem>>) attributes {dimension_semantics = [#tpu.dimension_semantics<arbitrary>], iteration_bounds = array<i64: 1>, scalar_prefetch = 0 : i64, scratch_operands = 0 : i64, tpu.core_type = #tpu.core_type<tc>, window_params = [{pipeline_mode = #tpu.pipeline_mode<synchronous>, transform_indices = @transform_0, window_bounds = array<i64: 32, 80>}, {pipeline_mode = #tpu.pipeline_mode<synchronous>, transform_indices = @transform_1, window_bounds = array<i64: 80, 32>}, {pipeline_mode = #tpu.pipeline_mode<synchronous>, transform_indices = @transform_2, window_bounds = array<i64: 1, 32>}, {pipeline_mode = #tpu.pipeline_mode<synchronous>, transform_indices = @transform_3, window_bounds = array<i64: 1, 32>}, {pipeline_mode = #tpu.pipeline_mode<synchronous>, transform_indices = @transform_4, window_bounds = array<i64: 1, 32>}, {pipeline_mode = #tpu.pipeline_mode<synchronous>, transform_indices = @transform_5, window_bounds = array<i64: 32, 32>}]} {
    %c0 = arith.constant 0 : index
    %c0_0 = arith.constant 0 : index
    %0 = vector.load %arg1[%c0, %c0_0] : memref<32x80xf32, #tpu.memory_space<vmem>>, vector<32x80xf32>
    %c0_1 = arith.constant 0 : index
    %c0_2 = arith.constant 0 : index
    %1 = vector.load %arg2[%c0_1, %c0_2] : memref<80x32xf32, #tpu.memory_space<vmem>>, vector<80x32xf32>
    %cst = arith.constant dense<0.000000e+00> : vector<32x32xf32>
    %2 = tpu.matmul %0, %1, %cst {dimension_numbers = #tpu.dot_dimension_numbers<[1], [0], [0], [1], [0, 0, 1, 1], [], []>} : vector<32x80xf32>, vector<80x32xf32>, vector<32x32xf32> -> vector<32x32xf32>
    %c0_3 = arith.constant 0 : index
    %c0_4 = arith.constant 0 : index
    %3 = vector.load %arg3[%c0_3, %c0_4] : memref<1x32xf32, #tpu.memory_space<vmem>>, vector<1x32xf32>
    %4 = vector.broadcast %3 : vector<1x32xf32> to vector<32x32xf32>
    %5 = arith.addf %2, %4 : vector<32x32xf32>
    %cst_5 = arith.constant 0.000000e+00 : f32
    %6 = vector.broadcast %cst_5 : f32 to vector<32x32xf32>
    %7 = arith.cmpf oge, %5, %6 : vector<32x32xf32>
    %cst_6 = arith.constant 2.000000e-01 : f32
    %8 = vector.broadcast %cst_6 : f32 to vector<32x32xf32>
    %9 = arith.mulf %8, %5 : vector<32x32xf32>
    %10 = arith.select %7, %5, %9 : vector<32x32xi1>, vector<32x32xf32>
    %cst_7 = arith.constant dense<0.000000e+00> : vector<32xf32>
    %11 = vector.multi_reduction <add>, %10, %cst_7 [0] : vector<32x32xf32> to vector<32xf32>
    %12 = vector.shape_cast %11 : vector<32xf32> to vector<1x32xf32>
    %cst_8 = arith.constant 3.200000e+01 : f32
    %13 = vector.broadcast %cst_8 : f32 to vector<1x32xf32>
    %14 = arith.divf %12, %13 : vector<1x32xf32>
    %15 = vector.broadcast %14 : vector<1x32xf32> to vector<32x32xf32>
    %16 = arith.subf %10, %15 : vector<32x32xf32>
    %17 = arith.mulf %16, %16 : vector<32x32xf32>
    %cst_9 = arith.constant dense<0.000000e+00> : vector<32xf32>
    %18 = vector.multi_reduction <add>, %17, %cst_9 [0] : vector<32x32xf32> to vector<32xf32>
    %19 = vector.shape_cast %18 : vector<32xf32> to vector<1x32xf32>
    %cst_10 = arith.constant 3.200000e+01 : f32
    %20 = vector.broadcast %cst_10 : f32 to vector<1x32xf32>
    %21 = arith.divf %19, %20 : vector<1x32xf32>
    %22 = vector.broadcast %14 : vector<1x32xf32> to vector<32x32xf32>
    %23 = arith.subf %10, %22 : vector<32x32xf32>
    %cst_11 = arith.constant 9.99999974E-6 : f32
    %24 = vector.broadcast %cst_11 : f32 to vector<1x32xf32>
    %25 = arith.addf %21, %24 : vector<1x32xf32>
    %26 = math.rsqrt %25 : vector<1x32xf32>
    %27 = vector.broadcast %26 : vector<1x32xf32> to vector<32x32xf32>
    %28 = arith.mulf %23, %27 : vector<32x32xf32>
    %c0_12 = arith.constant 0 : index
    %c0_13 = arith.constant 0 : index
    %29 = vector.load %arg4[%c0_12, %c0_13] : memref<1x32xf32, #tpu.memory_space<vmem>>, vector<1x32xf32>
    %30 = vector.broadcast %29 : vector<1x32xf32> to vector<32x32xf32>
    %31 = arith.mulf %28, %30 : vector<32x32xf32>
    %c0_14 = arith.constant 0 : index
    %c0_15 = arith.constant 0 : index
    %32 = vector.load %arg5[%c0_14, %c0_15] : memref<1x32xf32, #tpu.memory_space<vmem>>, vector<1x32xf32>
    %33 = vector.broadcast %32 : vector<1x32xf32> to vector<32x32xf32>
    %34 = arith.addf %31, %33 : vector<32x32xf32>
    %c0_16 = arith.constant 0 : index
    %c0_17 = arith.constant 0 : index
    %35 = vector.load %arg6[%c0_16, %c0_17] : memref<32x32xf32, #tpu.memory_space<vmem>>, vector<32x32xf32>
    tpu.vector_store %arg6[%c0_16, %c0_17], %34 {strides = array<i32>} : memref<32x32xf32, #tpu.memory_space<vmem>>, vector<32x32xf32>,
    return
  }
  func.func @transform_0(%arg0: i32) -> (i32, i32) {
    %c0_i32 = arith.constant 0 : i32
    %c0_i32_0 = arith.constant 0 : i32
    %c0_i32_1 = arith.constant 0 : i32
    return %c0_i32, %c0_i32_0 : i32, i32
  }
  func.func @transform_1(%arg0: i32) -> (i32, i32) {
    %c0_i32 = arith.constant 0 : i32
    %c0_i32_0 = arith.constant 0 : i32
    %c0_i32_1 = arith.constant 0 : i32
    return %c0_i32, %c0_i32_0 : i32, i32
  }
  func.func @transform_2(%arg0: i32) -> (i32, i32) {
    %c0_i32 = arith.constant 0 : i32
    %c0_i32_0 = arith.constant 0 : i32
    %c0_i32_1 = arith.constant 0 : i32
    return %c0_i32, %c0_i32_0 : i32, i32
  }
  func.func @transform_3(%arg0: i32) -> (i32, i32) {
    %c0_i32 = arith.constant 0 : i32
    %c0_i32_0 = arith.constant 0 : i32
    %c0_i32_1 = arith.constant 0 : i32
    return %c0_i32, %c0_i32_0 : i32, i32
  }
  func.func @transform_4(%arg0: i32) -> (i32, i32) {
    %c0_i32 = arith.constant 0 : i32
    %c0_i32_0 = arith.constant 0 : i32
    %c0_i32_1 = arith.constant 0 : i32
    return %c0_i32, %c0_i32_0 : i32, i32
  }
  func.func @transform_5(%arg0: i32) -> (i32, i32) {
    %c0_i32 = arith.constant 0 : i32
    %c0_i32_0 = arith.constant 0 : i32
    %c0_i32_1 = arith.constant 0 : i32
    return %c0_i32, %c0_i32_0 : i32, i32
  }
}

module attributes {stable_mosaic.version = 11 : i64} {
  func.func @_squash1_kernel(%arg0: i32, %arg1: memref<16x160xf32, #tpu.memory_space<vmem>>, %arg2: memref<16x160xf32, #tpu.memory_space<vmem>>, %arg3: memref<160x32xf32, #tpu.memory_space<vmem>>, %arg4: memref<1x32xf32, #tpu.memory_space<vmem>>, %arg5: memref<1x32xf32, #tpu.memory_space<vmem>>, %arg6: memref<1x32xf32, #tpu.memory_space<vmem>>, %arg7: memref<16x32xf32, #tpu.memory_space<vmem>>) attributes {dimension_semantics = [#tpu.dimension_semantics<arbitrary>], iteration_bounds = array<i64: 1>, scalar_prefetch = 0 : i64, scratch_operands = 0 : i64, tpu.core_type = #tpu.core_type<tc>, window_params = [{pipeline_mode = #tpu.pipeline_mode<synchronous>, transform_indices = @transform_0, window_bounds = array<i64: 16, 160>}, {pipeline_mode = #tpu.pipeline_mode<synchronous>, transform_indices = @transform_1, window_bounds = array<i64: 16, 160>}, {pipeline_mode = #tpu.pipeline_mode<synchronous>, transform_indices = @transform_2, window_bounds = array<i64: 160, 32>}, {pipeline_mode = #tpu.pipeline_mode<synchronous>, transform_indices = @transform_3, window_bounds = array<i64: 1, 32>}, {pipeline_mode = #tpu.pipeline_mode<synchronous>, transform_indices = @transform_4, window_bounds = array<i64: 1, 32>}, {pipeline_mode = #tpu.pipeline_mode<synchronous>, transform_indices = @transform_5, window_bounds = array<i64: 1, 32>}, {pipeline_mode = #tpu.pipeline_mode<synchronous>, transform_indices = @transform_6, window_bounds = array<i64: 16, 32>}]} {
    %c0 = arith.constant 0 : index
    %c0_0 = arith.constant 0 : index
    %0 = vector.load %arg3[%c0, %c0_0] : memref<160x32xf32, #tpu.memory_space<vmem>>, vector<160x32xf32>
    %c0_1 = arith.constant 0 : index
    %c0_2 = arith.constant 0 : index
    %1 = vector.load %arg4[%c0_1, %c0_2] : memref<1x32xf32, #tpu.memory_space<vmem>>, vector<1x32xf32>
    %c0_3 = arith.constant 0 : index
    %c0_4 = arith.constant 0 : index
    %2 = vector.load %arg1[%c0_3, %c0_4] : memref<16x160xf32, #tpu.memory_space<vmem>>, vector<16x160xf32>
    %cst = arith.constant dense<0.000000e+00> : vector<16x32xf32>
    %3 = tpu.matmul %2, %0, %cst {dimension_numbers = #tpu.dot_dimension_numbers<[1], [0], [0], [1], [0, 0, 1, 1], [], []>} : vector<16x160xf32>, vector<160x32xf32>, vector<16x32xf32> -> vector<16x32xf32>
    %4 = vector.broadcast %1 : vector<1x32xf32> to vector<16x32xf32>
    %5 = arith.addf %3, %4 : vector<16x32xf32>
    %c0_5 = arith.constant 0 : index
    %c0_6 = arith.constant 0 : index
    %6 = vector.load %arg2[%c0_5, %c0_6] : memref<16x160xf32, #tpu.memory_space<vmem>>, vector<16x160xf32>
    %cst_7 = arith.constant dense<0.000000e+00> : vector<16x32xf32>
    %7 = tpu.matmul %6, %0, %cst_7 {dimension_numbers = #tpu.dot_dimension_numbers<[1], [0], [0], [1], [0, 0, 1, 1], [], []>} : vector<16x160xf32>, vector<160x32xf32>, vector<16x32xf32> -> vector<16x32xf32>
    %8 = vector.broadcast %1 : vector<1x32xf32> to vector<16x32xf32>
    %9 = arith.addf %7, %8 : vector<16x32xf32>
    %cst_8 = arith.constant 0.000000e+00 : f32
    %10 = vector.broadcast %cst_8 : f32 to vector<16x32xf32>
    %11 = arith.cmpf oge, %5, %10 : vector<16x32xf32>
    %cst_9 = arith.constant 2.000000e-01 : f32
    %12 = vector.broadcast %cst_9 : f32 to vector<16x32xf32>
    %13 = arith.mulf %12, %5 : vector<16x32xf32>
    %14 = arith.select %11, %5, %13 : vector<16x32xi1>, vector<16x32xf32>
    %cst_10 = arith.constant 0.000000e+00 : f32
    %15 = vector.broadcast %cst_10 : f32 to vector<16x32xf32>
    %16 = arith.cmpf oge, %9, %15 : vector<16x32xf32>
    %cst_11 = arith.constant 2.000000e-01 : f32
    %17 = vector.broadcast %cst_11 : f32 to vector<16x32xf32>
    %18 = arith.mulf %17, %9 : vector<16x32xf32>
    %19 = arith.select %16, %9, %18 : vector<16x32xi1>, vector<16x32xf32>
    %cst_12 = arith.constant dense<0.000000e+00> : vector<32xf32>
    %20 = vector.multi_reduction <add>, %14, %cst_12 [0] : vector<16x32xf32> to vector<32xf32>
    %21 = vector.shape_cast %20 : vector<32xf32> to vector<1x32xf32>
    %cst_13 = arith.constant dense<0.000000e+00> : vector<32xf32>
    %22 = vector.multi_reduction <add>, %19, %cst_13 [0] : vector<16x32xf32> to vector<32xf32>
    %23 = vector.shape_cast %22 : vector<32xf32> to vector<1x32xf32>
    %24 = arith.addf %21, %23 : vector<1x32xf32>
    %cst_14 = arith.constant 3.200000e+01 : f32
    %25 = vector.broadcast %cst_14 : f32 to vector<1x32xf32>
    %26 = arith.divf %24, %25 : vector<1x32xf32>
    %27 = vector.broadcast %26 : vector<1x32xf32> to vector<16x32xf32>
    %28 = arith.subf %14, %27 : vector<16x32xf32>
    %29 = arith.mulf %28, %28 : vector<16x32xf32>
    %cst_15 = arith.constant dense<0.000000e+00> : vector<32xf32>
    %30 = vector.multi_reduction <add>, %29, %cst_15 [0] : vector<16x32xf32> to vector<32xf32>
    %31 = vector.shape_cast %30 : vector<32xf32> to vector<1x32xf32>
    %32 = vector.broadcast %26 : vector<1x32xf32> to vector<16x32xf32>
    %33 = arith.subf %19, %32 : vector<16x32xf32>
    %34 = arith.mulf %33, %33 : vector<16x32xf32>
    %cst_16 = arith.constant dense<0.000000e+00> : vector<32xf32>
    %35 = vector.multi_reduction <add>, %34, %cst_16 [0] : vector<16x32xf32> to vector<32xf32>
    %36 = vector.shape_cast %35 : vector<32xf32> to vector<1x32xf32>
    %37 = arith.addf %31, %36 : vector<1x32xf32>
    %cst_17 = arith.constant 3.200000e+01 : f32
    %38 = vector.broadcast %cst_17 : f32 to vector<1x32xf32>
    %39 = arith.divf %37, %38 : vector<1x32xf32>
    %cst_18 = arith.constant 9.99999974E-6 : f32
    %40 = vector.broadcast %cst_18 : f32 to vector<1x32xf32>
    %41 = arith.addf %39, %40 : vector<1x32xf32>
    %42 = math.rsqrt %41 : vector<1x32xf32>
    %c0_19 = arith.constant 0 : index
    %c0_20 = arith.constant 0 : index
    %43 = vector.load %arg5[%c0_19, %c0_20] : memref<1x32xf32, #tpu.memory_space<vmem>>, vector<1x32xf32>
    %c0_21 = arith.constant 0 : index
    %c0_22 = arith.constant 0 : index
    %44 = vector.load %arg6[%c0_21, %c0_22] : memref<1x32xf32, #tpu.memory_space<vmem>>, vector<1x32xf32>
    %45 = vector.broadcast %26 : vector<1x32xf32> to vector<16x32xf32>
    %46 = arith.subf %14, %45 : vector<16x32xf32>
    %47 = vector.broadcast %42 : vector<1x32xf32> to vector<16x32xf32>
    %48 = arith.mulf %46, %47 : vector<16x32xf32>
    %49 = vector.broadcast %43 : vector<1x32xf32> to vector<16x32xf32>
    %50 = arith.mulf %48, %49 : vector<16x32xf32>
    %51 = vector.broadcast %44 : vector<1x32xf32> to vector<16x32xf32>
    %52 = arith.addf %50, %51 : vector<16x32xf32>
    %53 = vector.broadcast %26 : vector<1x32xf32> to vector<16x32xf32>
    %54 = arith.subf %19, %53 : vector<16x32xf32>
    %55 = vector.broadcast %42 : vector<1x32xf32> to vector<16x32xf32>
    %56 = arith.mulf %54, %55 : vector<16x32xf32>
    %57 = vector.broadcast %43 : vector<1x32xf32> to vector<16x32xf32>
    %58 = arith.mulf %56, %57 : vector<16x32xf32>
    %59 = vector.broadcast %44 : vector<1x32xf32> to vector<16x32xf32>
    %60 = arith.addf %58, %59 : vector<16x32xf32>
    %61 = arith.maximumf %52, %60 : vector<16x32xf32>
    %c0_23 = arith.constant 0 : index
    %c0_24 = arith.constant 0 : index
    %62 = vector.load %arg7[%c0_23, %c0_24] : memref<16x32xf32, #tpu.memory_space<vmem>>, vector<16x32xf32>
    tpu.vector_store %arg7[%c0_23, %c0_24], %61 {strides = array<i32>} : memref<16x32xf32, #tpu.memory_space<vmem>>, vector<16x32xf32>,
    return
  }
  func.func @transform_0(%arg0: i32) -> (i32, i32) {
    %c0_i32 = arith.constant 0 : i32
    %c0_i32_0 = arith.constant 0 : i32
    %c0_i32_1 = arith.constant 0 : i32
    return %c0_i32, %c0_i32_0 : i32, i32
  }
  func.func @transform_1(%arg0: i32) -> (i32, i32) {
    %c0_i32 = arith.constant 0 : i32
    %c0_i32_0 = arith.constant 0 : i32
    %c0_i32_1 = arith.constant 0 : i32
    return %c0_i32, %c0_i32_0 : i32, i32
  }
  func.func @transform_2(%arg0: i32) -> (i32, i32) {
    %c0_i32 = arith.constant 0 : i32
    %c0_i32_0 = arith.constant 0 : i32
    %c0_i32_1 = arith.constant 0 : i32
    return %c0_i32, %c0_i32_0 : i32, i32
  }
  func.func @transform_3(%arg0: i32) -> (i32, i32) {
    %c0_i32 = arith.constant 0 : i32
    %c0_i32_0 = arith.constant 0 : i32
    %c0_i32_1 = arith.constant 0 : i32
    return %c0_i32, %c0_i32_0 : i32, i32
  }
  func.func @transform_4(%arg0: i32) -> (i32, i32) {
    %c0_i32 = arith.constant 0 : i32
    %c0_i32_0 = arith.constant 0 : i32
    %c0_i32_1 = arith.constant 0 : i32
    return %c0_i32, %c0_i32_0 : i32, i32
  }
  func.func @transform_5(%arg0: i32) -> (i32, i32) {
    %c0_i32 = arith.constant 0 : i32
    %c0_i32_0 = arith.constant 0 : i32
    %c0_i32_1 = arith.constant 0 : i32
    return %c0_i32, %c0_i32_0 : i32, i32
  }
  func.func @transform_6(%arg0: i32) -> (i32, i32) {
    %c0_i32 = arith.constant 0 : i32
    %c0_i32_0 = arith.constant 0 : i32
    %c0_i32_1 = arith.constant 0 : i32
    return %c0_i32, %c0_i32_0 : i32, i32
  }
}

module attributes {stable_mosaic.version = 11 : i64} {
  func.func @_embed_kernel(%arg0: i32, %arg1: memref<16x32xf32, #tpu.memory_space<vmem>>, %arg2: memref<32x32xf32, #tpu.memory_space<vmem>>, %arg3: memref<1x32xf32, #tpu.memory_space<vmem>>, %arg4: memref<16x32xf32, #tpu.memory_space<vmem>>, %arg5: memref<16x32xf32, #tpu.memory_space<vmem>>) attributes {dimension_semantics = [#tpu.dimension_semantics<arbitrary>], iteration_bounds = array<i64: 1>, scalar_prefetch = 0 : i64, scratch_operands = 0 : i64, tpu.core_type = #tpu.core_type<tc>, window_params = [{pipeline_mode = #tpu.pipeline_mode<synchronous>, transform_indices = @transform_0, window_bounds = array<i64: 16, 32>}, {pipeline_mode = #tpu.pipeline_mode<synchronous>, transform_indices = @transform_1, window_bounds = array<i64: 32, 32>}, {pipeline_mode = #tpu.pipeline_mode<synchronous>, transform_indices = @transform_2, window_bounds = array<i64: 1, 32>}, {pipeline_mode = #tpu.pipeline_mode<synchronous>, transform_indices = @transform_3, window_bounds = array<i64: 16, 32>}, {pipeline_mode = #tpu.pipeline_mode<synchronous>, transform_indices = @transform_4, window_bounds = array<i64: 16, 32>}]} {
    %c0 = arith.constant 0 : index
    %c0_0 = arith.constant 0 : index
    %0 = vector.load %arg1[%c0, %c0_0] : memref<16x32xf32, #tpu.memory_space<vmem>>, vector<16x32xf32>
    %c0_1 = arith.constant 0 : index
    %c0_2 = arith.constant 0 : index
    %1 = vector.load %arg2[%c0_1, %c0_2] : memref<32x32xf32, #tpu.memory_space<vmem>>, vector<32x32xf32>
    %cst = arith.constant dense<0.000000e+00> : vector<16x32xf32>
    %2 = tpu.matmul %0, %1, %cst {dimension_numbers = #tpu.dot_dimension_numbers<[1], [0], [0], [1], [0, 0, 1, 1], [], []>} : vector<16x32xf32>, vector<32x32xf32>, vector<16x32xf32> -> vector<16x32xf32>
    %c0_3 = arith.constant 0 : index
    %c0_4 = arith.constant 0 : index
    %3 = vector.load %arg3[%c0_3, %c0_4] : memref<1x32xf32, #tpu.memory_space<vmem>>, vector<1x32xf32>
    %4 = vector.broadcast %3 : vector<1x32xf32> to vector<16x32xf32>
    %5 = arith.addf %2, %4 : vector<16x32xf32>
    %cst_5 = arith.constant 5.65685415 : f32
    %6 = vector.broadcast %cst_5 : f32 to vector<16x32xf32>
    %7 = arith.mulf %5, %6 : vector<16x32xf32>
    %c0_6 = arith.constant 0 : index
    %c0_7 = arith.constant 0 : index
    %8 = vector.load %arg4[%c0_6, %c0_7] : memref<16x32xf32, #tpu.memory_space<vmem>>, vector<16x32xf32>
    %9 = arith.addf %7, %8 : vector<16x32xf32>
    %c0_8 = arith.constant 0 : index
    %c0_9 = arith.constant 0 : index
    %10 = vector.load %arg5[%c0_8, %c0_9] : memref<16x32xf32, #tpu.memory_space<vmem>>, vector<16x32xf32>
    tpu.vector_store %arg5[%c0_8, %c0_9], %9 {strides = array<i32>} : memref<16x32xf32, #tpu.memory_space<vmem>>, vector<16x32xf32>,
    return
  }
  func.func @transform_0(%arg0: i32) -> (i32, i32) {
    %c0_i32 = arith.constant 0 : i32
    %c0_i32_0 = arith.constant 0 : i32
    %c0_i32_1 = arith.constant 0 : i32
    return %c0_i32, %c0_i32_0 : i32, i32
  }
  func.func @transform_1(%arg0: i32) -> (i32, i32) {
    %c0_i32 = arith.constant 0 : i32
    %c0_i32_0 = arith.constant 0 : i32
    %c0_i32_1 = arith.constant 0 : i32
    return %c0_i32, %c0_i32_0 : i32, i32
  }
  func.func @transform_2(%arg0: i32) -> (i32, i32) {
    %c0_i32 = arith.constant 0 : i32
    %c0_i32_0 = arith.constant 0 : i32
    %c0_i32_1 = arith.constant 0 : i32
    return %c0_i32, %c0_i32_0 : i32, i32
  }
  func.func @transform_3(%arg0: i32) -> (i32, i32) {
    %c0_i32 = arith.constant 0 : i32
    %c0_i32_0 = arith.constant 0 : i32
    %c0_i32_1 = arith.constant 0 : i32
    return %c0_i32, %c0_i32_0 : i32, i32
  }
  func.func @transform_4(%arg0: i32) -> (i32, i32) {
    %c0_i32 = arith.constant 0 : i32
    %c0_i32_0 = arith.constant 0 : i32
    %c0_i32_1 = arith.constant 0 : i32
    return %c0_i32, %c0_i32_0 : i32, i32
  }
}

module attributes {stable_mosaic.version = 11 : i64} {
  func.func @_layer_kernel(%arg0: i32, %arg1: memref<16x32xf32, #tpu.memory_space<vmem>>, %arg2: memref<32x96xf32, #tpu.memory_space<vmem>>, %arg3: memref<1x96xf32, #tpu.memory_space<vmem>>, %arg4: memref<32x32xf32, #tpu.memory_space<vmem>>, %arg5: memref<1x32xf32, #tpu.memory_space<vmem>>, %arg6: memref<1x32xf32, #tpu.memory_space<vmem>>, %arg7: memref<1x32xf32, #tpu.memory_space<vmem>>, %arg8: memref<32x64xf32, #tpu.memory_space<vmem>>, %arg9: memref<1x64xf32, #tpu.memory_space<vmem>>, %arg10: memref<64x32xf32, #tpu.memory_space<vmem>>, %arg11: memref<1x32xf32, #tpu.memory_space<vmem>>, %arg12: memref<1x32xf32, #tpu.memory_space<vmem>>, %arg13: memref<1x32xf32, #tpu.memory_space<vmem>>, %arg14: memref<16x32xf32, #tpu.memory_space<vmem>>) attributes {dimension_semantics = [#tpu.dimension_semantics<arbitrary>], iteration_bounds = array<i64: 1>, scalar_prefetch = 0 : i64, scratch_operands = 0 : i64, tpu.core_type = #tpu.core_type<tc>, window_params = [{pipeline_mode = #tpu.pipeline_mode<synchronous>, transform_indices = @transform_0, window_bounds = array<i64: 16, 32>}, {pipeline_mode = #tpu.pipeline_mode<synchronous>, transform_indices = @transform_1, window_bounds = array<i64: 32, 96>}, {pipeline_mode = #tpu.pipeline_mode<synchronous>, transform_indices = @transform_2, window_bounds = array<i64: 1, 96>}, {pipeline_mode = #tpu.pipeline_mode<synchronous>, transform_indices = @transform_3, window_bounds = array<i64: 32, 32>}, {pipeline_mode = #tpu.pipeline_mode<synchronous>, transform_indices = @transform_4, window_bounds = array<i64: 1, 32>}, {pipeline_mode = #tpu.pipeline_mode<synchronous>, transform_indices = @transform_5, window_bounds = array<i64: 1, 32>}, {pipeline_mode = #tpu.pipeline_mode<synchronous>, transform_indices = @transform_6, window_bounds = array<i64: 1, 32>}, {pipeline_mode = #tpu.pipeline_mode<synchronous>, transform_indices = @transform_7, window_bounds = array<i64: 32, 64>}, {pipeline_mode = #tpu.pipeline_mode<synchronous>, transform_indices = @transform_8, window_bounds = array<i64: 1, 64>}, {pipeline_mode = #tpu.pipeline_mode<synchronous>, transform_indices = @transform_9, window_bounds = array<i64: 64, 32>}, {pipeline_mode = #tpu.pipeline_mode<synchronous>, transform_indices = @transform_10, window_bounds = array<i64: 1, 32>}, {pipeline_mode = #tpu.pipeline_mode<synchronous>, transform_indices = @transform_11, window_bounds = array<i64: 1, 32>}, {pipeline_mode = #tpu.pipeline_mode<synchronous>, transform_indices = @transform_12, window_bounds = array<i64: 1, 32>}, {pipeline_mode = #tpu.pipeline_mode<synchronous>, transform_indices = @transform_13, window_bounds = array<i64: 16, 32>}]} {
    %c0 = arith.constant 0 : index
    %c0_0 = arith.constant 0 : index
    %0 = vector.load %arg1[%c0, %c0_0] : memref<16x32xf32, #tpu.memory_space<vmem>>, vector<16x32xf32>
    %c0_1 = arith.constant 0 : index
    %c0_2 = arith.constant 0 : index
    %1 = vector.load %arg2[%c0_1, %c0_2] : memref<32x96xf32, #tpu.memory_space<vmem>>, vector<32x96xf32>
    %cst = arith.constant dense<0.000000e+00> : vector<16x96xf32>
    %2 = tpu.matmul %0, %1, %cst {dimension_numbers = #tpu.dot_dimension_numbers<[1], [0], [0], [1], [0, 0, 1, 1], [], []>} : vector<16x32xf32>, vector<32x96xf32>, vector<16x96xf32> -> vector<16x96xf32>
    %c0_3 = arith.constant 0 : index
    %c0_4 = arith.constant 0 : index
    %3 = vector.load %arg3[%c0_3, %c0_4] : memref<1x96xf32, #tpu.memory_space<vmem>>, vector<1x96xf32>
    %4 = vector.broadcast %3 : vector<1x96xf32> to vector<16x96xf32>
    %5 = arith.addf %2, %4 : vector<16x96xf32>
    %cst_5 = arith.constant 0.000000e+00 : f32
    %6 = vector.broadcast %cst_5 : f32 to vector<16x32xf32>
    %7 = vector.extract_strided_slice %5 {offsets = [0, 0], sizes = [16, 8], strides = [1, 1]} : vector<16x96xf32> to vector<16x8xf32>
    %cst_6 = arith.constant 0.353553385 : f32
    %8 = vector.broadcast %cst_6 : f32 to vector<16x8xf32>
    %9 = arith.mulf %7, %8 : vector<16x8xf32>
    %10 = vector.shape_cast %9 : vector<16x8xf32> to vector<2x8x8xf32>
    %11 = vector.extract_strided_slice %5 {offsets = [0, 32], sizes = [16, 8], strides = [1, 1]} : vector<16x96xf32> to vector<16x8xf32>
    %12 = vector.shape_cast %11 : vector<16x8xf32> to vector<2x8x8xf32>
    %13 = vector.extract_strided_slice %5 {offsets = [0, 64], sizes = [16, 8], strides = [1, 1]} : vector<16x96xf32> to vector<16x8xf32>
    %14 = vector.shape_cast %13 : vector<16x8xf32> to vector<2x8x8xf32>
    "tpu.trace_start"() <{level = 10 : i32, message = "bqd,bkd->bqk"}> : () -> ()
    %cst_7 = arith.constant dense<0.000000e+00> : vector<2x8x8xf32>
    %15 = tpu.matmul %10, %12, %cst_7 {dimension_numbers = #tpu.dot_dimension_numbers<[2], [2], [1], [1], [0, 0, 0, 1, 1, 1], [0], [0]>} : vector<2x8x8xf32>, vector<2x8x8xf32>, vector<2x8x8xf32> -> vector<2x8x8xf32>
    "tpu.trace_stop"() : () -> ()
    %cst_8 = arith.constant dense<0xFF800000> : vector<2x8xf32>
    %16 = vector.multi_reduction <maximumf>, %15, %cst_8 [2] : vector<2x8x8xf32> to vector<2x8xf32>
    %17 = vector.shape_cast %16 : vector<2x8xf32> to vector<2x8x1xf32>
    %18 = vector.broadcast %17 : vector<2x8x1xf32> to vector<2x8x8xf32>
    %19 = arith.subf %15, %18 : vector<2x8x8xf32>
    %20 = math.exp %19 : vector<2x8x8xf32>
    %cst_9 = arith.constant dense<0.000000e+00> : vector<2x8xf32>
    %21 = vector.multi_reduction <add>, %20, %cst_9 [2] : vector<2x8x8xf32> to vector<2x8xf32>
    %22 = vector.shape_cast %21 : vector<2x8xf32> to vector<2x8x1xf32>
    %23 = tpu.reciprocal %22 {approx = true} : vector<2x8x1xf32> -> vector<2x8x1xf32>
    %24 = vector.broadcast %23 : vector<2x8x1xf32> to vector<2x8x8xf32>
    %25 = arith.mulf %20, %24 : vector<2x8x8xf32>
    "tpu.trace_start"() <{level = 10 : i32, message = "bqk,bkd->bqd"}> : () -> ()
    %cst_10 = arith.constant dense<0.000000e+00> : vector<2x8x8xf32>
    %26 = tpu.matmul %25, %14, %cst_10 {dimension_numbers = #tpu.dot_dimension_numbers<[2], [1], [1], [2], [0, 0, 0, 1, 1, 2], [0], [0]>} : vector<2x8x8xf32>, vector<2x8x8xf32>, vector<2x8x8xf32> -> vector<2x8x8xf32>
    "tpu.trace_stop"() : () -> ()
    %27 = vector.shape_cast %26 : vector<2x8x8xf32> to vector<16x8xf32>
    %c0_11 = arith.constant 0 : index
    %c0_12 = arith.constant 0 : index
    %28 = vector.load %arg4[%c0_11, %c0_12] : memref<32x32xf32, #tpu.memory_space<vmem>>, vector<8x32xf32>
    %cst_13 = arith.constant dense<0.000000e+00> : vector<16x32xf32>
    %29 = tpu.matmul %27, %28, %cst_13 {dimension_numbers = #tpu.dot_dimension_numbers<[1], [0], [0], [1], [0, 0, 1, 1], [], []>} : vector<16x8xf32>, vector<8x32xf32>, vector<16x32xf32> -> vector<16x32xf32>
    %30 = arith.addf %6, %29 : vector<16x32xf32>
    %31 = vector.extract_strided_slice %5 {offsets = [0, 8], sizes = [16, 8], strides = [1, 1]} : vector<16x96xf32> to vector<16x8xf32>
    %cst_14 = arith.constant 0.353553385 : f32
    %32 = vector.broadcast %cst_14 : f32 to vector<16x8xf32>
    %33 = arith.mulf %31, %32 : vector<16x8xf32>
    %34 = vector.shape_cast %33 : vector<16x8xf32> to vector<2x8x8xf32>
    %35 = vector.extract_strided_slice %5 {offsets = [0, 40], sizes = [16, 8], strides = [1, 1]} : vector<16x96xf32> to vector<16x8xf32>
    %36 = vector.shape_cast %35 : vector<16x8xf32> to vector<2x8x8xf32>
    %37 = vector.extract_strided_slice %5 {offsets = [0, 72], sizes = [16, 8], strides = [1, 1]} : vector<16x96xf32> to vector<16x8xf32>
    %38 = vector.shape_cast %37 : vector<16x8xf32> to vector<2x8x8xf32>
    "tpu.trace_start"() <{level = 10 : i32, message = "bqd,bkd->bqk"}> : () -> ()
    %cst_15 = arith.constant dense<0.000000e+00> : vector<2x8x8xf32>
    %39 = tpu.matmul %34, %36, %cst_15 {dimension_numbers = #tpu.dot_dimension_numbers<[2], [2], [1], [1], [0, 0, 0, 1, 1, 1], [0], [0]>} : vector<2x8x8xf32>, vector<2x8x8xf32>, vector<2x8x8xf32> -> vector<2x8x8xf32>
    "tpu.trace_stop"() : () -> ()
    %cst_16 = arith.constant dense<0xFF800000> : vector<2x8xf32>
    %40 = vector.multi_reduction <maximumf>, %39, %cst_16 [2] : vector<2x8x8xf32> to vector<2x8xf32>
    %41 = vector.shape_cast %40 : vector<2x8xf32> to vector<2x8x1xf32>
    %42 = vector.broadcast %41 : vector<2x8x1xf32> to vector<2x8x8xf32>
    %43 = arith.subf %39, %42 : vector<2x8x8xf32>
    %44 = math.exp %43 : vector<2x8x8xf32>
    %cst_17 = arith.constant dense<0.000000e+00> : vector<2x8xf32>
    %45 = vector.multi_reduction <add>, %44, %cst_17 [2] : vector<2x8x8xf32> to vector<2x8xf32>
    %46 = vector.shape_cast %45 : vector<2x8xf32> to vector<2x8x1xf32>
    %47 = tpu.reciprocal %46 {approx = true} : vector<2x8x1xf32> -> vector<2x8x1xf32>
    %48 = vector.broadcast %47 : vector<2x8x1xf32> to vector<2x8x8xf32>
    %49 = arith.mulf %44, %48 : vector<2x8x8xf32>
    "tpu.trace_start"() <{level = 10 : i32, message = "bqk,bkd->bqd"}> : () -> ()
    %cst_18 = arith.constant dense<0.000000e+00> : vector<2x8x8xf32>
    %50 = tpu.matmul %49, %38, %cst_18 {dimension_numbers = #tpu.dot_dimension_numbers<[2], [1], [1], [2], [0, 0, 0, 1, 1, 2], [0], [0]>} : vector<2x8x8xf32>, vector<2x8x8xf32>, vector<2x8x8xf32> -> vector<2x8x8xf32>
    "tpu.trace_stop"() : () -> ()
    %51 = vector.shape_cast %50 : vector<2x8x8xf32> to vector<16x8xf32>
    %c8 = arith.constant 8 : index
    %c0_19 = arith.constant 0 : index
    %52 = vector.load %arg4[%c8, %c0_19] : memref<32x32xf32, #tpu.memory_space<vmem>>, vector<8x32xf32>
    %cst_20 = arith.constant dense<0.000000e+00> : vector<16x32xf32>
    %53 = tpu.matmul %51, %52, %cst_20 {dimension_numbers = #tpu.dot_dimension_numbers<[1], [0], [0], [1], [0, 0, 1, 1], [], []>} : vector<16x8xf32>, vector<8x32xf32>, vector<16x32xf32> -> vector<16x32xf32>
    %54 = arith.addf %30, %53 : vector<16x32xf32>
    %55 = vector.extract_strided_slice %5 {offsets = [0, 16], sizes = [16, 8], strides = [1, 1]} : vector<16x96xf32> to vector<16x8xf32>
    %cst_21 = arith.constant 0.353553385 : f32
    %56 = vector.broadcast %cst_21 : f32 to vector<16x8xf32>
    %57 = arith.mulf %55, %56 : vector<16x8xf32>
    %58 = vector.shape_cast %57 : vector<16x8xf32> to vector<2x8x8xf32>
    %59 = vector.extract_strided_slice %5 {offsets = [0, 48], sizes = [16, 8], strides = [1, 1]} : vector<16x96xf32> to vector<16x8xf32>
    %60 = vector.shape_cast %59 : vector<16x8xf32> to vector<2x8x8xf32>
    %61 = vector.extract_strided_slice %5 {offsets = [0, 80], sizes = [16, 8], strides = [1, 1]} : vector<16x96xf32> to vector<16x8xf32>
    %62 = vector.shape_cast %61 : vector<16x8xf32> to vector<2x8x8xf32>
    "tpu.trace_start"() <{level = 10 : i32, message = "bqd,bkd->bqk"}> : () -> ()
    %cst_22 = arith.constant dense<0.000000e+00> : vector<2x8x8xf32>
    %63 = tpu.matmul %58, %60, %cst_22 {dimension_numbers = #tpu.dot_dimension_numbers<[2], [2], [1], [1], [0, 0, 0, 1, 1, 1], [0], [0]>} : vector<2x8x8xf32>, vector<2x8x8xf32>, vector<2x8x8xf32> -> vector<2x8x8xf32>
    "tpu.trace_stop"() : () -> ()
    %cst_23 = arith.constant dense<0xFF800000> : vector<2x8xf32>
    %64 = vector.multi_reduction <maximumf>, %63, %cst_23 [2] : vector<2x8x8xf32> to vector<2x8xf32>
    %65 = vector.shape_cast %64 : vector<2x8xf32> to vector<2x8x1xf32>
    %66 = vector.broadcast %65 : vector<2x8x1xf32> to vector<2x8x8xf32>
    %67 = arith.subf %63, %66 : vector<2x8x8xf32>
    %68 = math.exp %67 : vector<2x8x8xf32>
    %cst_24 = arith.constant dense<0.000000e+00> : vector<2x8xf32>
    %69 = vector.multi_reduction <add>, %68, %cst_24 [2] : vector<2x8x8xf32> to vector<2x8xf32>
    %70 = vector.shape_cast %69 : vector<2x8xf32> to vector<2x8x1xf32>
    %71 = tpu.reciprocal %70 {approx = true} : vector<2x8x1xf32> -> vector<2x8x1xf32>
    %72 = vector.broadcast %71 : vector<2x8x1xf32> to vector<2x8x8xf32>
    %73 = arith.mulf %68, %72 : vector<2x8x8xf32>
    "tpu.trace_start"() <{level = 10 : i32, message = "bqk,bkd->bqd"}> : () -> ()
    %cst_25 = arith.constant dense<0.000000e+00> : vector<2x8x8xf32>
    %74 = tpu.matmul %73, %62, %cst_25 {dimension_numbers = #tpu.dot_dimension_numbers<[2], [1], [1], [2], [0, 0, 0, 1, 1, 2], [0], [0]>} : vector<2x8x8xf32>, vector<2x8x8xf32>, vector<2x8x8xf32> -> vector<2x8x8xf32>
    "tpu.trace_stop"() : () -> ()
    %75 = vector.shape_cast %74 : vector<2x8x8xf32> to vector<16x8xf32>
    %c16 = arith.constant 16 : index
    %c0_26 = arith.constant 0 : index
    %76 = vector.load %arg4[%c16, %c0_26] : memref<32x32xf32, #tpu.memory_space<vmem>>, vector<8x32xf32>
    %cst_27 = arith.constant dense<0.000000e+00> : vector<16x32xf32>
    %77 = tpu.matmul %75, %76, %cst_27 {dimension_numbers = #tpu.dot_dimension_numbers<[1], [0], [0], [1], [0, 0, 1, 1], [], []>} : vector<16x8xf32>, vector<8x32xf32>, vector<16x32xf32> -> vector<16x32xf32>
    %78 = arith.addf %54, %77 : vector<16x32xf32>
    %79 = vector.extract_strided_slice %5 {offsets = [0, 24], sizes = [16, 8], strides = [1, 1]} : vector<16x96xf32> to vector<16x8xf32>
    %cst_28 = arith.constant 0.353553385 : f32
    %80 = vector.broadcast %cst_28 : f32 to vector<16x8xf32>
    %81 = arith.mulf %79, %80 : vector<16x8xf32>
    %82 = vector.shape_cast %81 : vector<16x8xf32> to vector<2x8x8xf32>
    %83 = vector.extract_strided_slice %5 {offsets = [0, 56], sizes = [16, 8], strides = [1, 1]} : vector<16x96xf32> to vector<16x8xf32>
    %84 = vector.shape_cast %83 : vector<16x8xf32> to vector<2x8x8xf32>
    %85 = vector.extract_strided_slice %5 {offsets = [0, 88], sizes = [16, 8], strides = [1, 1]} : vector<16x96xf32> to vector<16x8xf32>
    %86 = vector.shape_cast %85 : vector<16x8xf32> to vector<2x8x8xf32>
    "tpu.trace_start"() <{level = 10 : i32, message = "bqd,bkd->bqk"}> : () -> ()
    %cst_29 = arith.constant dense<0.000000e+00> : vector<2x8x8xf32>
    %87 = tpu.matmul %82, %84, %cst_29 {dimension_numbers = #tpu.dot_dimension_numbers<[2], [2], [1], [1], [0, 0, 0, 1, 1, 1], [0], [0]>} : vector<2x8x8xf32>, vector<2x8x8xf32>, vector<2x8x8xf32> -> vector<2x8x8xf32>
    "tpu.trace_stop"() : () -> ()
    %cst_30 = arith.constant dense<0xFF800000> : vector<2x8xf32>
    %88 = vector.multi_reduction <maximumf>, %87, %cst_30 [2] : vector<2x8x8xf32> to vector<2x8xf32>
    %89 = vector.shape_cast %88 : vector<2x8xf32> to vector<2x8x1xf32>
    %90 = vector.broadcast %89 : vector<2x8x1xf32> to vector<2x8x8xf32>
    %91 = arith.subf %87, %90 : vector<2x8x8xf32>
    %92 = math.exp %91 : vector<2x8x8xf32>
    %cst_31 = arith.constant dense<0.000000e+00> : vector<2x8xf32>
    %93 = vector.multi_reduction <add>, %92, %cst_31 [2] : vector<2x8x8xf32> to vector<2x8xf32>
    %94 = vector.shape_cast %93 : vector<2x8xf32> to vector<2x8x1xf32>
    %95 = tpu.reciprocal %94 {approx = true} : vector<2x8x1xf32> -> vector<2x8x1xf32>
    %96 = vector.broadcast %95 : vector<2x8x1xf32> to vector<2x8x8xf32>
    %97 = arith.mulf %92, %96 : vector<2x8x8xf32>
    "tpu.trace_start"() <{level = 10 : i32, message = "bqk,bkd->bqd"}> : () -> ()
    %cst_32 = arith.constant dense<0.000000e+00> : vector<2x8x8xf32>
    %98 = tpu.matmul %97, %86, %cst_32 {dimension_numbers = #tpu.dot_dimension_numbers<[2], [1], [1], [2], [0, 0, 0, 1, 1, 2], [0], [0]>} : vector<2x8x8xf32>, vector<2x8x8xf32>, vector<2x8x8xf32> -> vector<2x8x8xf32>
    "tpu.trace_stop"() : () -> ()
    %99 = vector.shape_cast %98 : vector<2x8x8xf32> to vector<16x8xf32>
    %c24 = arith.constant 24 : index
    %c0_33 = arith.constant 0 : index
    %100 = vector.load %arg4[%c24, %c0_33] : memref<32x32xf32, #tpu.memory_space<vmem>>, vector<8x32xf32>
    %cst_34 = arith.constant dense<0.000000e+00> : vector<16x32xf32>
    %101 = tpu.matmul %99, %100, %cst_34 {dimension_numbers = #tpu.dot_dimension_numbers<[1], [0], [0], [1], [0, 0, 1, 1], [], []>} : vector<16x8xf32>, vector<8x32xf32>, vector<16x32xf32> -> vector<16x32xf32>
    %102 = arith.addf %78, %101 : vector<16x32xf32>
    %c0_35 = arith.constant 0 : index
    %c0_36 = arith.constant 0 : index
    %103 = vector.load %arg5[%c0_35, %c0_36] : memref<1x32xf32, #tpu.memory_space<vmem>>, vector<1x32xf32>
    %104 = vector.broadcast %103 : vector<1x32xf32> to vector<16x32xf32>
    %105 = arith.addf %102, %104 : vector<16x32xf32>
    %106 = arith.addf %105, %0 : vector<16x32xf32>
    %c0_37 = arith.constant 0 : index
    %c0_38 = arith.constant 0 : index
    %107 = vector.load %arg6[%c0_37, %c0_38] : memref<1x32xf32, #tpu.memory_space<vmem>>, vector<1x32xf32>
    %c0_39 = arith.constant 0 : index
    %c0_40 = arith.constant 0 : index
    %108 = vector.load %arg7[%c0_39, %c0_40] : memref<1x32xf32, #tpu.memory_space<vmem>>, vector<1x32xf32>
    %cst_41 = arith.constant dense<0.000000e+00> : vector<16xf32>
    %109 = vector.multi_reduction <add>, %106, %cst_41 [1] : vector<16x32xf32> to vector<16xf32>
    %110 = vector.shape_cast %109 : vector<16xf32> to vector<16x1xf32>
    %cst_42 = arith.constant 3.200000e+01 : f32
    %111 = vector.broadcast %cst_42 : f32 to vector<16x1xf32>
    %112 = arith.divf %110, %111 : vector<16x1xf32>
    %113 = vector.broadcast %112 : vector<16x1xf32> to vector<16x32xf32>
    %114 = arith.subf %106, %113 : vector<16x32xf32>
    %115 = arith.mulf %114, %114 : vector<16x32xf32>
    %cst_43 = arith.constant dense<0.000000e+00> : vector<16xf32>
    %116 = vector.multi_reduction <add>, %115, %cst_43 [1] : vector<16x32xf32> to vector<16xf32>
    %117 = vector.shape_cast %116 : vector<16xf32> to vector<16x1xf32>
    %cst_44 = arith.constant 3.200000e+01 : f32
    %118 = vector.broadcast %cst_44 : f32 to vector<16x1xf32>
    %119 = arith.divf %117, %118 : vector<16x1xf32>
    %120 = vector.broadcast %112 : vector<16x1xf32> to vector<16x32xf32>
    %121 = arith.subf %106, %120 : vector<16x32xf32>
    %cst_45 = arith.constant 9.99999974E-6 : f32
    %122 = vector.broadcast %cst_45 : f32 to vector<16x1xf32>
    %123 = arith.addf %119, %122 : vector<16x1xf32>
    %124 = math.rsqrt %123 : vector<16x1xf32>
    %125 = vector.broadcast %124 : vector<16x1xf32> to vector<16x32xf32>
    %126 = arith.mulf %121, %125 : vector<16x32xf32>
    %127 = vector.broadcast %107 : vector<1x32xf32> to vector<16x32xf32>
    %128 = arith.mulf %126, %127 : vector<16x32xf32>
    %129 = vector.broadcast %108 : vector<1x32xf32> to vector<16x32xf32>
    %130 = arith.addf %128, %129 : vector<16x32xf32>
    %c0_46 = arith.constant 0 : index
    %c0_47 = arith.constant 0 : index
    %131 = vector.load %arg8[%c0_46, %c0_47] : memref<32x64xf32, #tpu.memory_space<vmem>>, vector<32x64xf32>
    %cst_48 = arith.constant dense<0.000000e+00> : vector<16x64xf32>
    %132 = tpu.matmul %130, %131, %cst_48 {dimension_numbers = #tpu.dot_dimension_numbers<[1], [0], [0], [1], [0, 0, 1, 1], [], []>} : vector<16x32xf32>, vector<32x64xf32>, vector<16x64xf32> -> vector<16x64xf32>
    %c0_49 = arith.constant 0 : index
    %c0_50 = arith.constant 0 : index
    %133 = vector.load %arg9[%c0_49, %c0_50] : memref<1x64xf32, #tpu.memory_space<vmem>>, vector<1x64xf32>
    %134 = vector.broadcast %133 : vector<1x64xf32> to vector<16x64xf32>
    %135 = arith.addf %132, %134 : vector<16x64xf32>
    %cst_51 = arith.constant 5.000000e-01 : f32
    %136 = vector.broadcast %cst_51 : f32 to vector<16x64xf32>
    %137 = arith.mulf %136, %135 : vector<16x64xf32>
    %cst_52 = arith.constant 4.471500e-02 : f32
    %138 = vector.broadcast %cst_52 : f32 to vector<16x64xf32>
    %139 = arith.mulf %138, %135 : vector<16x64xf32>
    %140 = arith.mulf %139, %135 : vector<16x64xf32>
    %141 = arith.mulf %140, %135 : vector<16x64xf32>
    %142 = arith.addf %135, %141 : vector<16x64xf32>
    %cst_53 = arith.constant 0.797884583 : f32
    %143 = vector.broadcast %cst_53 : f32 to vector<16x64xf32>
    %144 = arith.mulf %143, %142 : vector<16x64xf32>
    %145 = math.tanh %144 : vector<16x64xf32>
    %cst_54 = arith.constant 1.000000e+00 : f32
    %146 = vector.broadcast %cst_54 : f32 to vector<16x64xf32>
    %147 = arith.addf %146, %145 : vector<16x64xf32>
    %148 = arith.mulf %137, %147 : vector<16x64xf32>
    %c0_55 = arith.constant 0 : index
    %c0_56 = arith.constant 0 : index
    %149 = vector.load %arg10[%c0_55, %c0_56] : memref<64x32xf32, #tpu.memory_space<vmem>>, vector<64x32xf32>
    %cst_57 = arith.constant dense<0.000000e+00> : vector<16x32xf32>
    %150 = tpu.matmul %148, %149, %cst_57 {dimension_numbers = #tpu.dot_dimension_numbers<[1], [0], [0], [1], [0, 0, 1, 1], [], []>} : vector<16x64xf32>, vector<64x32xf32>, vector<16x32xf32> -> vector<16x32xf32>
    %c0_58 = arith.constant 0 : index
    %c0_59 = arith.constant 0 : index
    %151 = vector.load %arg11[%c0_58, %c0_59] : memref<1x32xf32, #tpu.memory_space<vmem>>, vector<1x32xf32>
    %152 = vector.broadcast %151 : vector<1x32xf32> to vector<16x32xf32>
    %153 = arith.addf %150, %152 : vector<16x32xf32>
    %154 = arith.addf %153, %130 : vector<16x32xf32>
    %c0_60 = arith.constant 0 : index
    %c0_61 = arith.constant 0 : index
    %155 = vector.load %arg12[%c0_60, %c0_61] : memref<1x32xf32, #tpu.memory_space<vmem>>, vector<1x32xf32>
    %c0_62 = arith.constant 0 : index
    %c0_63 = arith.constant 0 : index
    %156 = vector.load %arg13[%c0_62, %c0_63] : memref<1x32xf32, #tpu.memory_space<vmem>>, vector<1x32xf32>
    %cst_64 = arith.constant dense<0.000000e+00> : vector<16xf32>
    %157 = vector.multi_reduction <add>, %154, %cst_64 [1] : vector<16x32xf32> to vector<16xf32>
    %158 = vector.shape_cast %157 : vector<16xf32> to vector<16x1xf32>
    %cst_65 = arith.constant 3.200000e+01 : f32
    %159 = vector.broadcast %cst_65 : f32 to vector<16x1xf32>
    %160 = arith.divf %158, %159 : vector<16x1xf32>
    %161 = vector.broadcast %160 : vector<16x1xf32> to vector<16x32xf32>
    %162 = arith.subf %154, %161 : vector<16x32xf32>
    %163 = arith.mulf %162, %162 : vector<16x32xf32>
    %cst_66 = arith.constant dense<0.000000e+00> : vector<16xf32>
    %164 = vector.multi_reduction <add>, %163, %cst_66 [1] : vector<16x32xf32> to vector<16xf32>
    %165 = vector.shape_cast %164 : vector<16xf32> to vector<16x1xf32>
    %cst_67 = arith.constant 3.200000e+01 : f32
    %166 = vector.broadcast %cst_67 : f32 to vector<16x1xf32>
    %167 = arith.divf %165, %166 : vector<16x1xf32>
    %168 = vector.broadcast %160 : vector<16x1xf32> to vector<16x32xf32>
    %169 = arith.subf %154, %168 : vector<16x32xf32>
    %cst_68 = arith.constant 9.99999974E-6 : f32
    %170 = vector.broadcast %cst_68 : f32 to vector<16x1xf32>
    %171 = arith.addf %167, %170 : vector<16x1xf32>
    %172 = math.rsqrt %171 : vector<16x1xf32>
    %173 = vector.broadcast %172 : vector<16x1xf32> to vector<16x32xf32>
    %174 = arith.mulf %169, %173 : vector<16x32xf32>
    %175 = vector.broadcast %155 : vector<1x32xf32> to vector<16x32xf32>
    %176 = arith.mulf %174, %175 : vector<16x32xf32>
    %177 = vector.broadcast %156 : vector<1x32xf32> to vector<16x32xf32>
    %178 = arith.addf %176, %177 : vector<16x32xf32>
    %c0_69 = arith.constant 0 : index
    %c0_70 = arith.constant 0 : index
    %179 = vector.load %arg14[%c0_69, %c0_70] : memref<16x32xf32, #tpu.memory_space<vmem>>, vector<16x32xf32>
    tpu.vector_store %arg14[%c0_69, %c0_70], %178 {strides = array<i32>} : memref<16x32xf32, #tpu.memory_space<vmem>>, vector<16x32xf32>,
    return
  }
  func.func @transform_0(%arg0: i32) -> (i32, i32) {
    %c0_i32 = arith.constant 0 : i32
    %c0_i32_0 = arith.constant 0 : i32
    %c0_i32_1 = arith.constant 0 : i32
    return %c0_i32, %c0_i32_0 : i32, i32
  }
  func.func @transform_1(%arg0: i32) -> (i32, i32) {
    %c0_i32 = arith.constant 0 : i32
    %c0_i32_0 = arith.constant 0 : i32
    %c0_i32_1 = arith.constant 0 : i32
    return %c0_i32, %c0_i32_0 : i32, i32
  }
  func.func @transform_2(%arg0: i32) -> (i32, i32) {
    %c0_i32 = arith.constant 0 : i32
    %c0_i32_0 = arith.constant 0 : i32
    %c0_i32_1 = arith.constant 0 : i32
    return %c0_i32, %c0_i32_0 : i32, i32
  }
  func.func @transform_3(%arg0: i32) -> (i32, i32) {
    %c0_i32 = arith.constant 0 : i32
    %c0_i32_0 = arith.constant 0 : i32
    %c0_i32_1 = arith.constant 0 : i32
    return %c0_i32, %c0_i32_0 : i32, i32
  }
  func.func @transform_4(%arg0: i32) -> (i32, i32) {
    %c0_i32 = arith.constant 0 : i32
    %c0_i32_0 = arith.constant 0 : i32
    %c0_i32_1 = arith.constant 0 : i32
    return %c0_i32, %c0_i32_0 : i32, i32
  }
  func.func @transform_5(%arg0: i32) -> (i32, i32) {
    %c0_i32 = arith.constant 0 : i32
    %c0_i32_0 = arith.constant 0 : i32
    %c0_i32_1 = arith.constant 0 : i32
    return %c0_i32, %c0_i32_0 : i32, i32
  }
  func.func @transform_6(%arg0: i32) -> (i32, i32) {
    %c0_i32 = arith.constant 0 : i32
    %c0_i32_0 = arith.constant 0 : i32
    %c0_i32_1 = arith.constant 0 : i32
    return %c0_i32, %c0_i32_0 : i32, i32
  }
  func.func @transform_7(%arg0: i32) -> (i32, i32) {
    %c0_i32 = arith.constant 0 : i32
    %c0_i32_0 = arith.constant 0 : i32
    %c0_i32_1 = arith.constant 0 : i32
    return %c0_i32, %c0_i32_0 : i32, i32
  }
  func.func @transform_8(%arg0: i32) -> (i32, i32) {
    %c0_i32 = arith.constant 0 : i32
    %c0_i32_0 = arith.constant 0 : i32
    %c0_i32_1 = arith.constant 0 : i32
    return %c0_i32, %c0_i32_0 : i32, i32
  }
  func.func @transform_9(%arg0: i32) -> (i32, i32) {
    %c0_i32 = arith.constant 0 : i32
    %c0_i32_0 = arith.constant 0 : i32
    %c0_i32_1 = arith.constant 0 : i32
    return %c0_i32, %c0_i32_0 : i32, i32
  }
  func.func @transform_10(%arg0: i32) -> (i32, i32) {
    %c0_i32 = arith.constant 0 : i32
    %c0_i32_0 = arith.constant 0 : i32
    %c0_i32_1 = arith.constant 0 : i32
    return %c0_i32, %c0_i32_0 : i32, i32
  }
  func.func @transform_11(%arg0: i32) -> (i32, i32) {
    %c0_i32 = arith.constant 0 : i32
    %c0_i32_0 = arith.constant 0 : i32
    %c0_i32_1 = arith.constant 0 : i32
    return %c0_i32, %c0_i32_0 : i32, i32
  }
  func.func @transform_12(%arg0: i32) -> (i32, i32) {
    %c0_i32 = arith.constant 0 : i32
    %c0_i32_0 = arith.constant 0 : i32
    %c0_i32_1 = arith.constant 0 : i32
    return %c0_i32, %c0_i32_0 : i32, i32
  }
  func.func @transform_13(%arg0: i32) -> (i32, i32) {
    %c0_i32 = arith.constant 0 : i32
    %c0_i32_0 = arith.constant 0 : i32
    %c0_i32_1 = arith.constant 0 : i32
    return %c0_i32, %c0_i32_0 : i32, i32
  }
}

module attributes {stable_mosaic.version = 11 : i64} {
  func.func @_layer_kernel(%arg0: i32, %arg1: memref<16x32xf32, #tpu.memory_space<vmem>>, %arg2: memref<32x96xf32, #tpu.memory_space<vmem>>, %arg3: memref<1x96xf32, #tpu.memory_space<vmem>>, %arg4: memref<32x32xf32, #tpu.memory_space<vmem>>, %arg5: memref<1x32xf32, #tpu.memory_space<vmem>>, %arg6: memref<1x32xf32, #tpu.memory_space<vmem>>, %arg7: memref<1x32xf32, #tpu.memory_space<vmem>>, %arg8: memref<32x64xf32, #tpu.memory_space<vmem>>, %arg9: memref<1x64xf32, #tpu.memory_space<vmem>>, %arg10: memref<64x32xf32, #tpu.memory_space<vmem>>, %arg11: memref<1x32xf32, #tpu.memory_space<vmem>>, %arg12: memref<1x32xf32, #tpu.memory_space<vmem>>, %arg13: memref<1x32xf32, #tpu.memory_space<vmem>>, %arg14: memref<16x32xf32, #tpu.memory_space<vmem>>) attributes {dimension_semantics = [#tpu.dimension_semantics<arbitrary>], iteration_bounds = array<i64: 1>, scalar_prefetch = 0 : i64, scratch_operands = 0 : i64, tpu.core_type = #tpu.core_type<tc>, window_params = [{pipeline_mode = #tpu.pipeline_mode<synchronous>, transform_indices = @transform_0, window_bounds = array<i64: 16, 32>}, {pipeline_mode = #tpu.pipeline_mode<synchronous>, transform_indices = @transform_1, window_bounds = array<i64: 32, 96>}, {pipeline_mode = #tpu.pipeline_mode<synchronous>, transform_indices = @transform_2, window_bounds = array<i64: 1, 96>}, {pipeline_mode = #tpu.pipeline_mode<synchronous>, transform_indices = @transform_3, window_bounds = array<i64: 32, 32>}, {pipeline_mode = #tpu.pipeline_mode<synchronous>, transform_indices = @transform_4, window_bounds = array<i64: 1, 32>}, {pipeline_mode = #tpu.pipeline_mode<synchronous>, transform_indices = @transform_5, window_bounds = array<i64: 1, 32>}, {pipeline_mode = #tpu.pipeline_mode<synchronous>, transform_indices = @transform_6, window_bounds = array<i64: 1, 32>}, {pipeline_mode = #tpu.pipeline_mode<synchronous>, transform_indices = @transform_7, window_bounds = array<i64: 32, 64>}, {pipeline_mode = #tpu.pipeline_mode<synchronous>, transform_indices = @transform_8, window_bounds = array<i64: 1, 64>}, {pipeline_mode = #tpu.pipeline_mode<synchronous>, transform_indices = @transform_9, window_bounds = array<i64: 64, 32>}, {pipeline_mode = #tpu.pipeline_mode<synchronous>, transform_indices = @transform_10, window_bounds = array<i64: 1, 32>}, {pipeline_mode = #tpu.pipeline_mode<synchronous>, transform_indices = @transform_11, window_bounds = array<i64: 1, 32>}, {pipeline_mode = #tpu.pipeline_mode<synchronous>, transform_indices = @transform_12, window_bounds = array<i64: 1, 32>}, {pipeline_mode = #tpu.pipeline_mode<synchronous>, transform_indices = @transform_13, window_bounds = array<i64: 16, 32>}]} {
    %c0 = arith.constant 0 : index
    %c0_0 = arith.constant 0 : index
    %0 = vector.load %arg1[%c0, %c0_0] : memref<16x32xf32, #tpu.memory_space<vmem>>, vector<16x32xf32>
    %c0_1 = arith.constant 0 : index
    %c0_2 = arith.constant 0 : index
    %1 = vector.load %arg2[%c0_1, %c0_2] : memref<32x96xf32, #tpu.memory_space<vmem>>, vector<32x96xf32>
    %cst = arith.constant dense<0.000000e+00> : vector<16x96xf32>
    %2 = tpu.matmul %0, %1, %cst {dimension_numbers = #tpu.dot_dimension_numbers<[1], [0], [0], [1], [0, 0, 1, 1], [], []>} : vector<16x32xf32>, vector<32x96xf32>, vector<16x96xf32> -> vector<16x96xf32>
    %c0_3 = arith.constant 0 : index
    %c0_4 = arith.constant 0 : index
    %3 = vector.load %arg3[%c0_3, %c0_4] : memref<1x96xf32, #tpu.memory_space<vmem>>, vector<1x96xf32>
    %4 = vector.broadcast %3 : vector<1x96xf32> to vector<16x96xf32>
    %5 = arith.addf %2, %4 : vector<16x96xf32>
    %cst_5 = arith.constant 0.000000e+00 : f32
    %6 = vector.broadcast %cst_5 : f32 to vector<16x32xf32>
    %7 = vector.extract_strided_slice %5 {offsets = [0, 0], sizes = [16, 8], strides = [1, 1]} : vector<16x96xf32> to vector<16x8xf32>
    %cst_6 = arith.constant 0.353553385 : f32
    %8 = vector.broadcast %cst_6 : f32 to vector<16x8xf32>
    %9 = arith.mulf %7, %8 : vector<16x8xf32>
    %10 = vector.shape_cast %9 : vector<16x8xf32> to vector<2x8x8xf32>
    %11 = vector.extract_strided_slice %5 {offsets = [0, 32], sizes = [16, 8], strides = [1, 1]} : vector<16x96xf32> to vector<16x8xf32>
    %12 = vector.shape_cast %11 : vector<16x8xf32> to vector<2x8x8xf32>
    %13 = vector.extract_strided_slice %5 {offsets = [0, 64], sizes = [16, 8], strides = [1, 1]} : vector<16x96xf32> to vector<16x8xf32>
    %14 = vector.shape_cast %13 : vector<16x8xf32> to vector<2x8x8xf32>
    "tpu.trace_start"() <{level = 10 : i32, message = "bqd,bkd->bqk"}> : () -> ()
    %cst_7 = arith.constant dense<0.000000e+00> : vector<2x8x8xf32>
    %15 = tpu.matmul %10, %12, %cst_7 {dimension_numbers = #tpu.dot_dimension_numbers<[2], [2], [1], [1], [0, 0, 0, 1, 1, 1], [0], [0]>} : vector<2x8x8xf32>, vector<2x8x8xf32>, vector<2x8x8xf32> -> vector<2x8x8xf32>
    "tpu.trace_stop"() : () -> ()
    %cst_8 = arith.constant dense<0xFF800000> : vector<2x8xf32>
    %16 = vector.multi_reduction <maximumf>, %15, %cst_8 [2] : vector<2x8x8xf32> to vector<2x8xf32>
    %17 = vector.shape_cast %16 : vector<2x8xf32> to vector<2x8x1xf32>
    %18 = vector.broadcast %17 : vector<2x8x1xf32> to vector<2x8x8xf32>
    %19 = arith.subf %15, %18 : vector<2x8x8xf32>
    %20 = math.exp %19 : vector<2x8x8xf32>
    %cst_9 = arith.constant dense<0.000000e+00> : vector<2x8xf32>
    %21 = vector.multi_reduction <add>, %20, %cst_9 [2] : vector<2x8x8xf32> to vector<2x8xf32>
    %22 = vector.shape_cast %21 : vector<2x8xf32> to vector<2x8x1xf32>
    %23 = tpu.reciprocal %22 {approx = true} : vector<2x8x1xf32> -> vector<2x8x1xf32>
    %24 = vector.broadcast %23 : vector<2x8x1xf32> to vector<2x8x8xf32>
    %25 = arith.mulf %20, %24 : vector<2x8x8xf32>
    "tpu.trace_start"() <{level = 10 : i32, message = "bqk,bkd->bqd"}> : () -> ()
    %cst_10 = arith.constant dense<0.000000e+00> : vector<2x8x8xf32>
    %26 = tpu.matmul %25, %14, %cst_10 {dimension_numbers = #tpu.dot_dimension_numbers<[2], [1], [1], [2], [0, 0, 0, 1, 1, 2], [0], [0]>} : vector<2x8x8xf32>, vector<2x8x8xf32>, vector<2x8x8xf32> -> vector<2x8x8xf32>
    "tpu.trace_stop"() : () -> ()
    %27 = vector.shape_cast %26 : vector<2x8x8xf32> to vector<16x8xf32>
    %c0_11 = arith.constant 0 : index
    %c0_12 = arith.constant 0 : index
    %28 = vector.load %arg4[%c0_11, %c0_12] : memref<32x32xf32, #tpu.memory_space<vmem>>, vector<8x32xf32>
    %cst_13 = arith.constant dense<0.000000e+00> : vector<16x32xf32>
    %29 = tpu.matmul %27, %28, %cst_13 {dimension_numbers = #tpu.dot_dimension_numbers<[1], [0], [0], [1], [0, 0, 1, 1], [], []>} : vector<16x8xf32>, vector<8x32xf32>, vector<16x32xf32> -> vector<16x32xf32>
    %30 = arith.addf %6, %29 : vector<16x32xf32>
    %31 = vector.extract_strided_slice %5 {offsets = [0, 8], sizes = [16, 8], strides = [1, 1]} : vector<16x96xf32> to vector<16x8xf32>
    %cst_14 = arith.constant 0.353553385 : f32
    %32 = vector.broadcast %cst_14 : f32 to vector<16x8xf32>
    %33 = arith.mulf %31, %32 : vector<16x8xf32>
    %34 = vector.shape_cast %33 : vector<16x8xf32> to vector<2x8x8xf32>
    %35 = vector.extract_strided_slice %5 {offsets = [0, 40], sizes = [16, 8], strides = [1, 1]} : vector<16x96xf32> to vector<16x8xf32>
    %36 = vector.shape_cast %35 : vector<16x8xf32> to vector<2x8x8xf32>
    %37 = vector.extract_strided_slice %5 {offsets = [0, 72], sizes = [16, 8], strides = [1, 1]} : vector<16x96xf32> to vector<16x8xf32>
    %38 = vector.shape_cast %37 : vector<16x8xf32> to vector<2x8x8xf32>
    "tpu.trace_start"() <{level = 10 : i32, message = "bqd,bkd->bqk"}> : () -> ()
    %cst_15 = arith.constant dense<0.000000e+00> : vector<2x8x8xf32>
    %39 = tpu.matmul %34, %36, %cst_15 {dimension_numbers = #tpu.dot_dimension_numbers<[2], [2], [1], [1], [0, 0, 0, 1, 1, 1], [0], [0]>} : vector<2x8x8xf32>, vector<2x8x8xf32>, vector<2x8x8xf32> -> vector<2x8x8xf32>
    "tpu.trace_stop"() : () -> ()
    %cst_16 = arith.constant dense<0xFF800000> : vector<2x8xf32>
    %40 = vector.multi_reduction <maximumf>, %39, %cst_16 [2] : vector<2x8x8xf32> to vector<2x8xf32>
    %41 = vector.shape_cast %40 : vector<2x8xf32> to vector<2x8x1xf32>
    %42 = vector.broadcast %41 : vector<2x8x1xf32> to vector<2x8x8xf32>
    %43 = arith.subf %39, %42 : vector<2x8x8xf32>
    %44 = math.exp %43 : vector<2x8x8xf32>
    %cst_17 = arith.constant dense<0.000000e+00> : vector<2x8xf32>
    %45 = vector.multi_reduction <add>, %44, %cst_17 [2] : vector<2x8x8xf32> to vector<2x8xf32>
    %46 = vector.shape_cast %45 : vector<2x8xf32> to vector<2x8x1xf32>
    %47 = tpu.reciprocal %46 {approx = true} : vector<2x8x1xf32> -> vector<2x8x1xf32>
    %48 = vector.broadcast %47 : vector<2x8x1xf32> to vector<2x8x8xf32>
    %49 = arith.mulf %44, %48 : vector<2x8x8xf32>
    "tpu.trace_start"() <{level = 10 : i32, message = "bqk,bkd->bqd"}> : () -> ()
    %cst_18 = arith.constant dense<0.000000e+00> : vector<2x8x8xf32>
    %50 = tpu.matmul %49, %38, %cst_18 {dimension_numbers = #tpu.dot_dimension_numbers<[2], [1], [1], [2], [0, 0, 0, 1, 1, 2], [0], [0]>} : vector<2x8x8xf32>, vector<2x8x8xf32>, vector<2x8x8xf32> -> vector<2x8x8xf32>
    "tpu.trace_stop"() : () -> ()
    %51 = vector.shape_cast %50 : vector<2x8x8xf32> to vector<16x8xf32>
    %c8 = arith.constant 8 : index
    %c0_19 = arith.constant 0 : index
    %52 = vector.load %arg4[%c8, %c0_19] : memref<32x32xf32, #tpu.memory_space<vmem>>, vector<8x32xf32>
    %cst_20 = arith.constant dense<0.000000e+00> : vector<16x32xf32>
    %53 = tpu.matmul %51, %52, %cst_20 {dimension_numbers = #tpu.dot_dimension_numbers<[1], [0], [0], [1], [0, 0, 1, 1], [], []>} : vector<16x8xf32>, vector<8x32xf32>, vector<16x32xf32> -> vector<16x32xf32>
    %54 = arith.addf %30, %53 : vector<16x32xf32>
    %55 = vector.extract_strided_slice %5 {offsets = [0, 16], sizes = [16, 8], strides = [1, 1]} : vector<16x96xf32> to vector<16x8xf32>
    %cst_21 = arith.constant 0.353553385 : f32
    %56 = vector.broadcast %cst_21 : f32 to vector<16x8xf32>
    %57 = arith.mulf %55, %56 : vector<16x8xf32>
    %58 = vector.shape_cast %57 : vector<16x8xf32> to vector<2x8x8xf32>
    %59 = vector.extract_strided_slice %5 {offsets = [0, 48], sizes = [16, 8], strides = [1, 1]} : vector<16x96xf32> to vector<16x8xf32>
    %60 = vector.shape_cast %59 : vector<16x8xf32> to vector<2x8x8xf32>
    %61 = vector.extract_strided_slice %5 {offsets = [0, 80], sizes = [16, 8], strides = [1, 1]} : vector<16x96xf32> to vector<16x8xf32>
    %62 = vector.shape_cast %61 : vector<16x8xf32> to vector<2x8x8xf32>
    "tpu.trace_start"() <{level = 10 : i32, message = "bqd,bkd->bqk"}> : () -> ()
    %cst_22 = arith.constant dense<0.000000e+00> : vector<2x8x8xf32>
    %63 = tpu.matmul %58, %60, %cst_22 {dimension_numbers = #tpu.dot_dimension_numbers<[2], [2], [1], [1], [0, 0, 0, 1, 1, 1], [0], [0]>} : vector<2x8x8xf32>, vector<2x8x8xf32>, vector<2x8x8xf32> -> vector<2x8x8xf32>
    "tpu.trace_stop"() : () -> ()
    %cst_23 = arith.constant dense<0xFF800000> : vector<2x8xf32>
    %64 = vector.multi_reduction <maximumf>, %63, %cst_23 [2] : vector<2x8x8xf32> to vector<2x8xf32>
    %65 = vector.shape_cast %64 : vector<2x8xf32> to vector<2x8x1xf32>
    %66 = vector.broadcast %65 : vector<2x8x1xf32> to vector<2x8x8xf32>
    %67 = arith.subf %63, %66 : vector<2x8x8xf32>
    %68 = math.exp %67 : vector<2x8x8xf32>
    %cst_24 = arith.constant dense<0.000000e+00> : vector<2x8xf32>
    %69 = vector.multi_reduction <add>, %68, %cst_24 [2] : vector<2x8x8xf32> to vector<2x8xf32>
    %70 = vector.shape_cast %69 : vector<2x8xf32> to vector<2x8x1xf32>
    %71 = tpu.reciprocal %70 {approx = true} : vector<2x8x1xf32> -> vector<2x8x1xf32>
    %72 = vector.broadcast %71 : vector<2x8x1xf32> to vector<2x8x8xf32>
    %73 = arith.mulf %68, %72 : vector<2x8x8xf32>
    "tpu.trace_start"() <{level = 10 : i32, message = "bqk,bkd->bqd"}> : () -> ()
    %cst_25 = arith.constant dense<0.000000e+00> : vector<2x8x8xf32>
    %74 = tpu.matmul %73, %62, %cst_25 {dimension_numbers = #tpu.dot_dimension_numbers<[2], [1], [1], [2], [0, 0, 0, 1, 1, 2], [0], [0]>} : vector<2x8x8xf32>, vector<2x8x8xf32>, vector<2x8x8xf32> -> vector<2x8x8xf32>
    "tpu.trace_stop"() : () -> ()
    %75 = vector.shape_cast %74 : vector<2x8x8xf32> to vector<16x8xf32>
    %c16 = arith.constant 16 : index
    %c0_26 = arith.constant 0 : index
    %76 = vector.load %arg4[%c16, %c0_26] : memref<32x32xf32, #tpu.memory_space<vmem>>, vector<8x32xf32>
    %cst_27 = arith.constant dense<0.000000e+00> : vector<16x32xf32>
    %77 = tpu.matmul %75, %76, %cst_27 {dimension_numbers = #tpu.dot_dimension_numbers<[1], [0], [0], [1], [0, 0, 1, 1], [], []>} : vector<16x8xf32>, vector<8x32xf32>, vector<16x32xf32> -> vector<16x32xf32>
    %78 = arith.addf %54, %77 : vector<16x32xf32>
    %79 = vector.extract_strided_slice %5 {offsets = [0, 24], sizes = [16, 8], strides = [1, 1]} : vector<16x96xf32> to vector<16x8xf32>
    %cst_28 = arith.constant 0.353553385 : f32
    %80 = vector.broadcast %cst_28 : f32 to vector<16x8xf32>
    %81 = arith.mulf %79, %80 : vector<16x8xf32>
    %82 = vector.shape_cast %81 : vector<16x8xf32> to vector<2x8x8xf32>
    %83 = vector.extract_strided_slice %5 {offsets = [0, 56], sizes = [16, 8], strides = [1, 1]} : vector<16x96xf32> to vector<16x8xf32>
    %84 = vector.shape_cast %83 : vector<16x8xf32> to vector<2x8x8xf32>
    %85 = vector.extract_strided_slice %5 {offsets = [0, 88], sizes = [16, 8], strides = [1, 1]} : vector<16x96xf32> to vector<16x8xf32>
    %86 = vector.shape_cast %85 : vector<16x8xf32> to vector<2x8x8xf32>
    "tpu.trace_start"() <{level = 10 : i32, message = "bqd,bkd->bqk"}> : () -> ()
    %cst_29 = arith.constant dense<0.000000e+00> : vector<2x8x8xf32>
    %87 = tpu.matmul %82, %84, %cst_29 {dimension_numbers = #tpu.dot_dimension_numbers<[2], [2], [1], [1], [0, 0, 0, 1, 1, 1], [0], [0]>} : vector<2x8x8xf32>, vector<2x8x8xf32>, vector<2x8x8xf32> -> vector<2x8x8xf32>
    "tpu.trace_stop"() : () -> ()
    %cst_30 = arith.constant dense<0xFF800000> : vector<2x8xf32>
    %88 = vector.multi_reduction <maximumf>, %87, %cst_30 [2] : vector<2x8x8xf32> to vector<2x8xf32>
    %89 = vector.shape_cast %88 : vector<2x8xf32> to vector<2x8x1xf32>
    %90 = vector.broadcast %89 : vector<2x8x1xf32> to vector<2x8x8xf32>
    %91 = arith.subf %87, %90 : vector<2x8x8xf32>
    %92 = math.exp %91 : vector<2x8x8xf32>
    %cst_31 = arith.constant dense<0.000000e+00> : vector<2x8xf32>
    %93 = vector.multi_reduction <add>, %92, %cst_31 [2] : vector<2x8x8xf32> to vector<2x8xf32>
    %94 = vector.shape_cast %93 : vector<2x8xf32> to vector<2x8x1xf32>
    %95 = tpu.reciprocal %94 {approx = true} : vector<2x8x1xf32> -> vector<2x8x1xf32>
    %96 = vector.broadcast %95 : vector<2x8x1xf32> to vector<2x8x8xf32>
    %97 = arith.mulf %92, %96 : vector<2x8x8xf32>
    "tpu.trace_start"() <{level = 10 : i32, message = "bqk,bkd->bqd"}> : () -> ()
    %cst_32 = arith.constant dense<0.000000e+00> : vector<2x8x8xf32>
    %98 = tpu.matmul %97, %86, %cst_32 {dimension_numbers = #tpu.dot_dimension_numbers<[2], [1], [1], [2], [0, 0, 0, 1, 1, 2], [0], [0]>} : vector<2x8x8xf32>, vector<2x8x8xf32>, vector<2x8x8xf32> -> vector<2x8x8xf32>
    "tpu.trace_stop"() : () -> ()
    %99 = vector.shape_cast %98 : vector<2x8x8xf32> to vector<16x8xf32>
    %c24 = arith.constant 24 : index
    %c0_33 = arith.constant 0 : index
    %100 = vector.load %arg4[%c24, %c0_33] : memref<32x32xf32, #tpu.memory_space<vmem>>, vector<8x32xf32>
    %cst_34 = arith.constant dense<0.000000e+00> : vector<16x32xf32>
    %101 = tpu.matmul %99, %100, %cst_34 {dimension_numbers = #tpu.dot_dimension_numbers<[1], [0], [0], [1], [0, 0, 1, 1], [], []>} : vector<16x8xf32>, vector<8x32xf32>, vector<16x32xf32> -> vector<16x32xf32>
    %102 = arith.addf %78, %101 : vector<16x32xf32>
    %c0_35 = arith.constant 0 : index
    %c0_36 = arith.constant 0 : index
    %103 = vector.load %arg5[%c0_35, %c0_36] : memref<1x32xf32, #tpu.memory_space<vmem>>, vector<1x32xf32>
    %104 = vector.broadcast %103 : vector<1x32xf32> to vector<16x32xf32>
    %105 = arith.addf %102, %104 : vector<16x32xf32>
    %106 = arith.addf %105, %0 : vector<16x32xf32>
    %c0_37 = arith.constant 0 : index
    %c0_38 = arith.constant 0 : index
    %107 = vector.load %arg6[%c0_37, %c0_38] : memref<1x32xf32, #tpu.memory_space<vmem>>, vector<1x32xf32>
    %c0_39 = arith.constant 0 : index
    %c0_40 = arith.constant 0 : index
    %108 = vector.load %arg7[%c0_39, %c0_40] : memref<1x32xf32, #tpu.memory_space<vmem>>, vector<1x32xf32>
    %cst_41 = arith.constant dense<0.000000e+00> : vector<16xf32>
    %109 = vector.multi_reduction <add>, %106, %cst_41 [1] : vector<16x32xf32> to vector<16xf32>
    %110 = vector.shape_cast %109 : vector<16xf32> to vector<16x1xf32>
    %cst_42 = arith.constant 3.200000e+01 : f32
    %111 = vector.broadcast %cst_42 : f32 to vector<16x1xf32>
    %112 = arith.divf %110, %111 : vector<16x1xf32>
    %113 = vector.broadcast %112 : vector<16x1xf32> to vector<16x32xf32>
    %114 = arith.subf %106, %113 : vector<16x32xf32>
    %115 = arith.mulf %114, %114 : vector<16x32xf32>
    %cst_43 = arith.constant dense<0.000000e+00> : vector<16xf32>
    %116 = vector.multi_reduction <add>, %115, %cst_43 [1] : vector<16x32xf32> to vector<16xf32>
    %117 = vector.shape_cast %116 : vector<16xf32> to vector<16x1xf32>
    %cst_44 = arith.constant 3.200000e+01 : f32
    %118 = vector.broadcast %cst_44 : f32 to vector<16x1xf32>
    %119 = arith.divf %117, %118 : vector<16x1xf32>
    %120 = vector.broadcast %112 : vector<16x1xf32> to vector<16x32xf32>
    %121 = arith.subf %106, %120 : vector<16x32xf32>
    %cst_45 = arith.constant 9.99999974E-6 : f32
    %122 = vector.broadcast %cst_45 : f32 to vector<16x1xf32>
    %123 = arith.addf %119, %122 : vector<16x1xf32>
    %124 = math.rsqrt %123 : vector<16x1xf32>
    %125 = vector.broadcast %124 : vector<16x1xf32> to vector<16x32xf32>
    %126 = arith.mulf %121, %125 : vector<16x32xf32>
    %127 = vector.broadcast %107 : vector<1x32xf32> to vector<16x32xf32>
    %128 = arith.mulf %126, %127 : vector<16x32xf32>
    %129 = vector.broadcast %108 : vector<1x32xf32> to vector<16x32xf32>
    %130 = arith.addf %128, %129 : vector<16x32xf32>
    %c0_46 = arith.constant 0 : index
    %c0_47 = arith.constant 0 : index
    %131 = vector.load %arg8[%c0_46, %c0_47] : memref<32x64xf32, #tpu.memory_space<vmem>>, vector<32x64xf32>
    %cst_48 = arith.constant dense<0.000000e+00> : vector<16x64xf32>
    %132 = tpu.matmul %130, %131, %cst_48 {dimension_numbers = #tpu.dot_dimension_numbers<[1], [0], [0], [1], [0, 0, 1, 1], [], []>} : vector<16x32xf32>, vector<32x64xf32>, vector<16x64xf32> -> vector<16x64xf32>
    %c0_49 = arith.constant 0 : index
    %c0_50 = arith.constant 0 : index
    %133 = vector.load %arg9[%c0_49, %c0_50] : memref<1x64xf32, #tpu.memory_space<vmem>>, vector<1x64xf32>
    %134 = vector.broadcast %133 : vector<1x64xf32> to vector<16x64xf32>
    %135 = arith.addf %132, %134 : vector<16x64xf32>
    %cst_51 = arith.constant 5.000000e-01 : f32
    %136 = vector.broadcast %cst_51 : f32 to vector<16x64xf32>
    %137 = arith.mulf %136, %135 : vector<16x64xf32>
    %cst_52 = arith.constant 4.471500e-02 : f32
    %138 = vector.broadcast %cst_52 : f32 to vector<16x64xf32>
    %139 = arith.mulf %138, %135 : vector<16x64xf32>
    %140 = arith.mulf %139, %135 : vector<16x64xf32>
    %141 = arith.mulf %140, %135 : vector<16x64xf32>
    %142 = arith.addf %135, %141 : vector<16x64xf32>
    %cst_53 = arith.constant 0.797884583 : f32
    %143 = vector.broadcast %cst_53 : f32 to vector<16x64xf32>
    %144 = arith.mulf %143, %142 : vector<16x64xf32>
    %145 = math.tanh %144 : vector<16x64xf32>
    %cst_54 = arith.constant 1.000000e+00 : f32
    %146 = vector.broadcast %cst_54 : f32 to vector<16x64xf32>
    %147 = arith.addf %146, %145 : vector<16x64xf32>
    %148 = arith.mulf %137, %147 : vector<16x64xf32>
    %c0_55 = arith.constant 0 : index
    %c0_56 = arith.constant 0 : index
    %149 = vector.load %arg10[%c0_55, %c0_56] : memref<64x32xf32, #tpu.memory_space<vmem>>, vector<64x32xf32>
    %cst_57 = arith.constant dense<0.000000e+00> : vector<16x32xf32>
    %150 = tpu.matmul %148, %149, %cst_57 {dimension_numbers = #tpu.dot_dimension_numbers<[1], [0], [0], [1], [0, 0, 1, 1], [], []>} : vector<16x64xf32>, vector<64x32xf32>, vector<16x32xf32> -> vector<16x32xf32>
    %c0_58 = arith.constant 0 : index
    %c0_59 = arith.constant 0 : index
    %151 = vector.load %arg11[%c0_58, %c0_59] : memref<1x32xf32, #tpu.memory_space<vmem>>, vector<1x32xf32>
    %152 = vector.broadcast %151 : vector<1x32xf32> to vector<16x32xf32>
    %153 = arith.addf %150, %152 : vector<16x32xf32>
    %154 = arith.addf %153, %130 : vector<16x32xf32>
    %c0_60 = arith.constant 0 : index
    %c0_61 = arith.constant 0 : index
    %155 = vector.load %arg12[%c0_60, %c0_61] : memref<1x32xf32, #tpu.memory_space<vmem>>, vector<1x32xf32>
    %c0_62 = arith.constant 0 : index
    %c0_63 = arith.constant 0 : index
    %156 = vector.load %arg13[%c0_62, %c0_63] : memref<1x32xf32, #tpu.memory_space<vmem>>, vector<1x32xf32>
    %cst_64 = arith.constant dense<0.000000e+00> : vector<16xf32>
    %157 = vector.multi_reduction <add>, %154, %cst_64 [1] : vector<16x32xf32> to vector<16xf32>
    %158 = vector.shape_cast %157 : vector<16xf32> to vector<16x1xf32>
    %cst_65 = arith.constant 3.200000e+01 : f32
    %159 = vector.broadcast %cst_65 : f32 to vector<16x1xf32>
    %160 = arith.divf %158, %159 : vector<16x1xf32>
    %161 = vector.broadcast %160 : vector<16x1xf32> to vector<16x32xf32>
    %162 = arith.subf %154, %161 : vector<16x32xf32>
    %163 = arith.mulf %162, %162 : vector<16x32xf32>
    %cst_66 = arith.constant dense<0.000000e+00> : vector<16xf32>
    %164 = vector.multi_reduction <add>, %163, %cst_66 [1] : vector<16x32xf32> to vector<16xf32>
    %165 = vector.shape_cast %164 : vector<16xf32> to vector<16x1xf32>
    %cst_67 = arith.constant 3.200000e+01 : f32
    %166 = vector.broadcast %cst_67 : f32 to vector<16x1xf32>
    %167 = arith.divf %165, %166 : vector<16x1xf32>
    %168 = vector.broadcast %160 : vector<16x1xf32> to vector<16x32xf32>
    %169 = arith.subf %154, %168 : vector<16x32xf32>
    %cst_68 = arith.constant 9.99999974E-6 : f32
    %170 = vector.broadcast %cst_68 : f32 to vector<16x1xf32>
    %171 = arith.addf %167, %170 : vector<16x1xf32>
    %172 = math.rsqrt %171 : vector<16x1xf32>
    %173 = vector.broadcast %172 : vector<16x1xf32> to vector<16x32xf32>
    %174 = arith.mulf %169, %173 : vector<16x32xf32>
    %175 = vector.broadcast %155 : vector<1x32xf32> to vector<16x32xf32>
    %176 = arith.mulf %174, %175 : vector<16x32xf32>
    %177 = vector.broadcast %156 : vector<1x32xf32> to vector<16x32xf32>
    %178 = arith.addf %176, %177 : vector<16x32xf32>
    %c0_69 = arith.constant 0 : index
    %c0_70 = arith.constant 0 : index
    %179 = vector.load %arg14[%c0_69, %c0_70] : memref<16x32xf32, #tpu.memory_space<vmem>>, vector<16x32xf32>
    tpu.vector_store %arg14[%c0_69, %c0_70], %178 {strides = array<i32>} : memref<16x32xf32, #tpu.memory_space<vmem>>, vector<16x32xf32>,
    return
  }
  func.func @transform_0(%arg0: i32) -> (i32, i32) {
    %c0_i32 = arith.constant 0 : i32
    %c0_i32_0 = arith.constant 0 : i32
    %c0_i32_1 = arith.constant 0 : i32
    return %c0_i32, %c0_i32_0 : i32, i32
  }
  func.func @transform_1(%arg0: i32) -> (i32, i32) {
    %c0_i32 = arith.constant 0 : i32
    %c0_i32_0 = arith.constant 0 : i32
    %c0_i32_1 = arith.constant 0 : i32
    return %c0_i32, %c0_i32_0 : i32, i32
  }
  func.func @transform_2(%arg0: i32) -> (i32, i32) {
    %c0_i32 = arith.constant 0 : i32
    %c0_i32_0 = arith.constant 0 : i32
    %c0_i32_1 = arith.constant 0 : i32
    return %c0_i32, %c0_i32_0 : i32, i32
  }
  func.func @transform_3(%arg0: i32) -> (i32, i32) {
    %c0_i32 = arith.constant 0 : i32
    %c0_i32_0 = arith.constant 0 : i32
    %c0_i32_1 = arith.constant 0 : i32
    return %c0_i32, %c0_i32_0 : i32, i32
  }
  func.func @transform_4(%arg0: i32) -> (i32, i32) {
    %c0_i32 = arith.constant 0 : i32
    %c0_i32_0 = arith.constant 0 : i32
    %c0_i32_1 = arith.constant 0 : i32
    return %c0_i32, %c0_i32_0 : i32, i32
  }
  func.func @transform_5(%arg0: i32) -> (i32, i32) {
    %c0_i32 = arith.constant 0 : i32
    %c0_i32_0 = arith.constant 0 : i32
    %c0_i32_1 = arith.constant 0 : i32
    return %c0_i32, %c0_i32_0 : i32, i32
  }
  func.func @transform_6(%arg0: i32) -> (i32, i32) {
    %c0_i32 = arith.constant 0 : i32
    %c0_i32_0 = arith.constant 0 : i32
    %c0_i32_1 = arith.constant 0 : i32
    return %c0_i32, %c0_i32_0 : i32, i32
  }
  func.func @transform_7(%arg0: i32) -> (i32, i32) {
    %c0_i32 = arith.constant 0 : i32
    %c0_i32_0 = arith.constant 0 : i32
    %c0_i32_1 = arith.constant 0 : i32
    return %c0_i32, %c0_i32_0 : i32, i32
  }
  func.func @transform_8(%arg0: i32) -> (i32, i32) {
    %c0_i32 = arith.constant 0 : i32
    %c0_i32_0 = arith.constant 0 : i32
    %c0_i32_1 = arith.constant 0 : i32
    return %c0_i32, %c0_i32_0 : i32, i32
  }
  func.func @transform_9(%arg0: i32) -> (i32, i32) {
    %c0_i32 = arith.constant 0 : i32
    %c0_i32_0 = arith.constant 0 : i32
    %c0_i32_1 = arith.constant 0 : i32
    return %c0_i32, %c0_i32_0 : i32, i32
  }
  func.func @transform_10(%arg0: i32) -> (i32, i32) {
    %c0_i32 = arith.constant 0 : i32
    %c0_i32_0 = arith.constant 0 : i32
    %c0_i32_1 = arith.constant 0 : i32
    return %c0_i32, %c0_i32_0 : i32, i32
  }
  func.func @transform_11(%arg0: i32) -> (i32, i32) {
    %c0_i32 = arith.constant 0 : i32
    %c0_i32_0 = arith.constant 0 : i32
    %c0_i32_1 = arith.constant 0 : i32
    return %c0_i32, %c0_i32_0 : i32, i32
  }
  func.func @transform_12(%arg0: i32) -> (i32, i32) {
    %c0_i32 = arith.constant 0 : i32
    %c0_i32_0 = arith.constant 0 : i32
    %c0_i32_1 = arith.constant 0 : i32
    return %c0_i32, %c0_i32_0 : i32, i32
  }
  func.func @transform_13(%arg0: i32) -> (i32, i32) {
    %c0_i32 = arith.constant 0 : i32
    %c0_i32_0 = arith.constant 0 : i32
    %c0_i32_1 = arith.constant 0 : i32
    return %c0_i32, %c0_i32_0 : i32, i32
  }
}

</mosaic_0001>

<bundles_post_ra>
// kernel: transformer_encoder_forward.5
= control target key start
LH: loop header
LB: loop body
LE: loop exit
PB: predicated region body
PF: predicated region fallthrough
CT: control target
= control target key end

     0   :  { %vm41_vm0 = vcmask 654336   ;;  %vm151_vm2 = vcmask 261120   ;;  %s413_s1 = inlined_call_operand.vmem [shape: f32[80,32], index: 1, kind: input, shape index: {}]   ;;  %s414_s0 = inlined_call_operand.vmem [shape: f32[32,80], index: 0, kind: input, shape index: {}]   ;;  %s415_s2 = inlined_call_operand.vmem [shape: f32[1,32], index: 2, kind: input, shape index: {}]   ;;  %s416_s3 = inlined_call_operand.vmem [shape: f32[1,32], index: 3, kind: input, shape index: {}]   ;;  %s417_s4 = inlined_call_operand.vmem [shape: f32[1,32], index: 4, kind: input, shape index: {}]   ;;  %s418_s5 = inlined_call_operand.vmem [shape: f32[32,32], index: 5, kind: output, shape index: {}]  }
   0x1   :  { %v24_v0 = vld [vmem:[%s413_s1] sm:$0xff]  ;;  %v25_v1 = vld [vmem:[%s413_s1 + $0x8] sm:$0xff]  ;;  %v26_v2 = vld [vmem:[%s413_s1 + $0x10] sm:$0xff] }
   0x2   :  { %v272_v3 = vpack.c.bf16 %v25_v1, %v24_v0  ;;  %v27_v4 = vld [vmem:[%s413_s1 + $0x18] sm:$0xff]  ;;  %v28_v6 = vld [vmem:[%s413_s1 + $0x20] sm:$0xff]  ;;  %v29_v7 = vld [vmem:[%s413_s1 + $0x28] sm:$0xff] }
   0x3   :  { %v276_v5 = vpack.c.bf16 %v27_v4, %v26_v2  ;;  %v20_v8 = vld [vmem:[%s414_s0] sm:$0xff]  ;;  %v22_v9 = vld [vmem:[%s414_s0 + $0x10] sm:$0xff]  ;;  %v280_v10 = vpack.c.bf16 %v29_v7, %v28_v6  ;;  %v31_v12 = vld [vmem:[%s413_s1 + $0x38] sm:$0xff] }
   0x4   :  { %273 = vmatprep.subr.bf16.mxu0 %v272_v3  ;;  %292 = vmatprep.subr.bf16.mxu1 %v272_v3  ;;  %v30_v11 = vld [vmem:[%s413_s1 + $0x30] sm:$0xff]  ;;  %v32_v14 = vld [vmem:[%s413_s1 + $0x40] sm:$0xff]  ;;  %v33_v15 = vld [vmem:[%s413_s1 + $0x48] sm:$0xff] }
   0x5   :  { %275 = vmatpush3.bf16.msra.mxu0 %v272_v3  ;;  %297 = vmatpush3.bf16.msra.mxu1 %v272_v3  ;;  %v284_v13 = vpack.c.bf16 %v31_v12, %v30_v11  ;;  %v288_v16 = vpack.c.bf16 %v33_v15, %v32_v14  ;;  %v21_v17 = vld [vmem:[%s414_s0 + $0x8] sm:$0xff]  ;;  %v23_v18 = vld [vmem:[%s414_s0 + $0x18] sm:$0xff]  ;;  %v225_v19 = vld [vmem:[%s415_s2] ss:$0 sm:$0xff] }
   0x6   :  { %277 = vmatprep.subr.bf16.mxu0 %v276_v5  ;;  %293 = vmatprep.subr.bf16.mxu1 %v276_v5  ;;  %v231_v15 = vld [vmem:[%s417_s4] ss:$0 sm:$0xff] }
   0x7   :  { %266 = vmatprep.mubr.msk.f32.mxu0 %vm41_vm0, %v20_v8  ;;  %269 = vmatprep.mubr.msk.f32.mxu1 %vm41_vm0, %v22_v9 }
   0x9   :  { %279 = vmatpush3.bf16.msra.mxu0 %v276_v5  ;;  %298 = vmatpush3.bf16.msra.mxu1 %v276_v5 }
   0xa   :  { %281 = vmatprep.subr.bf16.mxu0 %v280_v10  ;;  %294 = vmatprep.subr.bf16.mxu1 %v280_v10 }
   0xd   :  { %283 = vmatpush3.bf16.msra.mxu0 %v280_v10  ;;  %299 = vmatpush3.bf16.msra.mxu1 %v280_v10  ;;  %v230_v10 = vld [vmem:[%s416_s3] ss:$0 sm:$0xff] }
   0xe   :  { %285 = vmatprep.subr.bf16.mxu0 %v284_v13  ;;  %295 = vmatprep.subr.bf16.mxu1 %v284_v13 }
  0x11   :  { %287 = vmatpush3.bf16.msra.mxu0 %v284_v13  ;;  %300 = vmatpush3.bf16.msra.mxu1 %v284_v13 }
  0x12   :  { %289 = vmatprep.subr.bf16.mxu0 %v288_v16  ;;  %296 = vmatprep.subr.bf16.mxu1 %v288_v16 }
  0x15   :  { %291 = vmatpush3.bf16.msra.mxu0 %v288_v16  ;;  %301 = vmatpush3.bf16.msra.mxu1 %v288_v16 }
  0x18   :  { %267 = vmatmul.mubr.msk.f32.vlgmr.msra.gmra.mrb[0].mxu0 %vm41_vm0, %v21_v17  ;;  %270 = vmatmul.mubr.msk.f32.vlgmr.msra.gmra.mrb[0].mxu1 %vm41_vm0, %v23_v18 }
  0xeb   :  { %v268_v20 = vpop.f32.mrb[0].mxu0  ;;  %v271_v21 = vpop.f32.mrb[0].mxu1 }
  0xec   :  { %v126_v22 = vadd.f32 %v268_v20, %v225_v19  ;;  %v136_v23 = vadd.f32 %v271_v21, %v225_v19  ;;  %v120_v24 = vpop.f32.mrb[1].mxu0  ;;  %v130_v25 = vpop.f32.mrb[1].mxu1 }
  0xed   :  { %v121_v26 = vadd.f32 %v225_v19, %v120_v24  ;;  %v131_v27 = vadd.f32 %v225_v19, %v130_v25 }
  0xee   :  { %vm140_vm1 = vcmp.ge.f32.partialorder %v126_v22, 0.0  ;;  %v144_v28 = vmul.f32 0.2, %v126_v22  ;;  %v146_v29 = vmul.f32 0.2, %v136_v23  ;;  %vm142_vm5 = vcmp.ge.f32.partialorder %v136_v23, 0.0 }
  0xef   :  { %vm139_vm3 = vcmp.ge.f32.partialorder %v121_v26, 0.0  ;;  %v143_v30 = vmul.f32 0.2, %v121_v26  ;;  %vm141_vm4 = vcmp.ge.f32.partialorder %v131_v27, 0.0  ;;  %v145_v31 = vmul.f32 0.2, %v131_v27 }
  0xf0   :  { %v148_v32 = vsel %vm140_vm1, %v126_v22, %v144_v28  ;;  %v150_v37 = vsel %vm142_vm5, %v136_v23, %v146_v29 }
  0xf1   :  { %v153_v33 = vsel %vm151_vm2, %v148_v32, 0.0  ;;  %v147_v34 = vsel %vm139_vm3, %v121_v26, %v143_v30  ;;  %v149_v35 = vsel %vm141_vm4, %v131_v27, %v145_v31  ;;  %v157_v41 = vsel %vm151_vm2, %v150_v37, 0.0 }
  0xf2   :  { %v152_v36 = vsel %vm151_vm2, %v147_v34, 0.0  ;;  %v155_v39 = vsel %vm151_vm2, %v149_v35, 0.0 }
  0xf3   :  { %v154_v38 = vadd.f32 %v153_v33, %v152_v36 }
  0xf5   :  { %v156_v40 = vadd.f32 %v155_v39, %v154_v38 }
  0xf7   :  { %v158_v42 = vadd.f32 %v157_v41, %v156_v40 }
  0xf9   :  { %v159_v43 = vrot.slane %v158_v42, 4 }
  0xfb   :  { %v160_v44 = vadd.f32 %v159_v43, %v158_v42 }
  0xfd   :  { %v161_v45 = vrot.slane %v160_v44, 2 }
  0xff   :  { %v162_v46 = vadd.f32 %v161_v45, %v160_v44 }
 0x101   :  { %v163_v47 = vrot.slane %v162_v46, 1 }
 0x103   :  { %v164_v48 = vadd.f32 %v163_v47, %v162_v46 }
 0x105   :  { %v166_v49 = vmul.f32 0.03125, %v164_v48 }
 0x107   :  { %v167_v50 = vsub.f32 %v147_v34, %v166_v49  ;;  %v168_v51 = vsub.f32 %v148_v32, %v166_v49  ;;  %v169_v52 = vsub.f32 %v149_v35, %v166_v49  ;;  %v170_v53 = vsub.f32 %v150_v37, %v166_v49 }
 0x109   :  { %v171_v54 = vmul.f32 %v167_v50, %v167_v50  ;;  %v172_v55 = vmul.f32 %v168_v51, %v168_v51  ;;  %v173_v56 = vmul.f32 %v169_v52, %v169_v52  ;;  %v174_v57 = vmul.f32 %v170_v53, %v170_v53 }
 0x10b   :  { %v175_v58 = vsel %vm151_vm2, %v171_v54, 0.0  ;;  %v176_v59 = vsel %vm151_vm2, %v172_v55, 0.0  ;;  %v178_v61 = vsel %vm151_vm2, %v173_v56, 0.0  ;;  %v180_v63 = vsel %vm151_vm2, %v174_v57, 0.0 }
 0x10c   :  { %v177_v60 = vadd.f32 %v176_v59, %v175_v58 }
 0x10e   :  { %v179_v62 = vadd.f32 %v178_v61, %v177_v60 }
 0x110   :  { %v181_v0 = vadd.f32 %v180_v63, %v179_v62 }
 0x112   :  { %v182_v1 = vrot.slane %v181_v0, 4 }
 0x114   :  { %v183_v2 = vadd.f32 %v182_v1, %v181_v0 }
 0x116   :  { %v184_v3 = vrot.slane %v183_v2, 2 }
 0x118   :  { %v185_v4 = vadd.f32 %v184_v3, %v183_v2 }
 0x11a   :  { %v186_v5 = vrot.slane %v185_v4, 1 }
 0x11c   :  { %v187_v6 = vadd.f32 %v186_v5, %v185_v4 }
 0x11e   :  { %v188_v7 = vmul.f32 0.03125, %v187_v6 }
 0x120   :  { %v189_v8 = vadd.f32 1e-05, %v188_v7 }
 0x122   :  { %302 = vrsqrt.f32 %v189_v8 }
 0x12c   :  { %v303_v9 = vpop.eup %302 }
 0x12d   :  { %v191_v11 = vmul.f32 %v303_v9, %v167_v50  ;;  %v192_v12 = vmul.f32 %v303_v9, %v168_v51  ;;  %v193_v13 = vmul.f32 %v303_v9, %v169_v52  ;;  %v194_v14 = vmul.f32 %v303_v9, %v170_v53 }
 0x12f   :  { %v202_v16 = vmul.f32 %v230_v10, %v191_v11  ;;  %v203_v17 = vmul.f32 %v230_v10, %v192_v12  ;;  %v204_v18 = vmul.f32 %v230_v10, %v193_v13  ;;  %v205_v19 = vmul.f32 %v230_v10, %v194_v14 }
 0x131   :  { %v213_v20 = vadd.f32 %v231_v15, %v202_v16  ;;  %v214_v21 = vadd.f32 %v231_v15, %v203_v17  ;;  %v215_v22 = vadd.f32 %v231_v15, %v204_v18  ;;  %v216_v23 = vadd.f32 %v231_v15, %v205_v19 }
 0x133   :  { %217 = vst.msk [vmem:[%s418_s5] sm:$0xff] %vm151_vm2, %v213_v20  ;;  %218 = vst.msk [vmem:[%s418_s5 + $0x8] sm:$0xff] %vm151_vm2, %v214_v21 }
 0x134   :  { %219 = vst.msk [vmem:[%s418_s5 + $0x10] sm:$0xff] %vm151_vm2, %v215_v22  ;;  %220 = vst.msk [vmem:[%s418_s5 + $0x18] sm:$0xff] %vm151_vm2, %v216_v23 }

// kernel: transformer_encoder_forward.6
= control target key start
LH: loop header
LB: loop body
LE: loop exit
PB: predicated region body
PF: predicated region fallthrough
CT: control target
= control target key end

     0   :  { %v388_v0 = vmov 0.0|0.0   ;;  %vm54_vm0 = vcmask 261120   ;;  %s557_s2 = inlined_call_operand.vmem [shape: f32[160,32], index: 2, kind: input, shape index: {}]   ;;  %s558_s0 = inlined_call_operand.vmem [shape: f32[16,160], index: 0, kind: input, shape index: {}]   ;;  %s559_s1 = inlined_call_operand.vmem [shape: f32[16,160], index: 1, kind: input, shape index: {}]   ;;  %s560_s3 = inlined_call_operand.vmem [shape: f32[1,32], index: 3, kind: input, shape index: {}]   ;;  %s561_s4 = inlined_call_operand.vmem [shape: f32[1,32], index: 4, kind: input, shape index: {}]   ;;  %s562_s5 = inlined_call_operand.vmem [shape: f32[1,32], index: 5, kind: input, shape index: {}]   ;;  %s563_s6 = inlined_call_operand.vmem [shape: f32[16,32], index: 6, kind: output, shape index: {}]  }
   0x1   :  { %325 = vmatprep.subr.bf16.mxu0 %v388_v0  ;;  %355 = vmatprep.subr.bf16.mxu1 %v388_v0  ;;  %v23_v1 = vld [vmem:[%s557_s2] sm:$0xff]  ;;  %v24_v2 = vld [vmem:[%s557_s2 + $0x8] sm:$0xff]  ;;  %v25_v3 = vld [vmem:[%s557_s2 + $0x10] sm:$0xff] }
   0x2   :  { %v326_v4 = vpack.c.bf16 %v24_v2, %v23_v1  ;;  %v26_v5 = vld [vmem:[%s557_s2 + $0x18] sm:$0xff]  ;;  %v27_v7 = vld [vmem:[%s557_s2 + $0x20] sm:$0xff]  ;;  %v28_v8 = vld [vmem:[%s557_s2 + $0x28] sm:$0xff] }
   0x3   :  { %v329_v6 = vpack.c.bf16 %v26_v5, %v25_v3  ;;  %v45_v9 = vld [vmem:[%s558_s0 + $0x8] sm:$0xff]  ;;  %v332_v10 = vpack.c.bf16 %v28_v8, %v27_v7  ;;  %v29_v12 = vld [vmem:[%s557_s2 + $0x30] sm:$0xff]  ;;  %v30_v13 = vld [vmem:[%s557_s2 + $0x38] sm:$0xff] }
   0x4   :  { %327 = vmatpush1.bf16.msra.mxu0 %v326_v4  ;;  %357 = vmatpush1.bf16.msra.mxu1 %v326_v4  ;;  %v137_v11 = vld [vmem:[%s559_s1 + $0x8] sm:$0xff]  ;;  %v335_v14 = vpack.c.bf16 %v30_v13, %v29_v12  ;;  %v31_v15 = vld [vmem:[%s557_s2 + $0x40] sm:$0xff]  ;;  %v33_v18 = vld [vmem:[%s557_s2 + $0x50] sm:$0xff] }
   0x5   :  { %328 = vmatprep.subr.bf16.mxu0 %v388_v0  ;;  %358 = vmatprep.subr.bf16.mxu1 %v388_v0  ;;  %v32_v16 = vld [vmem:[%s557_s2 + $0x48] sm:$0xff]  ;;  %v34_v19 = vld [vmem:[%s557_s2 + $0x58] sm:$0xff]  ;;  %v35_v21 = vld [vmem:[%s557_s2 + $0x60] sm:$0xff] }
   0x6   :  { %319 = vmatprep.mubr.msk.f32.mxu0 %vm54_vm0, %v45_v9  ;;  %321 = vmatprep.mubr.msk.f32.mxu1 %vm54_vm0, %v137_v11  ;;  %v338_v17 = vpack.c.bf16 %v32_v16, %v31_v15  ;;  %v341_v20 = vpack.c.bf16 %v34_v19, %v33_v18  ;;  %v36_v22 = vld [vmem:[%s557_s2 + $0x68] sm:$0xff]  ;;  %v37_v24 = vld [vmem:[%s557_s2 + $0x70] sm:$0xff]  ;;  %v38_v25 = vld [vmem:[%s557_s2 + $0x78] sm:$0xff] }
   0x7   :  { %v344_v23 = vpack.c.bf16 %v36_v22, %v35_v21  ;;  %v347_v26 = vpack.c.bf16 %v38_v25, %v37_v24  ;;  %v39_v27 = vld [vmem:[%s557_s2 + $0x80] sm:$0xff]  ;;  %v40_v28 = vld [vmem:[%s557_s2 + $0x88] sm:$0xff]  ;;  %v41_v30 = vld [vmem:[%s557_s2 + $0x90] sm:$0xff] }
   0x8   :  { %330 = vmatpush1.bf16.msra.mxu0 %v329_v6  ;;  %360 = vmatpush1.bf16.msra.mxu1 %v329_v6  ;;  %v350_v29 = vpack.c.bf16 %v40_v28, %v39_v27  ;;  %v42_v31 = vld [vmem:[%s557_s2 + $0x98] sm:$0xff]  ;;  %v44_v33 = vld [vmem:[%s558_s0] sm:$0xff]  ;;  %v46_v37 = vld [vmem:[%s558_s0 + $0x10] sm:$0xff] }
   0x9   :  { %331 = vmatprep.subr.bf16.mxu0 %v388_v0  ;;  %361 = vmatprep.subr.bf16.mxu1 %v388_v0  ;;  %v353_v32 = vpack.c.bf16 %v42_v31, %v41_v30  ;;  %v136_v34 = vld [vmem:[%s559_s1] sm:$0xff]  ;;  %v47_v35 = vld [vmem:[%s558_s0 + $0x18] sm:$0xff]  ;;  %v138_v38 = vld [vmem:[%s559_s1 + $0x10] sm:$0xff] }
   0xa   :  { %v139_v36 = vld [vmem:[%s559_s1 + $0x18] sm:$0xff]  ;;  %v318_v39 = vld [vmem:[%s560_s3] ss:$0 sm:$0xff] }
   0xc   :  { %333 = vmatpush1.bf16.msra.mxu0 %v332_v10  ;;  %363 = vmatpush1.bf16.msra.mxu1 %v332_v10 }
   0xd   :  { %334 = vmatprep.subr.bf16.mxu0 %v388_v0  ;;  %364 = vmatprep.subr.bf16.mxu1 %v388_v0 }
  0x10   :  { %336 = vmatpush1.bf16.msra.mxu0 %v335_v14  ;;  %366 = vmatpush1.bf16.msra.mxu1 %v335_v14 }
  0x11   :  { %337 = vmatprep.subr.bf16.mxu0 %v388_v0  ;;  %367 = vmatprep.subr.bf16.mxu1 %v388_v0 }
  0x14   :  { %339 = vmatpush1.bf16.msra.mxu0 %v338_v17  ;;  %369 = vmatpush1.bf16.msra.mxu1 %v338_v17 }
  0x15   :  { %340 = vmatprep.subr.bf16.mxu0 %v388_v0  ;;  %370 = vmatprep.subr.bf16.mxu1 %v388_v0 }
  0x18   :  { %342 = vmatpush1.bf16.msra.mxu0 %v341_v20  ;;  %372 = vmatpush1.bf16.msra.mxu1 %v341_v20 }
  0x19   :  { %343 = vmatprep.subr.bf16.mxu0 %v388_v0  ;;  %373 = vmatprep.subr.bf16.mxu1 %v388_v0 }
  0x1c   :  { %345 = vmatpush1.bf16.msra.mxu0 %v344_v23  ;;  %375 = vmatpush1.bf16.msra.mxu1 %v344_v23 }
  0x1d   :  { %346 = vmatprep.subr.bf16.mxu0 %v388_v0  ;;  %376 = vmatprep.subr.bf16.mxu1 %v388_v0 }
  0x20   :  { %348 = vmatpush1.bf16.msra.mxu0 %v347_v26  ;;  %378 = vmatpush1.bf16.msra.mxu1 %v347_v26 }
  0x21   :  { %349 = vmatprep.subr.bf16.mxu0 %v388_v0  ;;  %379 = vmatprep.subr.bf16.mxu1 %v388_v0 }
  0x24   :  { %351 = vmatpush1.bf16.msra.mxu0 %v350_v29  ;;  %381 = vmatpush1.bf16.msra.mxu1 %v350_v29 }
  0x25   :  { %352 = vmatprep.subr.bf16.mxu0 %v388_v0  ;;  %382 = vmatprep.subr.bf16.mxu1 %v388_v0 }
  0x28   :  { %354 = vmatpush1.bf16.msra.mxu0 %v353_v32  ;;  %384 = vmatpush1.bf16.msra.mxu1 %v353_v32 }
  0x2b   :  { %126 = vmatmul.mubr.f32.vlgmr.msra.gmra.mrb[0].mxu0 %v44_v33  ;;  %211 = vmatmul.mubr.f32.vlgmr.msra.gmra.mrb[0].mxu1 %v136_v34 }
  0x2c   :  { %320 = vmatprep.mubr.msk.f32.mxu0 %vm54_vm0, %v47_v35  ;;  %322 = vmatprep.mubr.msk.f32.mxu1 %vm54_vm0, %v139_v36 }
  0x2f   :  { %131 = vmatmul.mubr.f32.gmra.mrb[2].mxu0 %v46_v37  ;;  %216 = vmatmul.mubr.f32.gmra.mrb[2].mxu1 %v138_v38 }
  0xfe   :  { %v127_v40 = vpop.f32.mrb[0].mxu0  ;;  %v212_v41 = vpop.f32.mrb[0].mxu1 }
  0xff   :  { %v128_v42 = vadd.f32 %v318_v39, %v127_v40  ;;  %v213_v43 = vadd.f32 %v318_v39, %v212_v41  ;;  %v129_v44 = vpop.f32.mrb[1].mxu0  ;;  %v214_v45 = vpop.f32.mrb[1].mxu1 }
 0x101   :  { %vm221_vm1 = vcmp.ge.f32.partialorder %v128_v42, 0.0  ;;  %v223_v46 = vmul.f32 0.2, %v128_v42  ;;  %vm227_vm2 = vcmp.ge.f32.partialorder %v213_v43, 0.0  ;;  %v229_v47 = vmul.f32 0.2, %v213_v43 }
 0x102   :  { %v132_v48 = vpop.f32.mrb[2].mxu0  ;;  %v217_v49 = vpop.f32.mrb[2].mxu1 }
 0x103   :  { %v133_v50 = vadd.f32 %v318_v39, %v132_v48  ;;  %v218_v51 = vadd.f32 %v318_v39, %v217_v49  ;;  %v134_v52 = vpop.f32.mrb[3].mxu0  ;;  %v219_v53 = vpop.f32.mrb[3].mxu1  ;;  %v225_v54 = vsel %vm221_vm1, %v128_v42, %v223_v46  ;;  %v231_v55 = vsel %vm227_vm2, %v213_v43, %v229_v47  ;;  %v323_v46 = vld [vmem:[%s561_s4] ss:$0 sm:$0xff] }
 0x104   :  { %v233_v60 = vsel %vm54_vm0, %v225_v54, 0.0  ;;  %v242_v61 = vsel %vm54_vm0, %v231_v55, 0.0 }
 0x105   :  { %vm222_vm3 = vcmp.ge.f32.partialorder %v133_v50, 0.0  ;;  %v224_v56 = vmul.f32 0.2, %v133_v50  ;;  %vm228_vm4 = vcmp.ge.f32.partialorder %v218_v51, 0.0  ;;  %v230_v57 = vmul.f32 0.2, %v218_v51 }
 0x107   :  { %v226_v58 = vsel %vm222_vm3, %v133_v50, %v224_v56  ;;  %v232_v59 = vsel %vm228_vm4, %v218_v51, %v230_v57  ;;  %v324_v51 = vld [vmem:[%s562_s5] ss:$0 sm:$0xff] }
 0x108   :  { %v234_v62 = vsel %vm54_vm0, %v226_v58, 0.0  ;;  %v243_v63 = vsel %vm54_vm0, %v232_v59, 0.0 }
 0x109   :  { %v235_v0 = vadd.f32 %v234_v62, %v233_v60  ;;  %v244_v1 = vadd.f32 %v243_v63, %v242_v61 }
 0x10b   :  { %v236_v2 = vrot.slane %v235_v0, 4  ;;  %v245_v3 = vrot.slane %v244_v1, 4 }
 0x10d   :  { %v237_v4 = vadd.f32 %v236_v2, %v235_v0  ;;  %v246_v5 = vadd.f32 %v245_v3, %v244_v1 }
 0x10f   :  { %v238_v6 = vrot.slane %v237_v4, 2  ;;  %v247_v7 = vrot.slane %v246_v5, 2 }
 0x111   :  { %v239_v8 = vadd.f32 %v238_v6, %v237_v4  ;;  %v248_v9 = vadd.f32 %v247_v7, %v246_v5 }
 0x113   :  { %v240_v10 = vrot.slane %v239_v8, 1  ;;  %v249_v11 = vrot.slane %v248_v9, 1 }
 0x115   :  { %v241_v12 = vadd.f32 %v240_v10, %v239_v8  ;;  %v250_v13 = vadd.f32 %v249_v11, %v248_v9 }
 0x117   :  { %v251_v14 = vadd.f32 %v250_v13, %v241_v12 }
 0x119   :  { %v253_v15 = vmul.f32 0.03125, %v251_v14 }
 0x11b   :  { %v254_v16 = vsub.f32 %v225_v54, %v253_v15  ;;  %v255_v17 = vsub.f32 %v226_v58, %v253_v15  ;;  %v267_v18 = vsub.f32 %v231_v55, %v253_v15  ;;  %v268_v19 = vsub.f32 %v232_v59, %v253_v15 }
 0x11d   :  { %v256_v20 = vmul.f32 %v254_v16, %v254_v16  ;;  %v257_v21 = vmul.f32 %v255_v17, %v255_v17  ;;  %v269_v22 = vmul.f32 %v267_v18, %v267_v18  ;;  %v270_v23 = vmul.f32 %v268_v19, %v268_v19 }
 0x11f   :  { %v258_v24 = vsel %vm54_vm0, %v256_v20, 0.0  ;;  %v259_v25 = vsel %vm54_vm0, %v257_v21, 0.0  ;;  %v271_v26 = vsel %vm54_vm0, %v269_v22, 0.0  ;;  %v272_v27 = vsel %vm54_vm0, %v270_v23, 0.0 }
 0x120   :  { %v260_v28 = vadd.f32 %v259_v25, %v258_v24  ;;  %v273_v29 = vadd.f32 %v272_v27, %v271_v26 }
 0x122   :  { %v261_v30 = vrot.slane %v260_v28, 4  ;;  %v274_v31 = vrot.slane %v273_v29, 4 }
 0x124   :  { %v262_v32 = vadd.f32 %v261_v30, %v260_v28  ;;  %v275_v33 = vadd.f32 %v274_v31, %v273_v29 }
 0x126   :  { %v263_v34 = vrot.slane %v262_v32, 2  ;;  %v276_v35 = vrot.slane %v275_v33, 2 }
 0x128   :  { %v264_v36 = vadd.f32 %v263_v34, %v262_v32  ;;  %v277_v37 = vadd.f32 %v276_v35, %v275_v33 }
 0x12a   :  { %v265_v38 = vrot.slane %v264_v36, 1  ;;  %v278_v39 = vrot.slane %v277_v37, 1 }
 0x12c   :  { %v266_v40 = vadd.f32 %v265_v38, %v264_v36  ;;  %v279_v41 = vadd.f32 %v278_v39, %v277_v37 }
 0x12e   :  { %v280_v42 = vadd.f32 %v279_v41, %v266_v40 }
 0x130   :  { %v281_v43 = vmul.f32 0.03125, %v280_v42 }
 0x132   :  { %v282_v44 = vadd.f32 1e-05, %v281_v43 }
 0x134   :  { %386 = vrsqrt.f32 %v282_v44 }
 0x13e   :  { %v387_v45 = vpop.eup %386 }
 0x13f   :  { %v286_v47 = vmul.f32 %v387_v45, %v254_v16  ;;  %v287_v48 = vmul.f32 %v387_v45, %v255_v17  ;;  %v304_v49 = vmul.f32 %v387_v45, %v267_v18  ;;  %v305_v50 = vmul.f32 %v387_v45, %v268_v19 }
 0x141   :  { %v294_v52 = vmul.f32 %v323_v46, %v286_v47  ;;  %v295_v53 = vmul.f32 %v323_v46, %v287_v48  ;;  %v306_v54 = vmul.f32 %v323_v46, %v304_v49  ;;  %v307_v55 = vmul.f32 %v323_v46, %v305_v50 }
 0x143   :  { %v302_v56 = vadd.f32 %v324_v51, %v294_v52  ;;  %v303_v57 = vadd.f32 %v324_v51, %v295_v53  ;;  %v308_v58 = vadd.f32 %v324_v51, %v306_v54  ;;  %v309_v59 = vadd.f32 %v324_v51, %v307_v55 }
 0x145   :  { %v310_v60 = vmax.f32 %v302_v56, %v308_v58  ;;  %v311_v61 = vmax.f32 %v303_v57, %v309_v59 }
 0x147   :  { %312 = vst.msk [vmem:[%s563_s6] sm:$0xff] %vm54_vm0, %v310_v60  ;;  %313 = vst.msk [vmem:[%s563_s6 + $0x8] sm:$0xff] %vm54_vm0, %v311_v61 }

// kernel: transformer_encoder_forward.7
= control target key start
LH: loop header
LB: loop body
LE: loop exit
PB: predicated region body
PF: predicated region fallthrough
CT: control target
= control target key end

     0   :  { %vm30_vm0 = vcmask 261120   ;;  %s214_s1 = inlined_call_operand.vmem [shape: f32[32,32], index: 1, kind: input, shape index: {}]   ;;  %s215_s0 = inlined_call_operand.vmem [shape: f32[16,32], index: 0, kind: input, shape index: {}]   ;;  %s216_s2 = inlined_call_operand.vmem [shape: f32[1,32], index: 2, kind: input, shape index: {}]   ;;  %s217_s3 = inlined_call_operand.vmem [shape: f32[16,32], index: 3, kind: input, shape index: {}]   ;;  %s218_s4 = inlined_call_operand.vmem [shape: f32[16,32], index: 4, kind: output, shape index: {}]  }
   0x1   :  { %v19_v0 = vld [vmem:[%s214_s1] sm:$0xff]  ;;  %v20_v1 = vld [vmem:[%s214_s1 + $0x8] sm:$0xff]  ;;  %v21_v2 = vld [vmem:[%s214_s1 + $0x10] sm:$0xff] }
   0x2   :  { %v144_v3 = vpack.c.bf16 %v20_v1, %v19_v0  ;;  %v22_v4 = vld [vmem:[%s214_s1 + $0x18] sm:$0xff]  ;;  %v17_v5 = vld [vmem:[%s215_s0] sm:$0xff]  ;;  %v18_v7 = vld [vmem:[%s215_s0 + $0x8] sm:$0xff] }
   0x3   :  { %v148_v6 = vpack.c.bf16 %v22_v4, %v21_v2  ;;  %141 = vmatprep.mubr.msk.f32.mxu0 %vm30_vm0, %v17_v5  ;;  %v124_v8 = vld [vmem:[%s216_s2] ss:$0 sm:$0xff]  ;;  %v115_v12 = vld [vmem:[%s217_s3 + $0x8] sm:$0xff] }
   0x4   :  { %145 = vmatprep.subr.bf16.mxu0 %v144_v3  ;;  %v114_v15 = vld [vmem:[%s217_s3] sm:$0xff] }
   0x5   :  { %147 = vmatpush3.bf16.msra.mxu0 %v144_v3 }
   0x6   :  { %149 = vmatprep.subr.bf16.mxu0 %v148_v6 }
   0x9   :  { %151 = vmatpush3.bf16.msra.mxu0 %v148_v6 }
   0xc   :  { %142 = vmatmul.mubr.msk.f32.vlgmr.msra.gmra.mrb[0].mxu0 %vm30_vm0, %v18_v7 }
  0xdf   :  { %v143_v9 = vpop.f32.mrb[0].mxu0 }
  0xe0   :  { %v109_v10 = vadd.f32 %v143_v9, %v124_v8  ;;  %v103_v11 = vpop.f32.mrb[1].mxu0 }
  0xe1   :  { %v104_v13 = vadd.f32 %v124_v8, %v103_v11 }
  0xe2   :  { %v113_v14 = vmul.f32 5.656854, %v109_v10 }
  0xe3   :  { %v112_v16 = vmul.f32 5.656854, %v104_v13 }
  0xe4   :  { %v117_v17 = vadd.f32 %v115_v12, %v113_v14 }
  0xe5   :  { %v116_v18 = vadd.f32 %v114_v15, %v112_v16 }
  0xe6   :  { %119 = vst.msk [vmem:[%s218_s4 + $0x8] sm:$0xff] %vm30_vm0, %v117_v17 }
  0xe7   :  { %118 = vst.msk [vmem:[%s218_s4] sm:$0xff] %vm30_vm0, %v116_v18 }

// kernel: transformer_encoder_forward.9
= control target key start
LH: loop header
LB: loop body
LE: loop exit
PB: predicated region body
PF: predicated region fallthrough
CT: control target
= control target key end

     0   :  { %vm58_vm0 = vcmask 261120   ;;  %s2847_s0 = inlined_call_operand.vmem [shape: f32[16,32], index: 0, kind: input, shape index: {}]   ;;  %s2848_s1 = inlined_call_operand.vmem [shape: f32[32,96], index: 1, kind: input, shape index: {}]   ;;  %s2849_s2 = inlined_call_operand.vmem [shape: f32[1,96], index: 2, kind: input, shape index: {}]   ;;  %s2850_s3 = inlined_call_operand.vmem [shape: f32[32,32], index: 3, kind: input, shape index: {}]   ;;  %s2851_s4 = inlined_call_operand.vmem [shape: f32[1,32], index: 4, kind: input, shape index: {}]   ;;  %s2852_s5 = inlined_call_operand.vmem [shape: f32[1,32], index: 5, kind: input, shape index: {}]   ;;  %s2853_s6 = inlined_call_operand.vmem [shape: f32[1,32], index: 6, kind: input, shape index: {}]   ;;  %s2854_s7 = inlined_call_operand.vmem [shape: f32[32,64], index: 7, kind: input, shape index: {}]   ;;  %s2855_s8 = inlined_call_operand.vmem [shape: f32[1,64], index: 8, kind: input, shape index: {}]   ;;  %s2856_s9 = inlined_call_operand.vmem [shape: f32[64,32], index: 9, kind: input, shape index: {}]   ;;  %s2857_s10 = inlined_call_operand.vmem [shape: f32[1,32], index: 10, kind: input, shape index: {}]   ;;  %s2858_s11 = inlined_call_operand.vmem [shape: f32[1,32], index: 11, kind: input, shape index: {}]   ;;  %s2859_s12 = inlined_call_operand.vmem [shape: f32[1,32], index: 12, kind: input, shape index: {}]   ;;  %s2860_s13 = inlined_call_operand.hbm [shape: f32[16,32], index: 13, kind: output, shape index: {}]  }
   0x1   :  { %v47_v0 = vld [vmem:[%s2848_s1] sm:$0xff]  ;;  %v48_v1 = vld [vmem:[%s2848_s1 + $0x8] sm:$0xff]  ;;  %v49_v2 = vld [vmem:[%s2848_s1 + $0x10] sm:$0xff] }
   0x2   :  { %v2375_v3 = vpack.c.bf16 %v48_v1, %v47_v0  ;;  %v50_v4 = vld [vmem:[%s2848_s1 + $0x18] sm:$0xff]  ;;  %v2598_v5 = vld [vmem:[%s2847_s0] sm:$0xff] }
   0x3   :  { %v2379_v6 = vpack.c.bf16 %v50_v4, %v49_v2  ;;  %2242 = vmatprep.mubr.msk.f32.mxu1 %vm58_vm0, %v2598_v5 }
   0x4   :  { %18 = vsyncpa [#allocation3], 0  ;;  %2376 = vmatprep.subr.bf16.mxu1 %v2375_v3  ;;  %v2605_v7 = vld [vmem:[%s2847_s0 + $0x8] sm:$0xff]  ;;  %v2497_v8 = vmov 0.0   ;;  %vm2498_vm1 = vmmov 0   ;;  %s2499_s0 = smov 96  }
   0x5   :  { %2378 = vmatpush3.bf16.msra.mxu1 %v2375_v3  ;;  %2255 = vmatprep.subr.mxu0 %v2497_v8  ;;  %v2122_v9 = vld [vmem:[%s2849_s2] ss:$0 sm:$0xff]  ;;  %s2500_s21 = smov 64   ;;  %s2501_s22 = smov 120   ;;  %vm145_vm2 = vcmask 64512   ;;  %vm1976_vm3 = vcmask 523264  }
   0x6   :  { %2380 = vmatprep.subr.bf16.mxu1 %v2379_v6  ;;  %2257 = vmatprep.mubr.msk.f32.mxu0 %vm2498_vm1, %v2497_v8  ;;  %s2502_s2 = smov 88   ;;  %s2503_s23 = smov 80  }
   0x7   :  { %s2504_s24 = smov 56   ;;  %s2505_s25 = smov 112  }
   0x8   :  { %s2506_s26 = smov 48   ;;  %s2507_s27 = smov 72  }
   0x9   :  { %2382 = vmatpush3.bf16.msra.mxu1 %v2379_v6  ;;  %s2508_s28 = smov 104   ;;  %s2509_s18 = smov 40  }
   0xa   :  { %2245 = vmatprep.subr.mxu1 %v2497_v8 }
   0xc   :  { %2243 = vmatmul.mubr.msk.f32.vlgmr.msra.gmra.mrb[0].mxu1 %vm58_vm0, %v2605_v7 }
   0xd   :  { %2247 = vmatprep.mubr.msk.f32.mxu1 %vm2498_vm1, %v2497_v8 }
  0xdf   :  { %v2244_v10 = vpop.f32.mrb[0].mxu1 }
  0xe0   :  { %v131_v11 = vpop.f32.mrb[1].mxu1  ;;  %v2621_v13 = vadd.f32 %v2244_v10, %v2122_v9 }
  0xe1   :  { %v2618_v12 = vadd.f32 %v2122_v9, %v131_v11 }
  0xe2   :  { %v2626_v14 = vmul.f32 0.35355338, %v2621_v13 }
  0xe3   :  { %143 = vrot.lane.b32.xlu0 %v2618_v12, %s2499_s0  ;;  %v2632_v16 = vmul.f32 0.35355338, %v2618_v12 }
  0xe7   :  { %222 = vrot.lane.b32.xlu0 %v2621_v13, %s2499_s0 }
  0xeb   :  { %397 = vrot.lane.b32.xlu0 %v2621_v13, %s2500_s21 }
  0xef   :  { %552 = vrot.lane.b32.xlu0 %v2626_v14, %s2501_s22 }
 0x155   :  { %v144_v15 = vpop.permute.xlu0 %143 }
 0x156   :  { %2246 = vmatpush3.xpose.msk.msra.mxu1 %vm145_vm2, %v144_v15 }
 0x157   :  { %2250 = vmatprep.subr.mxu1 %v2497_v8 }
 0x159   :  { %v223_v17 = vpop.permute.xlu0 %222  ;;  %2248 = vmatmul.mubr.msk.f32.vlgmr.msra.gmra.mrb[2].mxu1 %vm145_vm2, %v2632_v16 }
 0x15a   :  { %2251 = vmatpush3.xpose.msk.msra.mxu1 %vm145_vm2, %v223_v17  ;;  %2252 = vmatprep.mubr.msk.f32.mxu1 %vm2498_vm1, %v2497_v8 }
 0x15b   :  { %2260 = vmatprep.subr.mxu1 %v2497_v8 }
 0x15d   :  { %v398_v18 = vpop.permute.xlu0 %397  ;;  %2253 = vmatmul.mubr.msk.f32.vlgmr.msra.gmra.mrb[4].mxu1 %vm145_vm2, %v2626_v14 }
 0x15e   :  { %2261 = vmatpush3.msra.mxu1 %v398_v18  ;;  %2262 = vmatprep.mubr.msk.f32.mxu1 %vm2498_vm1, %v2497_v8 }
 0x15f   :  { %2270 = vmatprep.subr.mxu1 %v2497_v8 }
 0x161   :  { %v553_v25 = vpop.permute.xlu0 %552 }
 0x22c   :  { %v217_v19 = vpop.f32.mrb[2].mxu1 }
 0x22d   :  { %v2249_v20 = vpop.f32.mrb[3].mxu1  ;;  %v299_v21 = vsel %vm145_vm2, %v217_v19, -inf }
 0x22e   :  { %300 = vmax.xlane.f32.xlu0 %v299_v21  ;;  %v473_v20 = vld [vmem:[%s2850_s3] sm:$0xff] }
 0x230   :  { %v295_v22 = vpop.f32.mrb[4].mxu1 }
 0x231   :  { %v2254_v23 = vpop.f32.mrb[5].mxu1  ;;  %v302_v24 = vsel %vm145_vm2, %v295_v22, -inf }
 0x232   :  { %303 = vmax.xlane.f32.xlu1 %v302_v24 }
 0x244   :  { %321 = vrot.lane.b32.xlu0 %v2618_v12, %s2500_s21 }
 0x248   :  { %474 = vrot.lane.b32.xlu0 %v2632_v16, %s2501_s22 }
 0x2bb   :  { %v301_v26 = vpop.xlane.xlu0 %300 }
 0x2bc   :  { %v305_v33 = vsub.f32 %v217_v19, %v301_v26  ;;  %v804_v19 = vld [vmem:[%s2850_s3 + $0x8] sm:$0xff] }
 0x2be   :  { %v307_v34 = vmul.f32 1.442695, %v305_v33 }
 0x2bf   :  { %v322_v27 = vpop.permute.xlu0 %321  ;;  %v304_v28 = vpop.xlane.xlu1 %303 }
 0x2c0   :  { %v306_v29 = vsub.f32 %v295_v22, %v304_v28  ;;  %2256 = vmatpush3.msra.mxu0 %v322_v27 }
 0x2c1   :  { %2265 = vmatprep.subr.mxu0 %v2497_v8 }
 0x2c2   :  { %v309_v30 = vmul.f32 1.442695, %v306_v29 }
 0x2c3   :  { %v475_v45 = vpop.permute.xlu0 %474 }
 0x2c4   :  { %2429 = vpow2.f32 %v309_v30 }
 0x2c5   :  { %2431 = vpow2.f32 %v307_v34 }
 0x2ce   :  { %v2430_v31 = vpop.eup %2429 }
 0x2cf   :  { %v314_v32 = vsel %vm145_vm2, %v2430_v31, 0.0  ;;  %v2432_v35 = vpop.eup %2431 }
 0x2d0   :  { %315 = vadd.xlane.f32.xlu1 %v314_v32  ;;  %v311_v36 = vsel %vm145_vm2, %v2432_v35, 0.0 }
 0x2e1   :  { %554 = vrot.lane.b32.xlu1 %v2621_v13, %s2502_s2 }
 0x305   :  { %312 = vadd.xlane.f32.xlu1 %v311_v36 }
 0x316   :  { %476 = vrot.lane.b32.xlu1 %v2618_v12, %s2502_s2 }
 0x31a   :  { %969 = vrot.lane.b32.xlu1 %v2618_v12, %s2503_s23 }
 0x35d   :  { %v316_v37 = vpop.xlane.xlu1 %315 }
 0x35e   :  { %2433 = vrcp.f32 %v316_v37 }
 0x361   :  { %v555_v40 = vpop.permute.xlu1 %554 }
 0x368   :  { %v2434_v38 = vpop.eup %2433 }
 0x369   :  { %v320_v39 = vmul.f32 %v2434_v38, %v2430_v31 }
 0x36b   :  { %2263 = vmatmul.mubr.msk.f32.vlgmr.msra.gmra.mrb[6].mxu1 %vm145_vm2, %v320_v39 }
 0x36c   :  { %2271 = vmatpush3.xpose.msk.msra.mxu1 %vm145_vm2, %v555_v40  ;;  %2272 = vmatprep.mubr.msk.f32.mxu1 %vm2498_vm1, %v2497_v8 }
 0x36d   :  { %2280 = vmatprep.subr.mxu1 %v2497_v8 }
 0x36f   :  { %2273 = vmatmul.mubr.msk.f32.vlgmr.msra.gmra.mrb[8].mxu1 %vm145_vm2, %v553_v25 }
 0x370   :  { %2282 = vmatprep.mubr.msk.f32.mxu1 %vm2498_vm1, %v2497_v8 }
 0x392   :  { %v313_v41 = vpop.xlane.xlu1 %312 }
 0x393   :  { %2435 = vrcp.f32 %v313_v41 }
 0x396   :  { %v477_v44 = vpop.permute.xlu1 %476 }
 0x39a   :  { %v970_v9 = vpop.permute.xlu1 %969 }
 0x39d   :  { %v2436_v42 = vpop.eup %2435 }
 0x39e   :  { %v319_v43 = vmul.f32 %v2436_v42, %v2432_v35  ;;  %v1297_v42 = vld [vmem:[%s2850_s3 + $0x10] sm:$0xff] }
 0x3a0   :  { %2258 = vmatmul.mubr.msk.f32.vlgmr.msra.gmra.mrb[0].mxu0 %vm145_vm2, %v319_v43 }
 0x3a1   :  { %2266 = vmatpush3.xpose.msk.msra.mxu0 %vm145_vm2, %v477_v44  ;;  %2267 = vmatprep.mubr.msk.f32.mxu0 %vm2498_vm1, %v2497_v8 }
 0x3a2   :  { %2275 = vmatprep.subr.mxu0 %v2497_v8 }
 0x3a4   :  { %2268 = vmatmul.mubr.msk.f32.vlgmr.msra.gmra.mrb[2].mxu0 %vm145_vm2, %v475_v45 }
 0x3a5   :  { %2277 = vmatprep.mubr.msk.f32.mxu0 %vm2498_vm1, %v2497_v8 }
 0x43e   :  { %v2672_v46 = vpop.f32.mrb[6].mxu1 }
 0x43f   :  { %v2264_v47 = vpop.f32.mrb[7].mxu1 }
 0x442   :  { %v626_v48 = vpop.f32.mrb[8].mxu1 }
 0x443   :  { %v2274_v49 = vpop.f32.mrb[9].mxu1  ;;  %v633_v50 = vsel %vm145_vm2, %v626_v48, -inf }
 0x444   :  { %634 = vmax.xlane.f32.xlu0 %v633_v50 }
 0x45a   :  { %728 = vrot.lane.b32.xlu0 %v2621_v13, %s2504_s24 }
 0x45e   :  { %967 = vrot.lane.b32.xlu0 %v2632_v16, %s2505_s25 }
 0x462   :  { %1047 = vrot.lane.b32.xlu0 %v2621_v13, %s2503_s23 }
 0x473   :  { %v2679_v51 = vpop.f32.mrb[0].mxu0 }
 0x474   :  { %v2259_v52 = vpop.f32.mrb[1].mxu0 }
 0x477   :  { %v548_v53 = vpop.f32.mrb[2].mxu0 }
 0x478   :  { %v2269_v54 = vpop.f32.mrb[3].mxu0  ;;  %v630_v55 = vsel %vm145_vm2, %v548_v53, -inf }
 0x481   :  { %631 = vmax.xlane.f32.xlu0 %v630_v55 }
 0x497   :  { %652 = vrot.lane.b32.xlu0 %v2618_v12, %s2504_s24 }
 0x49b   :  { %1145 = vrot.lane.b32.xlu0 %v2618_v12, %s2506_s26 }
 0x49f   :  { %1383 = vrot.lane.b32.xlu0 %v2618_v12, %s2507_s27 }
 0x4a3   :  { %1461 = vrot.lane.b32.xlu0 %v2621_v13, %s2507_s27 }
 0x4a7   :  { %1381 = vrot.lane.b32.xlu0 %v2632_v16, %s2508_s28 }
 0x4ab   :  { %1459 = vrot.lane.b32.xlu0 %v2626_v14, %s2508_s28 }
 0x4d1   :  { %v635_v56 = vpop.xlane.xlu0 %634 }
 0x4d2   :  { %v637_v57 = vsub.f32 %v626_v48, %v635_v56 }
 0x4d4   :  { %v640_v58 = vmul.f32 1.442695, %v637_v57 }
 0x4d5   :  { %v729_v59 = vpop.permute.xlu0 %728 }
 0x4d6   :  { %2437 = vpow2.f32 %v640_v58  ;;  %2281 = vmatpush3.msra.mxu1 %v729_v59 }
 0x4d7   :  { %2295 = vmatprep.subr.mxu1 %v2497_v8 }
 0x4d9   :  { %v968_v62 = vpop.permute.xlu0 %967 }
 0x4dd   :  { %v1048_v63 = vpop.permute.xlu0 %1047 }
 0x4e0   :  { %v2438_v60 = vpop.eup %2437 }
 0x4e1   :  { %v645_v61 = vsel %vm145_vm2, %v2438_v60, 0.0 }
 0x4e2   :  { %646 = vadd.xlane.f32.xlu1 %v645_v61 }
 0x4f3   :  { %1045 = vrot.lane.b32.xlu1 %v2626_v14, %s2505_s25 }
 0x50e   :  { %v632_v0 = vpop.xlane.xlu0 %631 }
 0x50f   :  { %v636_v1 = vsub.f32 %v548_v53, %v632_v0 }
 0x511   :  { %v638_v2 = vmul.f32 1.442695, %v636_v1 }
 0x512   :  { %v653_v3 = vpop.permute.xlu0 %652 }
 0x513   :  { %2439 = vpow2.f32 %v638_v2  ;;  %2276 = vmatpush3.msra.mxu0 %v653_v3 }
 0x514   :  { %2285 = vmatprep.subr.mxu0 %v804_v19 }
 0x516   :  { %v1146_v31 = vpop.permute.xlu0 %1145 }
 0x51d   :  { %v2440_v4 = vpop.eup %2439 }
 0x51e   :  { %v642_v6 = vsel %vm145_vm2, %v2440_v4, 0.0 }
 0x51f   :  { %643 = vadd.xlane.f32.xlu1 %v642_v6 }
 0x56f   :  { %v647_v10 = vpop.xlane.xlu1 %646 }
 0x570   :  { %2441 = vrcp.f32 %v647_v10 }
 0x573   :  { %v1046_v14 = vpop.permute.xlu1 %1045 }
 0x57a   :  { %v2442_v11 = vpop.eup %2441 }
 0x57b   :  { %v651_v15 = vmul.f32 %v2442_v11, %v2438_v60 }
 0x57d   :  { %2283 = vmatmul.mubr.msk.f32.vlgmr.msra.gmra.mrb[10].mxu1 %vm145_vm2, %v651_v15 }
 0x57e   :  { %2296 = vmatpush3.xpose.msk.msra.mxu1 %vm145_vm2, %v970_v9  ;;  %2297 = vmatprep.mubr.msk.f32.mxu1 %vm2498_vm1, %v2497_v8 }
 0x57f   :  { %2300 = vmatprep.subr.mxu1 %v2497_v8 }
 0x581   :  { %2298 = vmatmul.mubr.msk.f32.vlgmr.msra.gmra.mrb[12].mxu1 %vm145_vm2, %v968_v62 }
 0x582   :  { %2301 = vmatpush3.xpose.msk.msra.mxu1 %vm145_vm2, %v1048_v63  ;;  %2302 = vmatprep.mubr.msk.f32.mxu1 %vm2498_vm1, %v2497_v8 }
 0x583   :  { %2310 = vmatprep.subr.mxu1 %v2497_v8 }
 0x585   :  { %2303 = vmatmul.mubr.msk.f32.vlgmr.msra.gmra.mrb[14].mxu1 %vm145_vm2, %v1046_v14 }
 0x586   :  { %2312 = vmatprep.mubr.msk.f32.mxu1 %vm2498_vm1, %v2497_v8 }
 0x5ac   :  { %v644_v16 = vpop.xlane.xlu1 %643 }
 0x5ad   :  { %2443 = vrcp.f32 %v644_v16 }
 0x5b7   :  { %v2444_v17 = vpop.eup %2443 }
 0x5b8   :  { %v650_v18 = vmul.f32 %v2444_v17, %v2440_v4 }
 0x5ba   :  { %2278 = vmatmul.mubr.msk.f32.vlgmr.msra.gmra.mrb[4].mxu0 %vm145_vm2, %v650_v18 }
 0x5bb   :  { %2286 = vmatpush3.msra.mxu0 %v804_v19 }
 0x5bc   :  { %2290 = vmatprep.subr.mxu0 %v473_v20 }
 0x650   :  { %v800_v21 = vpop.f32.mrb[10].mxu1 }
 0x651   :  { %v2284_v22 = vpop.f32.mrb[11].mxu1 }
 0x654   :  { %v1041_v23 = vpop.f32.mrb[12].mxu1 }
 0x655   :  { %v2299_v24 = vpop.f32.mrb[13].mxu1  ;;  %v1123_v25 = vsel %vm145_vm2, %v1041_v23, -inf }
 0x656   :  { %1124 = vmax.xlane.f32.xlu1 %v1123_v25  ;;  %v2157_v25 = vld [vmem:[%s2851_s4] ss:$0 sm:$0xff] }
 0x658   :  { %v1119_v26 = vpop.f32.mrb[14].mxu1 }
 0x659   :  { %v2304_v27 = vpop.f32.mrb[15].mxu1  ;;  %v1126_v28 = vsel %vm145_vm2, %v1119_v26, -inf }
 0x65a   :  { %1127 = vmax.xlane.f32.xlu1 %v1126_v28 }
 0x68d   :  { %v724_v29 = vpop.f32.mrb[4].mxu0 }
 0x68e   :  { %v2279_v30 = vpop.f32.mrb[5].mxu0  ;;  %2287 = vmatprep.mubr.msk.f32.mxu0 %vm145_vm2, %v724_v29 }
 0x68f   :  { %2288 = vmatmul.mubr.msk.f32.vlgmr.msra.gmra.mrb[6].mxu0 %vm145_vm2, %v800_v21 }
 0x690   :  { %2292 = vmatprep.mubr.msk.f32.mxu0 %vm145_vm2, %v2679_v51  ;;  %2291 = vmatpush3.msra.mxu0 %v473_v20 }
 0x691   :  { %2305 = vmatprep.subr.mxu0 %v2497_v8 }
 0x697   :  { %2293 = vmatmul.mubr.msk.f32.vlgmr.msra.gmra.mrb[6].mxu0 %vm145_vm2, %v2672_v46  ;;  %v1384_v46 = vpop.permute.xlu0 %1383 }
 0x698   :  { %2306 = vmatpush3.msra.mxu0 %v1146_v31  ;;  %2307 = vmatprep.mubr.msk.f32.mxu0 %vm2498_vm1, %v2497_v8 }
 0x699   :  { %2315 = vmatprep.subr.mxu0 %v1297_v42 }
 0x69b   :  { %v1462_v50 = vpop.permute.xlu0 %1461 }
 0x69f   :  { %v1382_v52 = vpop.permute.xlu0 %1381 }
 0x6a3   :  { %v1460_v57 = vpop.permute.xlu0 %1459 }
 0x6e3   :  { %v1125_v32 = vpop.xlane.xlu1 %1124 }
 0x6e4   :  { %v1129_v33 = vsub.f32 %v1041_v23, %v1125_v32 }
 0x6e6   :  { %v1131_v34 = vmul.f32 1.442695, %v1129_v33 }
 0x6e7   :  { %v1128_v35 = vpop.xlane.xlu1 %1127 }
 0x6e8   :  { %2445 = vpow2.f32 %v1131_v34  ;;  %v1130_v36 = vsub.f32 %v1119_v26, %v1128_v35 }
 0x6ea   :  { %v1133_v37 = vmul.f32 1.442695, %v1130_v36 }
 0x6ec   :  { %2447 = vpow2.f32 %v1133_v37 }
 0x6f2   :  { %v2446_v38 = vpop.eup %2445 }
 0x6f3   :  { %v1135_v39 = vsel %vm145_vm2, %v2446_v38, 0.0 }
 0x6f4   :  { %1136 = vadd.xlane.f32.xlu1 %v1135_v39 }
 0x6f6   :  { %v2448_v40 = vpop.eup %2447 }
 0x6f7   :  { %v1138_v41 = vsel %vm145_vm2, %v2448_v40, 0.0 }
 0x6f8   :  { %1139 = vadd.xlane.f32.xlu1 %v1138_v41 }
 0x709   :  { %1221 = vrot.lane.b32.xlu1 %v2621_v13, %s2506_s26  ;;  %s2510_s26 = smov [#allocation2]  }
 0x70a   :  { %s2111_s27 = sshll.u32 %s2510_s26, 4  ;;  %s2112_s27 = int_to_ptr.vmem [resolvable:$true] %s2111_s27 }
 0x70b   :  { %p2478_p1 = scmp.lt.s32.totalorder %s2112_s27, %s2112_s27 }
 0x781   :  { %v1137_v43 = vpop.xlane.xlu1 %1136 }
 0x782   :  { %2449 = vrcp.f32 %v1137_v43  ;;  %v1852_v43 = vld [vmem:[%s2854_s7 + $0x8] sm:$0xff] }
 0x785   :  { %v1140_v44 = vpop.xlane.xlu1 %1139 }
 0x786   :  { %2451 = vrcp.f32 %v1140_v44 }
 0x789   :  { %v1222_v45 = vpop.permute.xlu1 %1221 }
 0x78a   :  { %2311 = vmatpush3.msra.mxu1 %v1222_v45  ;;  %v1853_v45 = vld [vmem:[%s2854_s7 + $0x10] sm:$0xff] }
 0x78b   :  { %2320 = vmatprep.subr.mxu1 %v2497_v8 }
 0x78c   :  { %v2450_v47 = vpop.eup %2449 }
 0x78d   :  { %v1143_v48 = vmul.f32 %v2450_v47, %v2446_v38 }
 0x78f   :  { %2308 = vmatmul.mubr.msk.f32.vlgmr.msra.gmra.mrb[8].mxu0 %vm145_vm2, %v1143_v48 }
 0x790   :  { %v2452_v49 = vpop.eup %2451  ;;  %2316 = vmatpush3.msra.mxu0 %v1297_v42 }
 0x791   :  { %v1144_v51 = vmul.f32 %v2452_v49, %v2448_v40  ;;  %2325 = vmatprep.subr.mxu0 %v2497_v8 }
 0x793   :  { %2313 = vmatmul.mubr.msk.f32.vlgmr.msra.gmra.mrb[16].mxu1 %vm145_vm2, %v1144_v51 }
 0x794   :  { %2321 = vmatpush3.xpose.msk.msra.mxu1 %vm145_vm2, %v1384_v46  ;;  %2322 = vmatprep.mubr.msk.f32.mxu1 %vm2498_vm1, %v2497_v8  ;;  %v1854_v46 = vld [vmem:[%s2854_s7 + $0x18] sm:$0xff] }
 0x795   :  { %2330 = vmatprep.subr.mxu1 %v2497_v8  ;;  %v2387_v47 = vpack.c.bf16 %v1854_v46, %v1853_v45 }
 0x797   :  { %2323 = vmatmul.mubr.msk.f32.vlgmr.msra.gmra.mrb[18].mxu1 %vm145_vm2, %v1382_v52 }
 0x798   :  { %2332 = vmatprep.mubr.msk.f32.mxu1 %vm2498_vm1, %v2497_v8 }
 0x862   :  { %v1217_v53 = vpop.f32.mrb[8].mxu0 }
 0x863   :  { %v2309_v54 = vpop.f32.mrb[9].mxu0  ;;  %2317 = vmatprep.mubr.msk.f32.mxu0 %vm145_vm2, %v1217_v53 }
 0x866   :  { %v1293_v55 = vpop.f32.mrb[16].mxu1 }
 0x867   :  { %v2314_v56 = vpop.f32.mrb[17].mxu1  ;;  %2318 = vmatmul.mubr.msk.f32.vlgmr.msra.gmra.mrb[6].mxu0 %vm145_vm2, %v1293_v55  ;;  %v2158_v55 = vld [vmem:[%s2852_s5] ss:$0 sm:$0xff] }
 0x868   :  { %2326 = vmatpush3.xpose.msk.msra.mxu0 %vm145_vm2, %v1462_v50  ;;  %2327 = vmatprep.mubr.msk.f32.mxu0 %vm2498_vm1, %v2497_v8 }
 0x869   :  { %2335 = vmatprep.subr.mxu0 %v2497_v8 }
 0x86a   :  { %v1455_v58 = vpop.f32.mrb[18].mxu1 }
 0x86b   :  { %v2324_v59 = vpop.f32.mrb[19].mxu1  ;;  %2328 = vmatmul.mubr.msk.f32.vlgmr.msra.gmra.mrb[10].mxu0 %vm145_vm2, %v1460_v57  ;;  %v1537_v60 = vsel %vm145_vm2, %v1455_v58, -inf }
 0x86c   :  { %1538 = vmax.xlane.f32.xlu1 %v1537_v60  ;;  %2337 = vmatprep.mubr.msk.f32.mxu0 %vm2498_vm1, %v2497_v8  ;;  %v2159_v59 = vld [vmem:[%s2853_s6] ss:$0 sm:$0xff] }
 0x8f9   :  { %v1539_v61 = vpop.xlane.xlu1 %1538 }
 0x8fa   :  { %v1543_v62 = vsub.f32 %v1455_v58, %v1539_v61 }
 0x8fc   :  { %v1545_v63 = vmul.f32 1.442695, %v1543_v62 }
 0x8fe   :  { %2453 = vpow2.f32 %v1545_v63 }
 0x908   :  { %v2454_v3 = vpop.eup %2453 }
 0x909   :  { %v1549_v4 = vsel %vm145_vm2, %v2454_v3, 0.0 }
 0x93e   :  { %v1533_v0 = vpop.f32.mrb[10].mxu0 }
 0x93f   :  { %v2329_v1 = vpop.f32.mrb[11].mxu0  ;;  %v1540_v2 = vsel %vm145_vm2, %v1533_v0, -inf }
 0x940   :  { %1541 = vmax.xlane.f32.xlu0 %v1540_v2  ;;  %v1962_v1 = vld [vmem:[%s2856_s9 + $0x8] sm:$0xff] }
 0x944   :  { %1550 = vadd.xlane.f32.xlu0 %v1549_v4  ;;  %v1964_v4 = vld [vmem:[%s2856_s9 + $0x18] sm:$0xff] }
 0x95a   :  { %1559 = vrot.lane.b32.xlu0 %v2618_v12, %s2509_s18  ;;  %v1711_v12 = vld [vmem:[%s2850_s3 + $0x18] sm:$0xff] }
 0x9cd   :  { %v1542_v6 = vpop.xlane.xlu0 %1541 }
 0x9ce   :  { %v1544_v9 = vsub.f32 %v1533_v0, %v1542_v6  ;;  %v1961_v0 = vld [vmem:[%s2856_s9] sm:$0xff] }
 0x9cf   :  { %v2391_v2 = vpack.c.bf16 %v1962_v1, %v1961_v0  ;;  %v2167_v1 = vld [vmem:[%s2859_s12] ss:$0 sm:$0xff] }
 0x9d0   :  { %v1547_v10 = vmul.f32 1.442695, %v1544_v9  ;;  %v1965_v9 = vld [vmem:[%s2856_s9 + $0x20] sm:$0xff] }
 0x9d1   :  { %v1551_v8 = vpop.xlane.xlu0 %1550 }
 0x9d2   :  { %2455 = vpow2.f32 %v1547_v10  ;;  %v1966_v10 = vld [vmem:[%s2856_s9 + $0x28] sm:$0xff] }
 0x9d3   :  { %2457 = vrcp.f32 %v1551_v8  ;;  %v2399_v8 = vpack.c.bf16 %v1966_v10, %v1965_v9 }
 0x9d5   :  { %v1560_v11 = vpop.permute.xlu0 %1559 }
 0x9d6   :  { %2331 = vmatpush3.msra.mxu1 %v1560_v11  ;;  %v1967_v11 = vld [vmem:[%s2856_s9 + $0x30] sm:$0xff] }
 0x9dc   :  { %v2456_v15 = vpop.eup %2455 }
 0x9dd   :  { %v2458_v14 = vpop.eup %2457  ;;  %v1552_v16 = vsel %vm145_vm2, %v2456_v15, 0.0 }
 0x9de   :  { %v1557_v17 = vmul.f32 %v2458_v14, %v2454_v3  ;;  %1553 = vadd.xlane.f32.xlu1 %v1552_v16  ;;  %v1963_v3 = vld [vmem:[%s2856_s9 + $0x10] sm:$0xff]  ;;  %v2160_v16 = vld [vmem:[%s2855_s8] ss:$0 sm:$0xff] }
 0x9df   :  { %v2395_v6 = vpack.c.bf16 %v1964_v4, %v1963_v3 }
 0x9e0   :  { %2333 = vmatmul.mubr.msk.f32.vlgmr.msra.gmra.mrb[20].mxu1 %vm145_vm2, %v1557_v17 }
 0x9ef   :  { %1635 = vrot.lane.b32.xlu1 %v2621_v13, %s2509_s18 }
 0xa6b   :  { %v1554_v18 = vpop.xlane.xlu1 %1553 }
 0xa6c   :  { %2459 = vrcp.f32 %v1554_v18 }
 0xa6f   :  { %v1636_v19 = vpop.permute.xlu1 %1635 }
 0xa70   :  { %2336 = vmatpush3.msra.mxu0 %v1636_v19 }
 0xa71   :  { %2340 = vmatprep.subr.mxu0 %v1711_v12 }
 0xa76   :  { %v2460_v20 = vpop.eup %2459 }
 0xa77   :  { %v1558_v21 = vmul.f32 %v2460_v20, %v2456_v15  ;;  %v1968_v15 = vld [vmem:[%s2856_s9 + $0x38] sm:$0xff] }
 0xa78   :  { %v2403_v14 = vpack.c.bf16 %v1968_v15, %v1967_v11 }
 0xa79   :  { %2338 = vmatmul.mubr.msk.f32.vlgmr.msra.gmra.mrb[12].mxu0 %vm145_vm2, %v1558_v21 }
 0xa7a   :  { %2341 = vmatpush3.msra.mxu0 %v1711_v12 }
 0xa7b   :  { %2392 = vmatprep.subr.bf16.mxu0 %v2391_v2 }
 0xab3   :  { %v1631_v22 = vpop.f32.mrb[20].mxu1 }
 0xab4   :  { %v2334_v23 = vpop.f32.mrb[21].mxu1  ;;  %2342 = vmatprep.mubr.msk.f32.mxu0 %vm145_vm2, %v1631_v22 }
 0xb4c   :  { %v1707_v24 = vpop.f32.mrb[12].mxu0 }
 0xb4d   :  { %v2339_v13 = vpop.f32.mrb[13].mxu0  ;;  %2343 = vmatmul.mubr.msk.f32.vlgmr.msra.gmra.mrb[6].mxu0 %vm145_vm2, %v1707_v24 }
 0xb4e   :  { %2394 = vmatpush3.bf16.msra.mxu0 %v2391_v2 }
 0xb4f   :  { %2396 = vmatprep.subr.bf16.mxu0 %v2395_v6 }
 0xb52   :  { %2398 = vmatpush3.bf16.msra.mxu0 %v2395_v6 }
 0xb53   :  { %2400 = vmatprep.subr.bf16.mxu0 %v2399_v8 }
 0xb56   :  { %2402 = vmatpush3.bf16.msra.mxu0 %v2399_v8 }
 0xb57   :  { %2404 = vmatprep.subr.bf16.mxu0 %v2403_v14 }
 0xb5a   :  { %2406 = vmatpush3.bf16.msra.mxu0 %v2403_v14 }
 0xc20   :  { %v2344_v26 = vpop.f32.mrb[6].mxu0 }
 0xc21   :  { %v1803_v27 = vadd.f32 %v2344_v26, %v2157_v25  ;;  %v1784_v28 = vpop.f32.mrb[7].mxu0 }
 0xc22   :  { %v1802_v29 = vadd.f32 %v2157_v25, %v1784_v28 }
 0xc23   :  { %v1805_v30 = vadd.f32 %v1803_v27, %v2605_v7 }
 0xc24   :  { %v1804_v31 = vadd.f32 %v1802_v29, %v2598_v5  ;;  %v1851_v5 = vld [vmem:[%s2854_s7] sm:$0xff]  ;;  %s2473_s7 = scalar_lea.vmem %s2112_s27, 256 }
 0xc25   :  { %v1811_v32 = vsel %vm58_vm0, %v1805_v30, 0.0  ;;  %v2383_v44 = vpack.c.bf16 %v1852_v43, %v1851_v5  ;;  %p2474_p0 = scmp.ne.s32.totalorder %s2112_s27, %s2473_s7  ;;  %p2479_p2 = scmp.lt.s32.totalorder %s2473_s7, %s2473_s7 }
 0xc26   :  { %1812 = vadd.xlane.f32.xlu0 %v1811_v32  ;;  %v1808_v33 = vsel %vm58_vm0, %v1804_v31, 0.0 }
 0xc27   :  { %1809 = vadd.xlane.f32.xlu1 %v1808_v33  ;;  %2384 = vmatprep.subr.bf16.mxu1 %v2383_v44  ;;  %p2480_p3 = por %p2479_p2, %p2478_p1 }
 0xc28   :  { %2386 = vmatpush3.bf16.msra.mxu1 %v2383_v44 }
 0xc29   :  { %2388 = vmatprep.subr.bf16.mxu1 %v2387_v47  ;;  %p2481_p4 = pnand %p2480_p3, %p2474_p0 }
 0xc2c   :  { %2390 = vmatpush3.bf16.msra.mxu1 %v2387_v47 }
 0xcb3   :  { %v1813_v34 = vpop.xlane.xlu0 %1812 }
 0xcb4   :  { %v1816_v35 = vmul.f32 0.03125, %v1813_v34  ;;  %v1810_v36 = vpop.xlane.xlu1 %1809 }
 0xcb5   :  { %v1815_v37 = vmul.f32 0.03125, %v1810_v36 }
 0xcb6   :  { %v1818_v38 = vsub.f32 %v1805_v30, %v1816_v35 }
 0xcb7   :  { %v1817_v39 = vsub.f32 %v1804_v31, %v1815_v37  ;;  %v2163_v37 = vld [vmem:[%s2857_s10] ss:$0 sm:$0xff] }
 0xcb8   :  { %v1820_v40 = vmul.f32 %v1818_v38, %v1818_v38 }
 0xcb9   :  { %v1819_v41 = vmul.f32 %v1817_v39, %v1817_v39 }
 0xcba   :  { %v1824_v42 = vsel %vm58_vm0, %v1820_v40, 0.0 }
 0xcbb   :  { %1825 = vadd.xlane.f32.xlu1 %v1824_v42  ;;  %v1821_v7 = vsel %vm58_vm0, %v1819_v41, 0.0 }
 0xcbc   :  { %1822 = vadd.xlane.f32.xlu0 %v1821_v7 }
 0xd48   :  { %v1826_v48 = vpop.xlane.xlu1 %1825 }
 0xd49   :  { %v1828_v49 = vmul.f32 0.03125, %v1826_v48  ;;  %v1823_v50 = vpop.xlane.xlu0 %1822 }
 0xd4a   :  { %v1827_v51 = vmul.f32 0.03125, %v1823_v50 }
 0xd4b   :  { %v1830_v52 = vadd.f32 1e-05, %v1828_v49 }
 0xd4c   :  { %v1829_v53 = vadd.f32 1e-05, %v1827_v51 }
 0xd4d   :  { %2461 = vrsqrt.f32 %v1830_v52 }
 0xd4e   :  { %2463 = vrsqrt.f32 %v1829_v53 }
 0xd57   :  { %v2462_v54 = vpop.eup %2461 }
 0xd58   :  { %v2464_v56 = vpop.eup %2463  ;;  %v1834_v57 = vmul.f32 %v2462_v54, %v1818_v38 }
 0xd59   :  { %v1833_v58 = vmul.f32 %v2464_v56, %v1817_v39 }
 0xd5a   :  { %v1842_v60 = vmul.f32 %v2158_v55, %v1834_v57 }
 0xd5b   :  { %v1841_v61 = vmul.f32 %v2158_v55, %v1833_v58 }
 0xd5c   :  { %v1850_v63 = vadd.f32 %v2159_v59, %v1842_v60 }
 0xd5d   :  { %v1849_v62 = vadd.f32 %v2159_v59, %v1841_v61  ;;  %v2166_v61 = vld [vmem:[%s2858_s11] ss:$0 sm:$0xff] }
 0xd5f   :  { %2353 = vmatprep.mubr.msk.f32.mxu1 %vm58_vm0, %v1849_v62 }
 0xd60   :  { %2354 = vmatmul.mubr.msk.f32.vlgmr.msra.gmra.mrb[22].mxu1 %vm58_vm0, %v1850_v63 }
 0xe33   :  { %v2355_v17 = vpop.f32.mrb[22].mxu1 }
 0xe34   :  { %v1940_v18 = vadd.f32 %v2355_v17, %v2160_v16  ;;  %v1934_v12 = vpop.f32.mrb[23].mxu1 }
 0xe35   :  { %v1935_v19 = vadd.f32 %v2160_v16, %v1934_v12 }
 0xe36   :  { %v1946_v20 = vmul.f32 0.044715, %v1940_v18  ;;  %v1944_v34 = vmul.f32 0.5, %v1940_v18 }
 0xe37   :  { %v1945_v21 = vmul.f32 0.044715, %v1935_v19  ;;  %v1943_v32 = vmul.f32 0.5, %v1935_v19 }
 0xe38   :  { %v1948_v22 = vmul.f32 %v1946_v20, %v1940_v18 }
 0xe39   :  { %v1947_v23 = vmul.f32 %v1945_v21, %v1935_v19 }
 0xe3a   :  { %v1950_v24 = vmul.f32 %v1948_v22, %v1940_v18 }
 0xe3b   :  { %v1949_v13 = vmul.f32 %v1947_v23, %v1935_v19 }
 0xe3c   :  { %v1952_v25 = vadd.f32 %v1950_v24, %v1940_v18 }
 0xe3d   :  { %v1951_v26 = vadd.f32 %v1949_v13, %v1935_v19 }
 0xe3e   :  { %v1954_v27 = vmul.f32 0.7978846, %v1952_v25 }
 0xe3f   :  { %v1953_v28 = vmul.f32 0.7978846, %v1951_v26 }
 0xe40   :  { %2465 = vtanh.f32 %v1954_v27 }
 0xe41   :  { %2467 = vtanh.f32 %v1953_v28 }
 0xe4a   :  { %v2466_v29 = vpop.eup %2465 }
 0xe4b   :  { %v2468_v30 = vpop.eup %2467  ;;  %v1958_v31 = vadd.f32 1.0, %v2466_v29 }
 0xe4c   :  { %v1957_v33 = vadd.f32 1.0, %v2468_v30 }
 0xe4d   :  { %v1960_v36 = vmul.f32 %v1958_v31, %v1944_v34 }
 0xe4e   :  { %v1959_v35 = vmul.f32 %v1957_v33, %v1943_v32 }
 0xe50   :  { %2372 = vmatprep.mubr.msk.f32.mxu0 %vm1976_vm3, %v1959_v35 }
 0xe51   :  { %2373 = vmatmul.mubr.msk.f32.vlgmr.msra.gmra.mrb[14].mxu0 %vm1976_vm3, %v1960_v36 }
 0xf24   :  { %v2374_v38 = vpop.f32.mrb[14].mxu0 }
 0xf25   :  { %v2055_v39 = vadd.f32 %v2374_v38, %v2163_v37  ;;  %v2049_v40 = vpop.f32.mrb[15].mxu0 }
 0xf26   :  { %v2050_v41 = vadd.f32 %v2163_v37, %v2049_v40 }
 0xf27   :  { %v2059_v42 = vadd.f32 %v2055_v39, %v1850_v63 }
 0xf28   :  { %v2058_v7 = vadd.f32 %v2050_v41, %v1849_v62 }
 0xf29   :  { %v2065_v5 = vsel %vm58_vm0, %v2059_v42, 0.0 }
 0xf2a   :  { %2066 = vadd.xlane.f32.xlu1 %v2065_v5  ;;  %v2062_v43 = vsel %vm58_vm0, %v2058_v7, 0.0 }
 0xf2b   :  { %2063 = vadd.xlane.f32.xlu0 %v2062_v43 }
 0xfb7   :  { %v2067_v44 = vpop.xlane.xlu1 %2066 }
 0xfb8   :  { %v2069_v45 = vmul.f32 0.03125, %v2067_v44  ;;  %v2064_v46 = vpop.xlane.xlu0 %2063 }
 0xfb9   :  { %v2068_v47 = vmul.f32 0.03125, %v2064_v46 }
 0xfba   :  { %v2071_v48 = vsub.f32 %v2059_v42, %v2069_v45 }
 0xfbb   :  { %v2070_v49 = vsub.f32 %v2058_v7, %v2068_v47 }
 0xfbc   :  { %v2073_v50 = vmul.f32 %v2071_v48, %v2071_v48 }
 0xfbd   :  { %v2072_v51 = vmul.f32 %v2070_v49, %v2070_v49 }
 0xfbe   :  { %v2077_v52 = vsel %vm58_vm0, %v2073_v50, 0.0 }
 0xfbf   :  { %2078 = vadd.xlane.f32.xlu1 %v2077_v52  ;;  %v2074_v53 = vsel %vm58_vm0, %v2072_v51, 0.0 }
 0xfc0   :  { %2075 = vadd.xlane.f32.xlu0 %v2074_v53 }
0x104c   :  { %v2079_v54 = vpop.xlane.xlu1 %2078 }
0x104d   :  { %v2081_v55 = vmul.f32 0.03125, %v2079_v54  ;;  %v2076_v56 = vpop.xlane.xlu0 %2075 }
0x104e   :  { %v2080_v57 = vmul.f32 0.03125, %v2076_v56 }
0x104f   :  { %v2083_v58 = vadd.f32 1e-05, %v2081_v55 }
0x1050   :  { %v2082_v59 = vadd.f32 1e-05, %v2080_v57 }
0x1051   :  { %2469 = vrsqrt.f32 %v2083_v58 }
0x1052   :  { %2471 = vrsqrt.f32 %v2082_v59 }
0x105b   :  { %v2470_v60 = vpop.eup %2469 }
0x105c   :  { %v2472_v62 = vpop.eup %2471  ;;  %v2087_v63 = vmul.f32 %v2470_v60, %v2071_v48 }
0x105d   :  { %v2086_v0 = vmul.f32 %v2472_v62, %v2070_v49 }
0x105e   :  { %v2095_v2 = vmul.f32 %v2166_v61, %v2087_v63 }
0x105f   :  { %v2094_v3 = vmul.f32 %v2166_v61, %v2086_v0 }
0x1060   :  { %v2103_v4 = vadd.f32 %v2167_v1, %v2095_v2 }
0x1061   :  { %v2102_v6 = vadd.f32 %v2167_v1, %v2094_v3 }
0x1062   :  { %2105 = vst.msk [vmem:[#allocation2 + $0x8] sm:$0xff] %vm58_vm0, %v2103_v4 }
0x1063   :  { %2104 = vst.msk [vmem:[#allocation2] sm:$0xff] %vm58_vm0, %v2102_v6 }
0x1064   :  { %2484 = shalt.err (!%p2481_p4)
}
0x1065   :  { %s2485_s28 = scalar_lea.hbm %s2860_s13, 256 }
0x1066   :  { %p2486_p5 = scmp.ne.s32.totalorder %s2860_s13, %s2485_s28  ;;  %p2489_p6 = scmp.lt.u32.totalorder %s2485_s28, %s2860_s13 }
0x1068   :  { %p2491_p7 = pnand %p2489_p6, %p2486_p5 }
0x106a   :  { %2494 = shalt.err (!%p2491_p7)
}
0x106b   :  { %s2511_s15 = smov 128   ;;  %s2512_s16 = smov 8  }
0x106c   :  { %2117 = dma.vmem_to_hbm [thread:$0]  %s2112_s27, 256, %s2860_s13, [#allocation3], %s2511_s15, %s2511_s15, %s2512_s16  }
0x106d   :  { %2495 = dma.done.wait [#allocation3], 256  }
0x106e   :  { %2496 = vsyncadd [#allocation3], 4294967040 }
0x106f   :  { %2121 = vsyncpa [#allocation3], 1 }

// kernel: transformer_encoder_forward.8
= control target key start
LH: loop header
LB: loop body
LE: loop exit
PB: predicated region body
PF: predicated region fallthrough
CT: control target
= control target key end

     0   :  { %vm57_vm0 = vcmask 261120   ;;  %v2457_v8 = vmov 0.0   ;;  %vm2458_vm1 = vmmov 0   ;;  %s2460_s21 = smov 64   ;;  %s2461_s22 = smov 120   ;;  %vm144_vm2 = vcmask 64512   ;;  %s2798_s1 = inlined_call_operand.vmem [shape: f32[32,96], index: 1, kind: input, shape index: {}]   ;;  %s2799_s0 = inlined_call_operand.vmem [shape: f32[16,32], index: 0, kind: input, shape index: {}]   ;;  %s2800_s2 = inlined_call_operand.vmem [shape: f32[1,96], index: 2, kind: input, shape index: {}]   ;;  %s2801_s3 = inlined_call_operand.vmem [shape: f32[32,32], index: 3, kind: input, shape index: {}]   ;;  %s2802_s4 = inlined_call_operand.vmem [shape: f32[1,32], index: 4, kind: input, shape index: {}]   ;;  %s2803_s7 = inlined_call_operand.vmem [shape: f32[32,64], index: 7, kind: input, shape index: {}]   ;;  %s2804_s5 = inlined_call_operand.vmem [shape: f32[1,32], index: 5, kind: input, shape index: {}]   ;;  %s2805_s6 = inlined_call_operand.vmem [shape: f32[1,32], index: 6, kind: input, shape index: {}]   ;;  %s2806_s9 = inlined_call_operand.vmem [shape: f32[64,32], index: 9, kind: input, shape index: {}]   ;;  %s2807_s8 = inlined_call_operand.vmem [shape: f32[1,64], index: 8, kind: input, shape index: {}]   ;;  %s2808_s10 = inlined_call_operand.vmem [shape: f32[1,32], index: 10, kind: input, shape index: {}]   ;;  %s2809_s11 = inlined_call_operand.vmem [shape: f32[1,32], index: 11, kind: input, shape index: {}]   ;;  %s2810_s12 = inlined_call_operand.vmem [shape: f32[1,32], index: 12, kind: input, shape index: {}]   ;;  %s2811_s13 = inlined_call_operand.vmem [shape: f32[16,32], index: 13, kind: output, shape index: {}]  }
   0x1   :  { %v46_v0 = vld [vmem:[%s2798_s1] sm:$0xff]  ;;  %v47_v1 = vld [vmem:[%s2798_s1 + $0x8] sm:$0xff]  ;;  %v48_v2 = vld [vmem:[%s2798_s1 + $0x10] sm:$0xff]  ;;  %2242 = vmatprep.subr.mxu0 %v2457_v8  ;;  %2244 = vmatprep.mubr.msk.f32.mxu0 %vm2458_vm1, %v2457_v8  ;;  %s2463_s23 = smov 80   ;;  %s2464_s24 = smov 56   ;;  %vm1975_vm3 = vcmask 523264  }
   0x2   :  { %v2362_v3 = vpack.c.bf16 %v47_v1, %v46_v0  ;;  %v49_v4 = vld [vmem:[%s2798_s1 + $0x18] sm:$0xff]  ;;  %v2555_v5 = vld [vmem:[%s2799_s0] sm:$0xff]  ;;  %v2562_v7 = vld [vmem:[%s2799_s0 + $0x8] sm:$0xff]  ;;  %s2459_s0 = smov 96   ;;  %s2465_s25 = smov 112  }
   0x3   :  { %v2366_v6 = vpack.c.bf16 %v49_v4, %v48_v2  ;;  %2229 = vmatprep.mubr.msk.f32.mxu1 %vm57_vm0, %v2555_v5  ;;  %v2109_v9 = vld [vmem:[%s2800_s2] ss:$0 sm:$0xff]  ;;  %s2462_s2 = smov 88   ;;  %s2466_s26 = smov 48  }
   0x4   :  { %2363 = vmatprep.subr.bf16.mxu1 %v2362_v3  ;;  %s2467_s27 = smov 72   ;;  %s2468_s28 = smov 104  }
   0x5   :  { %2365 = vmatpush3.bf16.msra.mxu1 %v2362_v3  ;;  %s2469_s18 = smov 40  }
   0x6   :  { %2367 = vmatprep.subr.bf16.mxu1 %v2366_v6 }
   0x9   :  { %2369 = vmatpush3.bf16.msra.mxu1 %v2366_v6 }
   0xa   :  { %2232 = vmatprep.subr.mxu1 %v2457_v8 }
   0xc   :  { %2230 = vmatmul.mubr.msk.f32.vlgmr.msra.gmra.mrb[0].mxu1 %vm57_vm0, %v2562_v7 }
   0xd   :  { %2234 = vmatprep.mubr.msk.f32.mxu1 %vm2458_vm1, %v2457_v8 }
  0xdf   :  { %v2231_v10 = vpop.f32.mrb[0].mxu1 }
  0xe0   :  { %v130_v11 = vpop.f32.mrb[1].mxu1  ;;  %v2578_v13 = vadd.f32 %v2231_v10, %v2109_v9 }
  0xe1   :  { %v2575_v12 = vadd.f32 %v2109_v9, %v130_v11 }
  0xe2   :  { %v2583_v14 = vmul.f32 0.35355338, %v2578_v13 }
  0xe3   :  { %142 = vrot.lane.b32.xlu0 %v2575_v12, %s2459_s0  ;;  %v2589_v16 = vmul.f32 0.35355338, %v2575_v12 }
  0xe7   :  { %221 = vrot.lane.b32.xlu0 %v2578_v13, %s2459_s0 }
  0xeb   :  { %396 = vrot.lane.b32.xlu0 %v2578_v13, %s2460_s21 }
  0xef   :  { %551 = vrot.lane.b32.xlu0 %v2583_v14, %s2461_s22 }
 0x155   :  { %v143_v15 = vpop.permute.xlu0 %142 }
 0x156   :  { %2233 = vmatpush3.xpose.msk.msra.mxu1 %vm144_vm2, %v143_v15 }
 0x157   :  { %2237 = vmatprep.subr.mxu1 %v2457_v8 }
 0x159   :  { %v222_v17 = vpop.permute.xlu0 %221  ;;  %2235 = vmatmul.mubr.msk.f32.vlgmr.msra.gmra.mrb[2].mxu1 %vm144_vm2, %v2589_v16 }
 0x15a   :  { %2238 = vmatpush3.xpose.msk.msra.mxu1 %vm144_vm2, %v222_v17  ;;  %2239 = vmatprep.mubr.msk.f32.mxu1 %vm2458_vm1, %v2457_v8 }
 0x15b   :  { %2247 = vmatprep.subr.mxu1 %v2457_v8 }
 0x15d   :  { %v397_v18 = vpop.permute.xlu0 %396  ;;  %2240 = vmatmul.mubr.msk.f32.vlgmr.msra.gmra.mrb[4].mxu1 %vm144_vm2, %v2583_v14 }
 0x15e   :  { %2248 = vmatpush3.msra.mxu1 %v397_v18  ;;  %2249 = vmatprep.mubr.msk.f32.mxu1 %vm2458_vm1, %v2457_v8 }
 0x15f   :  { %2257 = vmatprep.subr.mxu1 %v2457_v8 }
 0x161   :  { %v552_v25 = vpop.permute.xlu0 %551 }
 0x22c   :  { %v216_v19 = vpop.f32.mrb[2].mxu1 }
 0x22d   :  { %v2236_v20 = vpop.f32.mrb[3].mxu1  ;;  %v298_v21 = vsel %vm144_vm2, %v216_v19, -inf }
 0x22e   :  { %299 = vmax.xlane.f32.xlu0 %v298_v21  ;;  %v472_v20 = vld [vmem:[%s2801_s3] sm:$0xff] }
 0x230   :  { %v294_v22 = vpop.f32.mrb[4].mxu1 }
 0x231   :  { %v2241_v23 = vpop.f32.mrb[5].mxu1  ;;  %v301_v24 = vsel %vm144_vm2, %v294_v22, -inf }
 0x232   :  { %302 = vmax.xlane.f32.xlu1 %v301_v24 }
 0x244   :  { %320 = vrot.lane.b32.xlu0 %v2575_v12, %s2460_s21 }
 0x248   :  { %473 = vrot.lane.b32.xlu0 %v2589_v16, %s2461_s22 }
 0x2bb   :  { %v300_v26 = vpop.xlane.xlu0 %299 }
 0x2bc   :  { %v304_v33 = vsub.f32 %v216_v19, %v300_v26  ;;  %v803_v19 = vld [vmem:[%s2801_s3 + $0x8] sm:$0xff] }
 0x2be   :  { %v306_v34 = vmul.f32 1.442695, %v304_v33 }
 0x2bf   :  { %v321_v27 = vpop.permute.xlu0 %320  ;;  %v303_v28 = vpop.xlane.xlu1 %302 }
 0x2c0   :  { %v305_v29 = vsub.f32 %v294_v22, %v303_v28  ;;  %2243 = vmatpush3.msra.mxu0 %v321_v27 }
 0x2c1   :  { %2252 = vmatprep.subr.mxu0 %v2457_v8 }
 0x2c2   :  { %v308_v30 = vmul.f32 1.442695, %v305_v29 }
 0x2c3   :  { %v474_v45 = vpop.permute.xlu0 %473 }
 0x2c4   :  { %2413 = vpow2.f32 %v308_v30 }
 0x2c5   :  { %2415 = vpow2.f32 %v306_v34 }
 0x2ce   :  { %v2414_v31 = vpop.eup %2413 }
 0x2cf   :  { %v313_v32 = vsel %vm144_vm2, %v2414_v31, 0.0  ;;  %v2416_v35 = vpop.eup %2415 }
 0x2d0   :  { %314 = vadd.xlane.f32.xlu1 %v313_v32  ;;  %v310_v36 = vsel %vm144_vm2, %v2416_v35, 0.0 }
 0x2e1   :  { %553 = vrot.lane.b32.xlu1 %v2578_v13, %s2462_s2 }
 0x305   :  { %311 = vadd.xlane.f32.xlu1 %v310_v36 }
 0x316   :  { %475 = vrot.lane.b32.xlu1 %v2575_v12, %s2462_s2 }
 0x31a   :  { %968 = vrot.lane.b32.xlu1 %v2575_v12, %s2463_s23 }
 0x35d   :  { %v315_v37 = vpop.xlane.xlu1 %314 }
 0x35e   :  { %2417 = vrcp.f32 %v315_v37 }
 0x361   :  { %v554_v40 = vpop.permute.xlu1 %553 }
 0x368   :  { %v2418_v38 = vpop.eup %2417 }
 0x369   :  { %v319_v39 = vmul.f32 %v2418_v38, %v2414_v31 }
 0x36b   :  { %2250 = vmatmul.mubr.msk.f32.vlgmr.msra.gmra.mrb[6].mxu1 %vm144_vm2, %v319_v39 }
 0x36c   :  { %2258 = vmatpush3.xpose.msk.msra.mxu1 %vm144_vm2, %v554_v40  ;;  %2259 = vmatprep.mubr.msk.f32.mxu1 %vm2458_vm1, %v2457_v8 }
 0x36d   :  { %2267 = vmatprep.subr.mxu1 %v2457_v8 }
 0x36f   :  { %2260 = vmatmul.mubr.msk.f32.vlgmr.msra.gmra.mrb[8].mxu1 %vm144_vm2, %v552_v25 }
 0x370   :  { %2269 = vmatprep.mubr.msk.f32.mxu1 %vm2458_vm1, %v2457_v8 }
 0x392   :  { %v312_v41 = vpop.xlane.xlu1 %311 }
 0x393   :  { %2419 = vrcp.f32 %v312_v41 }
 0x396   :  { %v476_v44 = vpop.permute.xlu1 %475 }
 0x39a   :  { %v969_v9 = vpop.permute.xlu1 %968 }
 0x39d   :  { %v2420_v42 = vpop.eup %2419 }
 0x39e   :  { %v318_v43 = vmul.f32 %v2420_v42, %v2416_v35  ;;  %v1296_v42 = vld [vmem:[%s2801_s3 + $0x10] sm:$0xff] }
 0x3a0   :  { %2245 = vmatmul.mubr.msk.f32.vlgmr.msra.gmra.mrb[0].mxu0 %vm144_vm2, %v318_v43 }
 0x3a1   :  { %2253 = vmatpush3.xpose.msk.msra.mxu0 %vm144_vm2, %v476_v44  ;;  %2254 = vmatprep.mubr.msk.f32.mxu0 %vm2458_vm1, %v2457_v8 }
 0x3a2   :  { %2262 = vmatprep.subr.mxu0 %v2457_v8 }
 0x3a4   :  { %2255 = vmatmul.mubr.msk.f32.vlgmr.msra.gmra.mrb[2].mxu0 %vm144_vm2, %v474_v45 }
 0x3a5   :  { %2264 = vmatprep.mubr.msk.f32.mxu0 %vm2458_vm1, %v2457_v8 }
 0x43e   :  { %v2629_v46 = vpop.f32.mrb[6].mxu1 }
 0x43f   :  { %v2251_v47 = vpop.f32.mrb[7].mxu1 }
 0x442   :  { %v625_v48 = vpop.f32.mrb[8].mxu1 }
 0x443   :  { %v2261_v49 = vpop.f32.mrb[9].mxu1  ;;  %v632_v50 = vsel %vm144_vm2, %v625_v48, -inf }
 0x444   :  { %633 = vmax.xlane.f32.xlu0 %v632_v50 }
 0x45a   :  { %727 = vrot.lane.b32.xlu0 %v2578_v13, %s2464_s24 }
 0x45e   :  { %966 = vrot.lane.b32.xlu0 %v2589_v16, %s2465_s25 }
 0x462   :  { %1046 = vrot.lane.b32.xlu0 %v2578_v13, %s2463_s23 }
 0x473   :  { %v2636_v51 = vpop.f32.mrb[0].mxu0 }
 0x474   :  { %v2246_v52 = vpop.f32.mrb[1].mxu0 }
 0x477   :  { %v547_v53 = vpop.f32.mrb[2].mxu0 }
 0x478   :  { %v2256_v54 = vpop.f32.mrb[3].mxu0  ;;  %v629_v55 = vsel %vm144_vm2, %v547_v53, -inf }
 0x481   :  { %630 = vmax.xlane.f32.xlu0 %v629_v55 }
 0x497   :  { %651 = vrot.lane.b32.xlu0 %v2575_v12, %s2464_s24 }
 0x49b   :  { %1144 = vrot.lane.b32.xlu0 %v2575_v12, %s2466_s26 }
 0x49f   :  { %1382 = vrot.lane.b32.xlu0 %v2575_v12, %s2467_s27 }
 0x4a3   :  { %1460 = vrot.lane.b32.xlu0 %v2578_v13, %s2467_s27 }
 0x4a7   :  { %1380 = vrot.lane.b32.xlu0 %v2589_v16, %s2468_s28 }
 0x4ab   :  { %1458 = vrot.lane.b32.xlu0 %v2583_v14, %s2468_s28 }
 0x4d1   :  { %v634_v56 = vpop.xlane.xlu0 %633 }
 0x4d2   :  { %v636_v57 = vsub.f32 %v625_v48, %v634_v56 }
 0x4d4   :  { %v639_v58 = vmul.f32 1.442695, %v636_v57 }
 0x4d5   :  { %v728_v59 = vpop.permute.xlu0 %727 }
 0x4d6   :  { %2421 = vpow2.f32 %v639_v58  ;;  %2268 = vmatpush3.msra.mxu1 %v728_v59 }
 0x4d7   :  { %2282 = vmatprep.subr.mxu1 %v2457_v8 }
 0x4d9   :  { %v967_v62 = vpop.permute.xlu0 %966 }
 0x4dd   :  { %v1047_v63 = vpop.permute.xlu0 %1046 }
 0x4e0   :  { %v2422_v60 = vpop.eup %2421 }
 0x4e1   :  { %v644_v61 = vsel %vm144_vm2, %v2422_v60, 0.0 }
 0x4e2   :  { %645 = vadd.xlane.f32.xlu1 %v644_v61 }
 0x4f3   :  { %1044 = vrot.lane.b32.xlu1 %v2583_v14, %s2465_s25 }
 0x50e   :  { %v631_v0 = vpop.xlane.xlu0 %630 }
 0x50f   :  { %v635_v1 = vsub.f32 %v547_v53, %v631_v0 }
 0x511   :  { %v637_v2 = vmul.f32 1.442695, %v635_v1 }
 0x512   :  { %v652_v3 = vpop.permute.xlu0 %651 }
 0x513   :  { %2423 = vpow2.f32 %v637_v2  ;;  %2263 = vmatpush3.msra.mxu0 %v652_v3 }
 0x514   :  { %2272 = vmatprep.subr.mxu0 %v803_v19 }
 0x516   :  { %v1145_v31 = vpop.permute.xlu0 %1144 }
 0x51d   :  { %v2424_v4 = vpop.eup %2423 }
 0x51e   :  { %v641_v6 = vsel %vm144_vm2, %v2424_v4, 0.0 }
 0x51f   :  { %642 = vadd.xlane.f32.xlu1 %v641_v6 }
 0x56f   :  { %v646_v10 = vpop.xlane.xlu1 %645 }
 0x570   :  { %2425 = vrcp.f32 %v646_v10 }
 0x573   :  { %v1045_v14 = vpop.permute.xlu1 %1044 }
 0x57a   :  { %v2426_v11 = vpop.eup %2425 }
 0x57b   :  { %v650_v15 = vmul.f32 %v2426_v11, %v2422_v60 }
 0x57d   :  { %2270 = vmatmul.mubr.msk.f32.vlgmr.msra.gmra.mrb[10].mxu1 %vm144_vm2, %v650_v15 }
 0x57e   :  { %2283 = vmatpush3.xpose.msk.msra.mxu1 %vm144_vm2, %v969_v9  ;;  %2284 = vmatprep.mubr.msk.f32.mxu1 %vm2458_vm1, %v2457_v8 }
 0x57f   :  { %2287 = vmatprep.subr.mxu1 %v2457_v8 }
 0x581   :  { %2285 = vmatmul.mubr.msk.f32.vlgmr.msra.gmra.mrb[12].mxu1 %vm144_vm2, %v967_v62 }
 0x582   :  { %2288 = vmatpush3.xpose.msk.msra.mxu1 %vm144_vm2, %v1047_v63  ;;  %2289 = vmatprep.mubr.msk.f32.mxu1 %vm2458_vm1, %v2457_v8 }
 0x583   :  { %2297 = vmatprep.subr.mxu1 %v2457_v8 }
 0x585   :  { %2290 = vmatmul.mubr.msk.f32.vlgmr.msra.gmra.mrb[14].mxu1 %vm144_vm2, %v1045_v14 }
 0x586   :  { %2299 = vmatprep.mubr.msk.f32.mxu1 %vm2458_vm1, %v2457_v8 }
 0x5ac   :  { %v643_v16 = vpop.xlane.xlu1 %642 }
 0x5ad   :  { %2427 = vrcp.f32 %v643_v16 }
 0x5b7   :  { %v2428_v17 = vpop.eup %2427 }
 0x5b8   :  { %v649_v18 = vmul.f32 %v2428_v17, %v2424_v4 }
 0x5ba   :  { %2265 = vmatmul.mubr.msk.f32.vlgmr.msra.gmra.mrb[4].mxu0 %vm144_vm2, %v649_v18 }
 0x5bb   :  { %2273 = vmatpush3.msra.mxu0 %v803_v19 }
 0x5bc   :  { %2277 = vmatprep.subr.mxu0 %v472_v20 }
 0x650   :  { %v799_v21 = vpop.f32.mrb[10].mxu1 }
 0x651   :  { %v2271_v22 = vpop.f32.mrb[11].mxu1 }
 0x654   :  { %v1040_v23 = vpop.f32.mrb[12].mxu1 }
 0x655   :  { %v2286_v24 = vpop.f32.mrb[13].mxu1  ;;  %v1122_v25 = vsel %vm144_vm2, %v1040_v23, -inf }
 0x656   :  { %1123 = vmax.xlane.f32.xlu1 %v1122_v25  ;;  %v2144_v25 = vld [vmem:[%s2802_s4] ss:$0 sm:$0xff] }
 0x658   :  { %v1118_v26 = vpop.f32.mrb[14].mxu1 }
 0x659   :  { %v2291_v27 = vpop.f32.mrb[15].mxu1  ;;  %v1125_v28 = vsel %vm144_vm2, %v1118_v26, -inf }
 0x65a   :  { %1126 = vmax.xlane.f32.xlu1 %v1125_v28 }
 0x68d   :  { %v723_v29 = vpop.f32.mrb[4].mxu0 }
 0x68e   :  { %v2266_v30 = vpop.f32.mrb[5].mxu0  ;;  %2274 = vmatprep.mubr.msk.f32.mxu0 %vm144_vm2, %v723_v29 }
 0x68f   :  { %2275 = vmatmul.mubr.msk.f32.vlgmr.msra.gmra.mrb[6].mxu0 %vm144_vm2, %v799_v21 }
 0x690   :  { %2279 = vmatprep.mubr.msk.f32.mxu0 %vm144_vm2, %v2636_v51  ;;  %2278 = vmatpush3.msra.mxu0 %v472_v20 }
 0x691   :  { %2292 = vmatprep.subr.mxu0 %v2457_v8 }
 0x697   :  { %2280 = vmatmul.mubr.msk.f32.vlgmr.msra.gmra.mrb[6].mxu0 %vm144_vm2, %v2629_v46  ;;  %v1383_v46 = vpop.permute.xlu0 %1382 }
 0x698   :  { %2293 = vmatpush3.msra.mxu0 %v1145_v31  ;;  %2294 = vmatprep.mubr.msk.f32.mxu0 %vm2458_vm1, %v2457_v8 }
 0x699   :  { %2302 = vmatprep.subr.mxu0 %v1296_v42 }
 0x69b   :  { %v1461_v50 = vpop.permute.xlu0 %1460 }
 0x69f   :  { %v1381_v52 = vpop.permute.xlu0 %1380 }
 0x6a3   :  { %v1459_v57 = vpop.permute.xlu0 %1458 }
 0x6e3   :  { %v1124_v32 = vpop.xlane.xlu1 %1123 }
 0x6e4   :  { %v1128_v33 = vsub.f32 %v1040_v23, %v1124_v32 }
 0x6e6   :  { %v1130_v34 = vmul.f32 1.442695, %v1128_v33 }
 0x6e7   :  { %v1127_v35 = vpop.xlane.xlu1 %1126 }
 0x6e8   :  { %2429 = vpow2.f32 %v1130_v34  ;;  %v1129_v36 = vsub.f32 %v1118_v26, %v1127_v35 }
 0x6ea   :  { %v1132_v37 = vmul.f32 1.442695, %v1129_v36 }
 0x6ec   :  { %2431 = vpow2.f32 %v1132_v37 }
 0x6f2   :  { %v2430_v38 = vpop.eup %2429 }
 0x6f3   :  { %v1134_v39 = vsel %vm144_vm2, %v2430_v38, 0.0 }
 0x6f4   :  { %1135 = vadd.xlane.f32.xlu1 %v1134_v39 }
 0x6f6   :  { %v2432_v40 = vpop.eup %2431 }
 0x6f7   :  { %v1137_v41 = vsel %vm144_vm2, %v2432_v40, 0.0 }
 0x6f8   :  { %1138 = vadd.xlane.f32.xlu1 %v1137_v41 }
 0x709   :  { %1220 = vrot.lane.b32.xlu1 %v2578_v13, %s2466_s26 }
 0x781   :  { %v1136_v43 = vpop.xlane.xlu1 %1135 }
 0x782   :  { %2433 = vrcp.f32 %v1136_v43  ;;  %v1851_v43 = vld [vmem:[%s2803_s7 + $0x8] sm:$0xff] }
 0x785   :  { %v1139_v44 = vpop.xlane.xlu1 %1138 }
 0x786   :  { %2435 = vrcp.f32 %v1139_v44 }
 0x789   :  { %v1221_v45 = vpop.permute.xlu1 %1220 }
 0x78a   :  { %2298 = vmatpush3.msra.mxu1 %v1221_v45  ;;  %v1852_v45 = vld [vmem:[%s2803_s7 + $0x10] sm:$0xff] }
 0x78b   :  { %2307 = vmatprep.subr.mxu1 %v2457_v8 }
 0x78c   :  { %v2434_v47 = vpop.eup %2433 }
 0x78d   :  { %v1142_v48 = vmul.f32 %v2434_v47, %v2430_v38 }
 0x78f   :  { %2295 = vmatmul.mubr.msk.f32.vlgmr.msra.gmra.mrb[8].mxu0 %vm144_vm2, %v1142_v48 }
 0x790   :  { %v2436_v49 = vpop.eup %2435  ;;  %2303 = vmatpush3.msra.mxu0 %v1296_v42 }
 0x791   :  { %v1143_v51 = vmul.f32 %v2436_v49, %v2432_v40  ;;  %2312 = vmatprep.subr.mxu0 %v2457_v8 }
 0x793   :  { %2300 = vmatmul.mubr.msk.f32.vlgmr.msra.gmra.mrb[16].mxu1 %vm144_vm2, %v1143_v51 }
 0x794   :  { %2308 = vmatpush3.xpose.msk.msra.mxu1 %vm144_vm2, %v1383_v46  ;;  %2309 = vmatprep.mubr.msk.f32.mxu1 %vm2458_vm1, %v2457_v8  ;;  %v1853_v46 = vld [vmem:[%s2803_s7 + $0x18] sm:$0xff] }
 0x795   :  { %2317 = vmatprep.subr.mxu1 %v2457_v8  ;;  %v2374_v47 = vpack.c.bf16 %v1853_v46, %v1852_v45 }
 0x797   :  { %2310 = vmatmul.mubr.msk.f32.vlgmr.msra.gmra.mrb[18].mxu1 %vm144_vm2, %v1381_v52 }
 0x798   :  { %2319 = vmatprep.mubr.msk.f32.mxu1 %vm2458_vm1, %v2457_v8 }
 0x862   :  { %v1216_v53 = vpop.f32.mrb[8].mxu0 }
 0x863   :  { %v2296_v54 = vpop.f32.mrb[9].mxu0  ;;  %2304 = vmatprep.mubr.msk.f32.mxu0 %vm144_vm2, %v1216_v53 }
 0x866   :  { %v1292_v55 = vpop.f32.mrb[16].mxu1 }
 0x867   :  { %v2301_v56 = vpop.f32.mrb[17].mxu1  ;;  %2305 = vmatmul.mubr.msk.f32.vlgmr.msra.gmra.mrb[6].mxu0 %vm144_vm2, %v1292_v55  ;;  %v2145_v55 = vld [vmem:[%s2804_s5] ss:$0 sm:$0xff] }
 0x868   :  { %2313 = vmatpush3.xpose.msk.msra.mxu0 %vm144_vm2, %v1461_v50  ;;  %2314 = vmatprep.mubr.msk.f32.mxu0 %vm2458_vm1, %v2457_v8 }
 0x869   :  { %2322 = vmatprep.subr.mxu0 %v2457_v8 }
 0x86a   :  { %v1454_v58 = vpop.f32.mrb[18].mxu1 }
 0x86b   :  { %v2311_v59 = vpop.f32.mrb[19].mxu1  ;;  %2315 = vmatmul.mubr.msk.f32.vlgmr.msra.gmra.mrb[10].mxu0 %vm144_vm2, %v1459_v57  ;;  %v1536_v60 = vsel %vm144_vm2, %v1454_v58, -inf }
 0x86c   :  { %1537 = vmax.xlane.f32.xlu1 %v1536_v60  ;;  %2324 = vmatprep.mubr.msk.f32.mxu0 %vm2458_vm1, %v2457_v8  ;;  %v2146_v59 = vld [vmem:[%s2805_s6] ss:$0 sm:$0xff] }
 0x8f9   :  { %v1538_v61 = vpop.xlane.xlu1 %1537 }
 0x8fa   :  { %v1542_v62 = vsub.f32 %v1454_v58, %v1538_v61 }
 0x8fc   :  { %v1544_v63 = vmul.f32 1.442695, %v1542_v62 }
 0x8fe   :  { %2437 = vpow2.f32 %v1544_v63 }
 0x908   :  { %v2438_v3 = vpop.eup %2437 }
 0x909   :  { %v1548_v4 = vsel %vm144_vm2, %v2438_v3, 0.0 }
 0x93e   :  { %v1532_v0 = vpop.f32.mrb[10].mxu0 }
 0x93f   :  { %v2316_v1 = vpop.f32.mrb[11].mxu0  ;;  %v1539_v2 = vsel %vm144_vm2, %v1532_v0, -inf }
 0x940   :  { %1540 = vmax.xlane.f32.xlu0 %v1539_v2  ;;  %v1961_v1 = vld [vmem:[%s2806_s9 + $0x8] sm:$0xff] }
 0x944   :  { %1549 = vadd.xlane.f32.xlu0 %v1548_v4  ;;  %v1963_v4 = vld [vmem:[%s2806_s9 + $0x18] sm:$0xff] }
 0x95a   :  { %1558 = vrot.lane.b32.xlu0 %v2575_v12, %s2469_s18  ;;  %v1710_v12 = vld [vmem:[%s2801_s3 + $0x18] sm:$0xff] }
 0x9cd   :  { %v1541_v6 = vpop.xlane.xlu0 %1540 }
 0x9ce   :  { %v1543_v9 = vsub.f32 %v1532_v0, %v1541_v6  ;;  %v1960_v0 = vld [vmem:[%s2806_s9] sm:$0xff] }
 0x9cf   :  { %v2378_v2 = vpack.c.bf16 %v1961_v1, %v1960_v0  ;;  %v2154_v0 = vld [vmem:[%s2810_s12] ss:$0 sm:$0xff] }
 0x9d0   :  { %v1546_v10 = vmul.f32 1.442695, %v1543_v9  ;;  %v1964_v9 = vld [vmem:[%s2806_s9 + $0x20] sm:$0xff] }
 0x9d1   :  { %v1550_v8 = vpop.xlane.xlu0 %1549 }
 0x9d2   :  { %2439 = vpow2.f32 %v1546_v10  ;;  %v1965_v10 = vld [vmem:[%s2806_s9 + $0x28] sm:$0xff] }
 0x9d3   :  { %2441 = vrcp.f32 %v1550_v8  ;;  %v2386_v8 = vpack.c.bf16 %v1965_v10, %v1964_v9 }
 0x9d5   :  { %v1559_v11 = vpop.permute.xlu0 %1558 }
 0x9d6   :  { %2318 = vmatpush3.msra.mxu1 %v1559_v11  ;;  %v1966_v11 = vld [vmem:[%s2806_s9 + $0x30] sm:$0xff] }
 0x9dc   :  { %v2440_v15 = vpop.eup %2439 }
 0x9dd   :  { %v2442_v14 = vpop.eup %2441  ;;  %v1551_v16 = vsel %vm144_vm2, %v2440_v15, 0.0 }
 0x9de   :  { %v1556_v17 = vmul.f32 %v2442_v14, %v2438_v3  ;;  %1552 = vadd.xlane.f32.xlu1 %v1551_v16  ;;  %v1962_v3 = vld [vmem:[%s2806_s9 + $0x10] sm:$0xff]  ;;  %v2147_v16 = vld [vmem:[%s2807_s8] ss:$0 sm:$0xff] }
 0x9df   :  { %v2382_v6 = vpack.c.bf16 %v1963_v4, %v1962_v3 }
 0x9e0   :  { %2320 = vmatmul.mubr.msk.f32.vlgmr.msra.gmra.mrb[20].mxu1 %vm144_vm2, %v1556_v17 }
 0x9ef   :  { %1634 = vrot.lane.b32.xlu1 %v2578_v13, %s2469_s18 }
 0xa6b   :  { %v1553_v18 = vpop.xlane.xlu1 %1552 }
 0xa6c   :  { %2443 = vrcp.f32 %v1553_v18 }
 0xa6f   :  { %v1635_v19 = vpop.permute.xlu1 %1634 }
 0xa70   :  { %2323 = vmatpush3.msra.mxu0 %v1635_v19 }
 0xa71   :  { %2327 = vmatprep.subr.mxu0 %v1710_v12 }
 0xa76   :  { %v2444_v20 = vpop.eup %2443 }
 0xa77   :  { %v1557_v21 = vmul.f32 %v2444_v20, %v2440_v15  ;;  %v1967_v15 = vld [vmem:[%s2806_s9 + $0x38] sm:$0xff] }
 0xa78   :  { %v2390_v14 = vpack.c.bf16 %v1967_v15, %v1966_v11 }
 0xa79   :  { %2325 = vmatmul.mubr.msk.f32.vlgmr.msra.gmra.mrb[12].mxu0 %vm144_vm2, %v1557_v21 }
 0xa7a   :  { %2328 = vmatpush3.msra.mxu0 %v1710_v12 }
 0xa7b   :  { %2379 = vmatprep.subr.bf16.mxu0 %v2378_v2 }
 0xab3   :  { %v1630_v22 = vpop.f32.mrb[20].mxu1 }
 0xab4   :  { %v2321_v23 = vpop.f32.mrb[21].mxu1  ;;  %2329 = vmatprep.mubr.msk.f32.mxu0 %vm144_vm2, %v1630_v22 }
 0xb4c   :  { %v1706_v24 = vpop.f32.mrb[12].mxu0 }
 0xb4d   :  { %v2326_v13 = vpop.f32.mrb[13].mxu0  ;;  %2330 = vmatmul.mubr.msk.f32.vlgmr.msra.gmra.mrb[6].mxu0 %vm144_vm2, %v1706_v24 }
 0xb4e   :  { %2381 = vmatpush3.bf16.msra.mxu0 %v2378_v2 }
 0xb4f   :  { %2383 = vmatprep.subr.bf16.mxu0 %v2382_v6 }
 0xb52   :  { %2385 = vmatpush3.bf16.msra.mxu0 %v2382_v6 }
 0xb53   :  { %2387 = vmatprep.subr.bf16.mxu0 %v2386_v8 }
 0xb56   :  { %2389 = vmatpush3.bf16.msra.mxu0 %v2386_v8 }
 0xb57   :  { %2391 = vmatprep.subr.bf16.mxu0 %v2390_v14 }
 0xb5a   :  { %2393 = vmatpush3.bf16.msra.mxu0 %v2390_v14 }
 0xc20   :  { %v2331_v26 = vpop.f32.mrb[6].mxu0 }
 0xc21   :  { %v1802_v27 = vadd.f32 %v2331_v26, %v2144_v25  ;;  %v1783_v28 = vpop.f32.mrb[7].mxu0 }
 0xc22   :  { %v1801_v29 = vadd.f32 %v2144_v25, %v1783_v28 }
 0xc23   :  { %v1804_v30 = vadd.f32 %v1802_v27, %v2562_v7 }
 0xc24   :  { %v1803_v31 = vadd.f32 %v1801_v29, %v2555_v5  ;;  %v1850_v5 = vld [vmem:[%s2803_s7] sm:$0xff] }
 0xc25   :  { %v1810_v32 = vsel %vm57_vm0, %v1804_v30, 0.0  ;;  %v2370_v44 = vpack.c.bf16 %v1851_v43, %v1850_v5 }
 0xc26   :  { %1811 = vadd.xlane.f32.xlu0 %v1810_v32  ;;  %v1807_v33 = vsel %vm57_vm0, %v1803_v31, 0.0 }
 0xc27   :  { %1808 = vadd.xlane.f32.xlu1 %v1807_v33  ;;  %2371 = vmatprep.subr.bf16.mxu1 %v2370_v44 }
 0xc28   :  { %2373 = vmatpush3.bf16.msra.mxu1 %v2370_v44 }
 0xc29   :  { %2375 = vmatprep.subr.bf16.mxu1 %v2374_v47 }
 0xc2c   :  { %2377 = vmatpush3.bf16.msra.mxu1 %v2374_v47 }
 0xcb3   :  { %v1812_v34 = vpop.xlane.xlu0 %1811 }
 0xcb4   :  { %v1815_v35 = vmul.f32 0.03125, %v1812_v34  ;;  %v1809_v36 = vpop.xlane.xlu1 %1808 }
 0xcb5   :  { %v1814_v37 = vmul.f32 0.03125, %v1809_v36 }
 0xcb6   :  { %v1817_v38 = vsub.f32 %v1804_v30, %v1815_v35 }
 0xcb7   :  { %v1816_v39 = vsub.f32 %v1803_v31, %v1814_v37  ;;  %v2150_v37 = vld [vmem:[%s2808_s10] ss:$0 sm:$0xff] }
 0xcb8   :  { %v1819_v40 = vmul.f32 %v1817_v38, %v1817_v38 }
 0xcb9   :  { %v1818_v41 = vmul.f32 %v1816_v39, %v1816_v39 }
 0xcba   :  { %v1823_v42 = vsel %vm57_vm0, %v1819_v40, 0.0 }
 0xcbb   :  { %1824 = vadd.xlane.f32.xlu1 %v1823_v42  ;;  %v1820_v7 = vsel %vm57_vm0, %v1818_v41, 0.0 }
 0xcbc   :  { %1821 = vadd.xlane.f32.xlu0 %v1820_v7 }
 0xd48   :  { %v1825_v48 = vpop.xlane.xlu1 %1824 }
 0xd49   :  { %v1827_v49 = vmul.f32 0.03125, %v1825_v48  ;;  %v1822_v50 = vpop.xlane.xlu0 %1821 }
 0xd4a   :  { %v1826_v51 = vmul.f32 0.03125, %v1822_v50 }
 0xd4b   :  { %v1829_v52 = vadd.f32 1e-05, %v1827_v49 }
 0xd4c   :  { %v1828_v53 = vadd.f32 1e-05, %v1826_v51 }
 0xd4d   :  { %2445 = vrsqrt.f32 %v1829_v52 }
 0xd4e   :  { %2447 = vrsqrt.f32 %v1828_v53 }
 0xd57   :  { %v2446_v54 = vpop.eup %2445 }
 0xd58   :  { %v2448_v56 = vpop.eup %2447  ;;  %v1833_v57 = vmul.f32 %v2446_v54, %v1817_v38 }
 0xd59   :  { %v1832_v58 = vmul.f32 %v2448_v56, %v1816_v39 }
 0xd5a   :  { %v1841_v60 = vmul.f32 %v2145_v55, %v1833_v57 }
 0xd5b   :  { %v1840_v61 = vmul.f32 %v2145_v55, %v1832_v58 }
 0xd5c   :  { %v1849_v63 = vadd.f32 %v2146_v59, %v1841_v60 }
 0xd5d   :  { %v1848_v62 = vadd.f32 %v2146_v59, %v1840_v61  ;;  %v2153_v61 = vld [vmem:[%s2809_s11] ss:$0 sm:$0xff] }
 0xd5f   :  { %2340 = vmatprep.mubr.msk.f32.mxu1 %vm57_vm0, %v1848_v62 }
 0xd60   :  { %2341 = vmatmul.mubr.msk.f32.vlgmr.msra.gmra.mrb[22].mxu1 %vm57_vm0, %v1849_v63 }
 0xe33   :  { %v2342_v17 = vpop.f32.mrb[22].mxu1 }
 0xe34   :  { %v1939_v18 = vadd.f32 %v2342_v17, %v2147_v16  ;;  %v1933_v12 = vpop.f32.mrb[23].mxu1 }
 0xe35   :  { %v1934_v19 = vadd.f32 %v2147_v16, %v1933_v12 }
 0xe36   :  { %v1945_v20 = vmul.f32 0.044715, %v1939_v18  ;;  %v1943_v34 = vmul.f32 0.5, %v1939_v18 }
 0xe37   :  { %v1944_v21 = vmul.f32 0.044715, %v1934_v19  ;;  %v1942_v32 = vmul.f32 0.5, %v1934_v19 }
 0xe38   :  { %v1947_v22 = vmul.f32 %v1945_v20, %v1939_v18 }
 0xe39   :  { %v1946_v23 = vmul.f32 %v1944_v21, %v1934_v19 }
 0xe3a   :  { %v1949_v24 = vmul.f32 %v1947_v22, %v1939_v18 }
 0xe3b   :  { %v1948_v13 = vmul.f32 %v1946_v23, %v1934_v19 }
 0xe3c   :  { %v1951_v25 = vadd.f32 %v1949_v24, %v1939_v18 }
 0xe3d   :  { %v1950_v26 = vadd.f32 %v1948_v13, %v1934_v19 }
 0xe3e   :  { %v1953_v27 = vmul.f32 0.7978846, %v1951_v25 }
 0xe3f   :  { %v1952_v28 = vmul.f32 0.7978846, %v1950_v26 }
 0xe40   :  { %2449 = vtanh.f32 %v1953_v27 }
 0xe41   :  { %2451 = vtanh.f32 %v1952_v28 }
 0xe4a   :  { %v2450_v29 = vpop.eup %2449 }
 0xe4b   :  { %v2452_v30 = vpop.eup %2451  ;;  %v1957_v31 = vadd.f32 1.0, %v2450_v29 }
 0xe4c   :  { %v1956_v33 = vadd.f32 1.0, %v2452_v30 }
 0xe4d   :  { %v1959_v36 = vmul.f32 %v1957_v31, %v1943_v34 }
 0xe4e   :  { %v1958_v35 = vmul.f32 %v1956_v33, %v1942_v32 }
 0xe50   :  { %2359 = vmatprep.mubr.msk.f32.mxu0 %vm1975_vm3, %v1958_v35 }
 0xe51   :  { %2360 = vmatmul.mubr.msk.f32.vlgmr.msra.gmra.mrb[14].mxu0 %vm1975_vm3, %v1959_v36 }
 0xf24   :  { %v2361_v38 = vpop.f32.mrb[14].mxu0 }
 0xf25   :  { %v2054_v39 = vadd.f32 %v2361_v38, %v2150_v37  ;;  %v2048_v40 = vpop.f32.mrb[15].mxu0 }
 0xf26   :  { %v2049_v41 = vadd.f32 %v2150_v37, %v2048_v40 }
 0xf27   :  { %v2058_v42 = vadd.f32 %v2054_v39, %v1849_v63 }
 0xf28   :  { %v2057_v7 = vadd.f32 %v2049_v41, %v1848_v62 }
 0xf29   :  { %v2064_v5 = vsel %vm57_vm0, %v2058_v42, 0.0 }
 0xf2a   :  { %2065 = vadd.xlane.f32.xlu1 %v2064_v5  ;;  %v2061_v43 = vsel %vm57_vm0, %v2057_v7, 0.0 }
 0xf2b   :  { %2062 = vadd.xlane.f32.xlu0 %v2061_v43 }
 0xfb7   :  { %v2066_v44 = vpop.xlane.xlu1 %2065 }
 0xfb8   :  { %v2068_v45 = vmul.f32 0.03125, %v2066_v44  ;;  %v2063_v46 = vpop.xlane.xlu0 %2062 }
 0xfb9   :  { %v2067_v47 = vmul.f32 0.03125, %v2063_v46 }
 0xfba   :  { %v2070_v48 = vsub.f32 %v2058_v42, %v2068_v45 }
 0xfbb   :  { %v2069_v49 = vsub.f32 %v2057_v7, %v2067_v47 }
 0xfbc   :  { %v2072_v50 = vmul.f32 %v2070_v48, %v2070_v48 }
 0xfbd   :  { %v2071_v51 = vmul.f32 %v2069_v49, %v2069_v49 }
 0xfbe   :  { %v2076_v52 = vsel %vm57_vm0, %v2072_v50, 0.0 }
 0xfbf   :  { %2077 = vadd.xlane.f32.xlu1 %v2076_v52  ;;  %v2073_v53 = vsel %vm57_vm0, %v2071_v51, 0.0 }
 0xfc0   :  { %2074 = vadd.xlane.f32.xlu0 %v2073_v53 }
0x104c   :  { %v2078_v54 = vpop.xlane.xlu1 %2077 }
0x104d   :  { %v2080_v55 = vmul.f32 0.03125, %v2078_v54  ;;  %v2075_v56 = vpop.xlane.xlu0 %2074 }
0x104e   :  { %v2079_v57 = vmul.f32 0.03125, %v2075_v56 }
0x104f   :  { %v2082_v58 = vadd.f32 1e-05, %v2080_v55 }
0x1050   :  { %v2081_v59 = vadd.f32 1e-05, %v2079_v57 }
0x1051   :  { %2453 = vrsqrt.f32 %v2082_v58 }
0x1052   :  { %2455 = vrsqrt.f32 %v2081_v59 }
0x105b   :  { %v2454_v60 = vpop.eup %2453 }
0x105c   :  { %v2456_v62 = vpop.eup %2455  ;;  %v2086_v63 = vmul.f32 %v2454_v60, %v2070_v48 }
0x105d   :  { %v2085_v1 = vmul.f32 %v2456_v62, %v2069_v49 }
0x105e   :  { %v2094_v2 = vmul.f32 %v2153_v61, %v2086_v63 }
0x105f   :  { %v2093_v3 = vmul.f32 %v2153_v61, %v2085_v1 }
0x1060   :  { %v2102_v4 = vadd.f32 %v2154_v0, %v2094_v2 }
0x1061   :  { %v2101_v6 = vadd.f32 %v2154_v0, %v2093_v3 }
0x1062   :  { %2104 = vst.msk [vmem:[%s2811_s13 + $0x8] sm:$0xff] %vm57_vm0, %v2102_v4 }
0x1063   :  { %2103 = vst.msk [vmem:[%s2811_s13] sm:$0xff] %vm57_vm0, %v2101_v6 }

</bundles_post_ra>
